<compile_context>
chip_gen: v5e
topology: v5e:2x2
jax: 0.10.0
libtpu: 0.0.40
codegen_flags: <defaults>
</compile_context>

<pallas_src>
import functools

import jax
import jax.numpy as jnp
from jax import lax
from jax.experimental import pallas as pl
from jax.experimental.pallas import tpu as pltpu


def _round_up(x, m):
    return (x + m - 1) // m * m


def _vmem_limit_bytes():
    # Never hardcode 64 MiB: that is the entire physical VMEM of a v7x TensorCore.
    try:
        cap = int(pltpu.get_tpu_info().vmem_capacity_bytes)
    except Exception:
        cap = 64 * 1024 * 1024          # conservative fallback (v7x-sized VMEM)
    return int(min(cap * 3 // 4, 100 * 1024 * 1024))


_VMEM_LIMIT = _vmem_limit_bytes()


# ----------------------------------------------------------------------------
# Fused multi-layer GRU kernel ("wavefront"): one grid step per TB-timestep block,
# all layers processed inside the step.  Gate order [r, z, n] matches nn.GRU.
# Hidden states are carried in the constant-index output block hfin_ref (VMEM-
# resident across the sequential grid).  Inter-layer activations stay in VMEM.
# ----------------------------------------------------------------------------
def _gru_stack_kernel(x_ref, h0_ref, wih_ref, whh_ref, bgi_ref, bhn_ref,
                      out_ref, hfin_ref, act_ref, gi_ref,
                      *, seq_len, needs_mask):
    step = pl.program_id(0)

    @pl.when(step == 0)
    def _():
        hfin_ref[...] = h0_ref[...]

    num_layers = wih_ref.shape[0]
    B = h0_ref.shape[1]                     # padded batch (multiple of 8)
    H = h0_ref.shape[2]                     # padded hidden (multiple of 128)
    TB = x_ref.shape[0] // B                # timesteps in this block
    t0 = step * TB                          # global index of first timestep in block

    for l in range(num_layers):             # static: every layer's weights stay resident
        # Block input: embedded tokens for layer 0, previous layer's output (in VMEM) after.
        x_blk = x_ref[...] if l == 0 else act_ref[...].astype(jnp.bfloat16)

        # Hoisted fused input projection for the whole time block: ONE wide MXU dot,
        # block-level bias (b_ih with b_hr/b_hz folded in) added once.
        gi_ref[...] = (jnp.dot(x_blk, wih_ref[l],
                               preferred_element_type=jnp.float32) + bgi_ref[l])

        w_hh = whh_ref[l]                   # (H, 3H) bf16, resident across the time loop
        b_hn = bhn_ref[l]                   # (1, H)  f32 — only per-step bias (inside r*(.))

        def body(t, h):
            lo = pl.multiple_of(t * B, B)   # B % 8 == 0 -> sublane-aligned full tiles
            gh = jnp.dot(h.astype(jnp.bfloat16), w_hh,
                         preferred_element_type=jnp.float32)        # (B, 3H), one dot
            g = gi_ref[pl.ds(lo, B), :]                             # (B, 3H)
            r = jax.nn.sigmoid(g[:, :H] + gh[:, :H])
            z = jax.nn.sigmoid(g[:, H:2 * H] + gh[:, H:2 * H])
            n = jnp.tanh(g[:, 2 * H:] + r * (gh[:, 2 * H:] + b_hn))
            h_new = (1.0 - z) * n + z * h
            if needs_mask:                  # padded tail timesteps leave h unchanged
                h_new = jnp.where(t0 + t < seq_len, h_new, h)
            act_ref[pl.ds(lo, B), :] = h_new            # unmasked (8,128) f32 store
            return h_new

        hfin_ref[l] = lax.fori_loop(0, TB, body, hfin_ref[l], unroll=True)

    # Single bulk lane-dense bf16 writeback of the last layer's block (only HBM output).
    out_ref[...] = act_ref[...].astype(out_ref.dtype)


def gru_stack(x2, h0, w_ih, w_hh, b_gi, b_hn, *, seq_len, time_block):
    """Fused multi-layer GRU over the (padded) sequence.

    x2:   (seq_pad*B_pad, E_pad) bf16, time-major rows (row = t*B_pad + b)
    h0:   (L, B_pad, H_pad) f32   (padded positions MUST be zero)
    w_ih: (L, E_pad, 3*H_pad) bf16  fused [r|z|n] gate slabs, pre-transposed
    w_hh: (L, H_pad, 3*H_pad) bf16
    b_gi: (L, 1, 3*H_pad) f32   b_ih with b_hr/b_hz folded in
    b_hn: (L, 1, H_pad)  f32
    returns: out2 (seq_pad*B_pad, H_pad) bf16 (last layer), h_final (L, B_pad, H_pad) f32
    """
    rows, E_pad = x2.shape
    L, B_pad, H_pad = h0.shape
    seq_pad = rows // B_pad
    tb = time_block
    assert seq_pad % tb == 0 and B_pad % 8 == 0 and H_pad % 128 == 0 and E_pad == H_pad

    kernel = functools.partial(_gru_stack_kernel, seq_len=seq_len,
                               needs_mask=(seq_pad != seq_len))

    # TODO(synk): on v7x, shard B_pad across the two TensorCores with a leading
    # "parallel" grid axis once B_pad >= 16, and mark the constant-index weight
    # specs with pipeline_mode=pl.Buffered(1) to halve their VMEM footprint.
    out2, h_final = pl.pallas_call(
        kernel,
        grid_spec=pltpu.PrefetchScalarGridSpec(
            num_scalar_prefetch=0,
            grid=(seq_pad // tb,),
            in_specs=[
                pl.BlockSpec((tb * B_pad, E_pad), lambda i: (i, 0)),       # x (bf16)
                pl.BlockSpec((L, B_pad, H_pad), lambda i: (0, 0, 0)),      # h0
                pl.BlockSpec((L, E_pad, 3 * H_pad), lambda i: (0, 0, 0)),  # W_ih
                pl.BlockSpec((L, H_pad, 3 * H_pad), lambda i: (0, 0, 0)),  # W_hh
                pl.BlockSpec((L, 1, 3 * H_pad), lambda i: (0, 0, 0)),      # b_gi
                pl.BlockSpec((L, 1, H_pad), lambda i: (0, 0, 0)),          # b_hn
            ],
            out_specs=[
                pl.BlockSpec((tb * B_pad, H_pad), lambda i: (i, 0)),       # last-layer act
                pl.BlockSpec((L, B_pad, H_pad), lambda i: (0, 0, 0)),      # h_final (carried)
            ],
            scratch_shapes=[
                pltpu.VMEM((tb * B_pad, H_pad), jnp.float32),       # inter-layer activations
                pltpu.VMEM((tb * B_pad, 3 * H_pad), jnp.float32),   # hoisted gi projection
            ],
        ),
        out_shape=(
            jax.ShapeDtypeStruct((rows, H_pad), jnp.bfloat16),
            jax.ShapeDtypeStruct((L, B_pad, H_pad), jnp.float32),
        ),
        compiler_params=pltpu.CompilerParams(
            dimension_semantics=("arbitrary",),        # recurrence -> sequential grid
            vmem_limit_bytes=_VMEM_LIMIT),
    )(x2, h0, w_ih, w_hh, b_gi, b_hn)
    return out2, h_final


# ----------------------------------------------------------------------------
# Classifier kernel: one big lane-dense MXU dot per block, time-major output.
# ----------------------------------------------------------------------------
def _classifier_kernel(x_ref, w_ref, b_ref, o_ref):
    o_ref[...] = (jnp.dot(x_ref[...], w_ref[...],
                          preferred_element_type=jnp.float32) + b_ref[...])


def classifier(x2, w_cls, b_cls, *, rows_block):
    """x2: (rows, H_pad) bf16 time-major.  Returns (rows, C_pad) f32."""
    rows, H_pad = x2.shape
    C_pad = w_cls.shape[1]
    assert rows % rows_block == 0
    return pl.pallas_call(
        _classifier_kernel,
        grid_spec=pltpu.PrefetchScalarGridSpec(
            num_scalar_prefetch=0,
            grid=(rows // rows_block,),
            in_specs=[
                pl.BlockSpec((rows_block, H_pad), lambda i: (i, 0)),
                pl.BlockSpec((H_pad, C_pad), lambda i: (0, 0)),
                pl.BlockSpec((1, C_pad), lambda i: (0, 0)),
            ],
            out_specs=pl.BlockSpec((rows_block, C_pad), lambda i: (i, 0)),
        ),
        out_shape=jax.ShapeDtypeStruct((rows, C_pad), jnp.float32),
        compiler_params=pltpu.CompilerParams(
            dimension_semantics=("parallel",),
            vmem_limit_bytes=_VMEM_LIMIT),
    )(x2, w_cls, b_cls)


# ----------------------------------------------------------------------------
# charRNN forward
# ----------------------------------------------------------------------------
def char_rnn_forward(params, x, hs=None, *, num_classes, hidden_size, time_block=16):
    """x: (batch, seq) int32 indices. Returns (logits (batch*seq, C), h_final)."""
    batch, seq = x.shape
    L, H_pad, _ = params["w_hh"].shape
    B_pad = _round_up(batch, 8)
    tb = min(time_block, _round_up(seq, 8))
    seq_pad = _round_up(seq, tb)

    # Hidden state padded to (L, B_pad, H_pad); padded lanes must be zero (keeps the
    # padded hidden positions exactly zero through the recurrence).
    if hs is None:
        h0 = jnp.zeros((L, B_pad, H_pad), jnp.float32)
    else:
        h0 = jnp.zeros((L, B_pad, H_pad), jnp.float32).at[:, :batch, :hidden_size].set(
            hs.astype(jnp.float32))

    # Embedding gather straight into time-major layout (row = t*B_pad + b), bf16.
    x_pad = jnp.pad(x, ((0, B_pad - batch), (0, 0)))             # pad batch rows (idx 0)
    embed = jnp.take(params["embedding"], x_pad.T, axis=0)       # (seq, B_pad, E_pad) bf16
    x2 = embed.reshape(seq * B_pad, H_pad)
    if seq_pad != seq:                                           # masked-tail seq padding
        x2 = jnp.pad(x2, ((0, (seq_pad - seq) * B_pad), (0, 0)))

    # TODO(synk): nn.GRU inter-layer dropout is skipped (inference mode).
    out2, h_final = gru_stack(x2, h0, params["w_ih"], params["w_hh"],
                              params["b_gi"], params["b_hn"],
                              seq_len=seq, time_block=tb)

    logits2 = classifier(out2, params["w_cls"], params["b_cls"],
                         rows_block=tb * B_pad)                  # (seq_pad*B_pad, C_pad)

    # Reorder to PyTorch's flatten order: (batch, seq, C) -> (batch*seq, C).
    logits = logits2.reshape(seq_pad, B_pad, -1)[:seq, :batch, :num_classes]
    logits = jnp.transpose(logits, (1, 0, 2)).reshape(batch * seq, num_classes)

    h_out = h_final[:, :batch, :hidden_size]
    return logits, h_out


# ----------------------------------------------------------------------------
# Parameter init (PyTorch-style distributions), stored in the padded fused layout.
# ----------------------------------------------------------------------------
def init_params(key, num_classes, embed_dim, hidden_size, num_layers):
    H_pad = _round_up(hidden_size, 128)
    C_pad = _round_up(num_classes, 128)
    E_pad = H_pad                       # common input width for every layer's W_ih
    assert embed_dim <= E_pad
    bound = 1.0 / float(hidden_size) ** 0.5

    keys = jax.random.split(key, 3 + 4 * num_layers)

    emb = jax.random.normal(keys[0], (num_classes, embed_dim), jnp.float32)
    embedding = jnp.zeros((num_classes, E_pad), jnp.float32).at[:, :embed_dim].set(emb)

    wih_l, whh_l, bgi_l, bhn_l = [], [], [], []
    for l in range(num_layers):
        in_dim = embed_dim if l == 0 else hidden_size
        k = keys[3 + 4 * l: 3 + 4 * (l + 1)]
        w_ih = jax.random.uniform(k[0], (3, in_dim, hidden_size), jnp.float32, -bound, bound)
        w_hh = jax.random.uniform(k[1], (3, hidden_size, hidden_size), jnp.float32, -bound, bound)
        b_ih = jax.random.uniform(k[2], (3, hidden_size), jnp.float32, -bound, bound)
        b_hh = jax.random.uniform(k[3], (3, hidden_size), jnp.float32, -bound, bound)

        wih_p = jnp.zeros((E_pad, 3 * H_pad), jnp.float32)
        whh_p = jnp.zeros((H_pad, 3 * H_pad), jnp.float32)
        bgi_p = jnp.zeros((1, 3 * H_pad), jnp.float32)
        bhn_p = jnp.zeros((1, H_pad), jnp.float32)
        for g in range(3):              # fused gate slabs [r | z | n], lane-aligned
            c0 = g * H_pad
            wih_p = wih_p.at[:in_dim, c0:c0 + hidden_size].set(w_ih[g])
            whh_p = whh_p.at[:hidden_size, c0:c0 + hidden_size].set(w_hh[g])
        # Fold b_hr / b_hz into the hoisted block-level bias; b_hn stays per-step.
        bgi_p = bgi_p.at[0, 0:hidden_size].set(b_ih[0] + b_hh[0])
        bgi_p = bgi_p.at[0, H_pad:H_pad + hidden_size].set(b_ih[1] + b_hh[1])
        bgi_p = bgi_p.at[0, 2 * H_pad:2 * H_pad + hidden_size].set(b_ih[2])
        bhn_p = bhn_p.at[0, :hidden_size].set(b_hh[2])

        wih_l.append(wih_p); whh_l.append(whh_p)
        bgi_l.append(bgi_p); bhn_l.append(bhn_p)

    kw, kb = jax.random.split(keys[1])
    w_cls = jax.random.uniform(kw, (hidden_size, num_classes), jnp.float32, -bound, bound)
    b_cls = jax.random.uniform(kb, (num_classes,), jnp.float32, -bound, bound)

    return {
        "embedding": embedding.astype(jnp.bfloat16),             # (C, E_pad)
        "w_ih": jnp.stack(wih_l).astype(jnp.bfloat16),           # (L, E_pad, 3*H_pad)
        "w_hh": jnp.stack(whh_l).astype(jnp.bfloat16),           # (L, H_pad, 3*H_pad)
        "b_gi": jnp.stack(bgi_l),                                # (L, 1, 3*H_pad) f32
        "b_hn": jnp.stack(bhn_l),                                # (L, 1, H_pad)  f32
        "w_cls": jnp.zeros((H_pad, C_pad), jnp.float32)
                   .at[:hidden_size, :num_classes].set(w_cls).astype(jnp.bfloat16),
        "b_cls": jnp.zeros((1, C_pad), jnp.float32).at[0, :num_classes].set(b_cls),
    }


if __name__ == "__main__":
    num_classes = 50
    embed_dim = 16
    hidden_size = 32
    num_layers = 2
    batch = 2
    seq = 8

    key = jax.random.PRNGKey(0)
    k_param, k_x = jax.random.split(key)
    params = init_params(k_param, num_classes, embed_dim, hidden_size, num_layers)
    x = jax.random.randint(k_x, (batch, seq), 0, num_classes, jnp.int32)

    fwd = jax.jit(functools.partial(char_rnn_forward, params,
                                    num_classes=num_classes, hidden_size=hidden_size))
    logits, h0 = fwd(x)
    jax.block_until_ready((logits, h0))

    assert logits.shape == (batch * seq, num_classes)
    assert h0.shape == (num_layers, batch, hidden_size)
    print("KERNEL_OK")
</pallas_src>

<mosaic_0001>
module attributes {stable_mosaic.version = 11 : i64} {
  func.func @_classifier_kernel(%arg0: i32, %arg1: memref<64x128xbf16, #tpu.memory_space<vmem>>, %arg2: memref<128x128xbf16, #tpu.memory_space<vmem>>, %arg3: memref<1x128xf32, #tpu.memory_space<vmem>>, %arg4: memref<64x128xf32, #tpu.memory_space<vmem>>) attributes {dimension_semantics = [#tpu.dimension_semantics<parallel>], iteration_bounds = array<i64: 1>, scalar_prefetch = 0 : i64, scratch_operands = 0 : i64, tpu.core_type = #tpu.core_type<tc>, window_params = [{transform_indices = @transform_0, window_bounds = array<i64: 64, 128>}, {pipeline_mode = #tpu.pipeline_mode<synchronous>, transform_indices = @transform_1, window_bounds = array<i64: 128, 128>}, {pipeline_mode = #tpu.pipeline_mode<synchronous>, transform_indices = @transform_2, window_bounds = array<i64: 1, 128>}, {transform_indices = @transform_3, window_bounds = array<i64: 64, 128>}]} {
    %c0 = arith.constant 0 : index
    %c0_0 = arith.constant 0 : index
    %0 = vector.load %arg1[%c0, %c0_0] : memref<64x128xbf16, #tpu.memory_space<vmem>>, vector<64x128xbf16>
    %c0_1 = arith.constant 0 : index
    %c0_2 = arith.constant 0 : index
    %1 = vector.load %arg2[%c0_1, %c0_2] : memref<128x128xbf16, #tpu.memory_space<vmem>>, vector<128x128xbf16>
    %cst = arith.constant dense<0.000000e+00> : vector<64x128xf32>
    %2 = tpu.matmul %0, %1, %cst {dimension_numbers = #tpu.dot_dimension_numbers<[1], [0], [0], [1], [0, 0, 1, 1], [], []>} : vector<64x128xbf16>, vector<128x128xbf16>, vector<64x128xf32> -> vector<64x128xf32>
    %c0_3 = arith.constant 0 : index
    %c0_4 = arith.constant 0 : index
    %3 = vector.load %arg3[%c0_3, %c0_4] : memref<1x128xf32, #tpu.memory_space<vmem>>, vector<1x128xf32>
    %4 = vector.broadcast %3 : vector<1x128xf32> to vector<64x128xf32>
    %5 = arith.addf %2, %4 : vector<64x128xf32>
    %c0_5 = arith.constant 0 : index
    %c0_6 = arith.constant 0 : index
    %6 = vector.load %arg4[%c0_5, %c0_6] : memref<64x128xf32, #tpu.memory_space<vmem>>, vector<64x128xf32>
    tpu.vector_store %arg4[%c0_5, %c0_6], %5 {strides = array<i32>} : memref<64x128xf32, #tpu.memory_space<vmem>>, vector<64x128xf32>,
    return
  }
  func.func @transform_0(%arg0: i32) -> (i32, i32) {
    %c0_i32 = arith.constant 0 : i32
    %c0_i32_0 = arith.constant 0 : i32
    return %arg0, %c0_i32 : i32, i32
  }
  func.func @transform_1(%arg0: i32) -> (i32, i32) {
    %c0_i32 = arith.constant 0 : i32
    %c0_i32_0 = arith.constant 0 : i32
    %c0_i32_1 = arith.constant 0 : i32
    return %c0_i32, %c0_i32_0 : i32, i32
  }
  func.func @transform_2(%arg0: i32) -> (i32, i32) {
    %c0_i32 = arith.constant 0 : i32
    %c0_i32_0 = arith.constant 0 : i32
    %c0_i32_1 = arith.constant 0 : i32
    return %c0_i32, %c0_i32_0 : i32, i32
  }
  func.func @transform_3(%arg0: i32) -> (i32, i32) {
    %c0_i32 = arith.constant 0 : i32
    %c0_i32_0 = arith.constant 0 : i32
    return %arg0, %c0_i32 : i32, i32
  }
}

module attributes {stable_mosaic.version = 11 : i64} {
  func.func @_gru_stack_kernel(%arg0: i32, %arg1: memref<64x128xbf16, #tpu.memory_space<vmem>>, %arg2: memref<2x8x128xf32, #tpu.memory_space<vmem>>, %arg3: memref<2x128x384xbf16, #tpu.memory_space<vmem>>, %arg4: memref<2x128x384xbf16, #tpu.memory_space<vmem>>, %arg5: memref<2x1x384xf32, #tpu.memory_space<vmem>>, %arg6: memref<2x1x128xf32, #tpu.memory_space<vmem>>, %arg7: memref<64x128xbf16, #tpu.memory_space<vmem>>, %arg8: memref<2x8x128xf32, #tpu.memory_space<vmem>>, %arg9: memref<64x128xf32, #tpu.memory_space<vmem>>, %arg10: memref<64x384xf32, #tpu.memory_space<vmem>>) attributes {dimension_semantics = [#tpu.dimension_semantics<arbitrary>], iteration_bounds = array<i64: 1>, scalar_prefetch = 0 : i64, scratch_operands = 2 : i64, tpu.core_type = #tpu.core_type<tc>, window_params = [{transform_indices = @transform_0, window_bounds = array<i64: 64, 128>}, {pipeline_mode = #tpu.pipeline_mode<synchronous>, transform_indices = @transform_1, window_bounds = array<i64: 2, 8, 128>}, {pipeline_mode = #tpu.pipeline_mode<synchronous>, transform_indices = @transform_2, window_bounds = array<i64: 2, 128, 384>}, {pipeline_mode = #tpu.pipeline_mode<synchronous>, transform_indices = @transform_3, window_bounds = array<i64: 2, 128, 384>}, {pipeline_mode = #tpu.pipeline_mode<synchronous>, transform_indices = @transform_4, window_bounds = array<i64: 2, 1, 384>}, {pipeline_mode = #tpu.pipeline_mode<synchronous>, transform_indices = @transform_5, window_bounds = array<i64: 2, 1, 128>}, {transform_indices = @transform_6, window_bounds = array<i64: 64, 128>}, {pipeline_mode = #tpu.pipeline_mode<synchronous>, transform_indices = @transform_7, window_bounds = array<i64: 2, 8, 128>}]} {
    %c0_i32 = arith.constant 0 : i32
    %0 = arith.cmpi eq, %arg0, %c0_i32 : i32
    %1 = arith.extui %0 : i1 to i32
    %c0_i32_0 = arith.constant 0 : i32
    %2 = arith.cmpi ne, %1, %c0_i32_0 : i32
    scf.if %2 {
      %c0_170 = arith.constant 0 : index
      %c0_171 = arith.constant 0 : index
      %c0_172 = arith.constant 0 : index
      %619 = vector.load %arg2[%c0_170, %c0_171, %c0_172] : memref<2x8x128xf32, #tpu.memory_space<vmem>>, vector<2x8x128xf32>
      %c0_173 = arith.constant 0 : index
      %c0_174 = arith.constant 0 : index
      %c0_175 = arith.constant 0 : index
      %620 = vector.load %arg8[%c0_173, %c0_174, %c0_175] : memref<2x8x128xf32, #tpu.memory_space<vmem>>, vector<2x8x128xf32>
      tpu.vector_store %arg8[%c0_173, %c0_174, %c0_175], %619 {strides = array<i32>} : memref<2x8x128xf32, #tpu.memory_space<vmem>>, vector<2x8x128xf32>,
    } else {
    }
    %c0 = arith.constant 0 : index
    %c0_1 = arith.constant 0 : index
    %3 = vector.load %arg1[%c0, %c0_1] : memref<64x128xbf16, #tpu.memory_space<vmem>>, vector<64x128xbf16>
    %c0_2 = arith.constant 0 : index
    %c0_3 = arith.constant 0 : index
    %c0_4 = arith.constant 0 : index
    %4 = vector.load %arg3[%c0_2, %c0_3, %c0_4] : memref<2x128x384xbf16, #tpu.memory_space<vmem>>, vector<1x128x384xbf16>
    %5 = vector.shape_cast %4 : vector<1x128x384xbf16> to vector<128x384xbf16>
    %cst = arith.constant dense<0.000000e+00> : vector<64x384xf32>
    %6 = tpu.matmul %3, %5, %cst {dimension_numbers = #tpu.dot_dimension_numbers<[1], [0], [0], [1], [0, 0, 1, 1], [], []>} : vector<64x128xbf16>, vector<128x384xbf16>, vector<64x384xf32> -> vector<64x384xf32>
    %c0_5 = arith.constant 0 : index
    %c0_6 = arith.constant 0 : index
    %c0_7 = arith.constant 0 : index
    %7 = vector.load %arg5[%c0_5, %c0_6, %c0_7] : memref<2x1x384xf32, #tpu.memory_space<vmem>>, vector<1x1x384xf32>
    %8 = vector.shape_cast %7 : vector<1x1x384xf32> to vector<1x384xf32>
    %9 = vector.broadcast %8 : vector<1x384xf32> to vector<64x384xf32>
    %10 = arith.addf %6, %9 : vector<64x384xf32>
    %c0_8 = arith.constant 0 : index
    %c0_9 = arith.constant 0 : index
    %11 = vector.load %arg10[%c0_8, %c0_9] : memref<64x384xf32, #tpu.memory_space<vmem>>, vector<64x384xf32>
    tpu.vector_store %arg10[%c0_8, %c0_9], %10 {strides = array<i32>} : memref<64x384xf32, #tpu.memory_space<vmem>>, vector<64x384xf32>,
    %c0_10 = arith.constant 0 : index
    %c0_11 = arith.constant 0 : index
    %c0_12 = arith.constant 0 : index
    %12 = vector.load %arg4[%c0_10, %c0_11, %c0_12] : memref<2x128x384xbf16, #tpu.memory_space<vmem>>, vector<1x128x384xbf16>
    %13 = vector.shape_cast %12 : vector<1x128x384xbf16> to vector<128x384xbf16>
    %c0_13 = arith.constant 0 : index
    %c0_14 = arith.constant 0 : index
    %c0_15 = arith.constant 0 : index
    %14 = vector.load %arg6[%c0_13, %c0_14, %c0_15] : memref<2x1x128xf32, #tpu.memory_space<vmem>>, vector<1x1x128xf32>
    %15 = vector.shape_cast %14 : vector<1x1x128xf32> to vector<1x128xf32>
    %c0_16 = arith.constant 0 : index
    %c0_17 = arith.constant 0 : index
    %c0_18 = arith.constant 0 : index
    %16 = vector.load %arg8[%c0_16, %c0_17, %c0_18] : memref<2x8x128xf32, #tpu.memory_space<vmem>>, vector<1x8x128xf32>
    %17 = vector.shape_cast %16 : vector<1x8x128xf32> to vector<8x128xf32>
    %c0_i32_19 = arith.constant 0 : i32
    %c8_i32 = arith.constant 8 : i32
    %18 = arith.muli %c0_i32_19, %c8_i32 : i32
    %19 = tpu.assume_multiple %18, 8 : i32
    %20 = arith.truncf %17 : vector<8x128xf32> to vector<8x128xbf16>
    %cst_20 = arith.constant dense<0.000000e+00> : vector<8x384xf32>
    %21 = tpu.matmul %20, %13, %cst_20 {dimension_numbers = #tpu.dot_dimension_numbers<[1], [0], [0], [1], [0, 0, 1, 1], [], []>} : vector<8x128xbf16>, vector<128x384xbf16>, vector<8x384xf32> -> vector<8x384xf32>
    %22 = arith.index_cast %19 : i32 to index
    %c0_21 = arith.constant 0 : index
    %23 = vector.load %arg10[%22, %c0_21] : memref<64x384xf32, #tpu.memory_space<vmem>>, vector<8x384xf32>
    %24 = vector.extract_strided_slice %23 {offsets = [0, 0], sizes = [8, 128], strides = [1, 1]} : vector<8x384xf32> to vector<8x128xf32>
    %25 = vector.extract_strided_slice %21 {offsets = [0, 0], sizes = [8, 128], strides = [1, 1]} : vector<8x384xf32> to vector<8x128xf32>
    %26 = arith.addf %24, %25 : vector<8x128xf32>
    %27 = arith.negf %26 : vector<8x128xf32>
    %28 = math.exp %27 : vector<8x128xf32>
    %cst_22 = arith.constant 1.000000e+00 : f32
    %29 = vector.broadcast %cst_22 : f32 to vector<8x128xf32>
    %30 = arith.addf %29, %28 : vector<8x128xf32>
    %31 = arith.divf %29, %30 : vector<8x128xf32>
    %32 = vector.extract_strided_slice %23 {offsets = [0, 128], sizes = [8, 128], strides = [1, 1]} : vector<8x384xf32> to vector<8x128xf32>
    %33 = vector.extract_strided_slice %21 {offsets = [0, 128], sizes = [8, 128], strides = [1, 1]} : vector<8x384xf32> to vector<8x128xf32>
    %34 = arith.addf %32, %33 : vector<8x128xf32>
    %35 = arith.negf %34 : vector<8x128xf32>
    %36 = math.exp %35 : vector<8x128xf32>
    %cst_23 = arith.constant 1.000000e+00 : f32
    %37 = vector.broadcast %cst_23 : f32 to vector<8x128xf32>
    %38 = arith.addf %37, %36 : vector<8x128xf32>
    %39 = arith.divf %37, %38 : vector<8x128xf32>
    %40 = vector.extract_strided_slice %23 {offsets = [0, 256], sizes = [8, 128], strides = [1, 1]} : vector<8x384xf32> to vector<8x128xf32>
    %41 = vector.extract_strided_slice %21 {offsets = [0, 256], sizes = [8, 128], strides = [1, 1]} : vector<8x384xf32> to vector<8x128xf32>
    %42 = vector.broadcast %15 : vector<1x128xf32> to vector<8x128xf32>
    %43 = arith.addf %41, %42 : vector<8x128xf32>
    %44 = arith.mulf %31, %43 : vector<8x128xf32>
    %45 = arith.addf %40, %44 : vector<8x128xf32>
    %46 = math.tanh %45 : vector<8x128xf32>
    %cst_24 = arith.constant 1.000000e+00 : f32
    %47 = vector.broadcast %cst_24 : f32 to vector<8x128xf32>
    %48 = arith.subf %47, %39 : vector<8x128xf32>
    %49 = arith.mulf %48, %46 : vector<8x128xf32>
    %50 = arith.mulf %39, %17 : vector<8x128xf32>
    %51 = arith.addf %49, %50 : vector<8x128xf32>
    %52 = arith.index_cast %19 : i32 to index
    %c0_25 = arith.constant 0 : index
    %53 = vector.load %arg9[%52, %c0_25] : memref<64x128xf32, #tpu.memory_space<vmem>>, vector<8x128xf32>
    tpu.vector_store %arg9[%52, %c0_25], %51 {strides = array<i32>} : memref<64x128xf32, #tpu.memory_space<vmem>>, vector<8x128xf32>,
    %c1_i32 = arith.constant 1 : i32
    %c8_i32_26 = arith.constant 8 : i32
    %54 = arith.muli %c1_i32, %c8_i32_26 : i32
    %55 = tpu.assume_multiple %54, 8 : i32
    %56 = arith.truncf %51 : vector<8x128xf32> to vector<8x128xbf16>
    %cst_27 = arith.constant dense<0.000000e+00> : vector<8x384xf32>
    %57 = tpu.matmul %56, %13, %cst_27 {dimension_numbers = #tpu.dot_dimension_numbers<[1], [0], [0], [1], [0, 0, 1, 1], [], []>} : vector<8x128xbf16>, vector<128x384xbf16>, vector<8x384xf32> -> vector<8x384xf32>
    %58 = arith.index_cast %55 : i32 to index
    %c0_28 = arith.constant 0 : index
    %59 = vector.load %arg10[%58, %c0_28] : memref<64x384xf32, #tpu.memory_space<vmem>>, vector<8x384xf32>
    %60 = vector.extract_strided_slice %59 {offsets = [0, 0], sizes = [8, 128], strides = [1, 1]} : vector<8x384xf32> to vector<8x128xf32>
    %61 = vector.extract_strided_slice %57 {offsets = [0, 0], sizes = [8, 128], strides = [1, 1]} : vector<8x384xf32> to vector<8x128xf32>
    %62 = arith.addf %60, %61 : vector<8x128xf32>
    %63 = arith.negf %62 : vector<8x128xf32>
    %64 = math.exp %63 : vector<8x128xf32>
    %cst_29 = arith.constant 1.000000e+00 : f32
    %65 = vector.broadcast %cst_29 : f32 to vector<8x128xf32>
    %66 = arith.addf %65, %64 : vector<8x128xf32>
    %67 = arith.divf %65, %66 : vector<8x128xf32>
    %68 = vector.extract_strided_slice %59 {offsets = [0, 128], sizes = [8, 128], strides = [1, 1]} : vector<8x384xf32> to vector<8x128xf32>
    %69 = vector.extract_strided_slice %57 {offsets = [0, 128], sizes = [8, 128], strides = [1, 1]} : vector<8x384xf32> to vector<8x128xf32>
    %70 = arith.addf %68, %69 : vector<8x128xf32>
    %71 = arith.negf %70 : vector<8x128xf32>
    %72 = math.exp %71 : vector<8x128xf32>
    %cst_30 = arith.constant 1.000000e+00 : f32
    %73 = vector.broadcast %cst_30 : f32 to vector<8x128xf32>
    %74 = arith.addf %73, %72 : vector<8x128xf32>
    %75 = arith.divf %73, %74 : vector<8x128xf32>
    %76 = vector.extract_strided_slice %59 {offsets = [0, 256], sizes = [8, 128], strides = [1, 1]} : vector<8x384xf32> to vector<8x128xf32>
    %77 = vector.extract_strided_slice %57 {offsets = [0, 256], sizes = [8, 128], strides = [1, 1]} : vector<8x384xf32> to vector<8x128xf32>
    %78 = vector.broadcast %15 : vector<1x128xf32> to vector<8x128xf32>
    %79 = arith.addf %77, %78 : vector<8x128xf32>
    %80 = arith.mulf %67, %79 : vector<8x128xf32>
    %81 = arith.addf %76, %80 : vector<8x128xf32>
    %82 = math.tanh %81 : vector<8x128xf32>
    %cst_31 = arith.constant 1.000000e+00 : f32
    %83 = vector.broadcast %cst_31 : f32 to vector<8x128xf32>
    %84 = arith.subf %83, %75 : vector<8x128xf32>
    %85 = arith.mulf %84, %82 : vector<8x128xf32>
    %86 = arith.mulf %75, %51 : vector<8x128xf32>
    %87 = arith.addf %85, %86 : vector<8x128xf32>
    %88 = arith.index_cast %55 : i32 to index
    %c0_32 = arith.constant 0 : index
    %89 = vector.load %arg9[%88, %c0_32] : memref<64x128xf32, #tpu.memory_space<vmem>>, vector<8x128xf32>
    tpu.vector_store %arg9[%88, %c0_32], %87 {strides = array<i32>} : memref<64x128xf32, #tpu.memory_space<vmem>>, vector<8x128xf32>,
    %c2_i32 = arith.constant 2 : i32
    %c8_i32_33 = arith.constant 8 : i32
    %90 = arith.muli %c2_i32, %c8_i32_33 : i32
    %91 = tpu.assume_multiple %90, 8 : i32
    %92 = arith.truncf %87 : vector<8x128xf32> to vector<8x128xbf16>
    %cst_34 = arith.constant dense<0.000000e+00> : vector<8x384xf32>
    %93 = tpu.matmul %92, %13, %cst_34 {dimension_numbers = #tpu.dot_dimension_numbers<[1], [0], [0], [1], [0, 0, 1, 1], [], []>} : vector<8x128xbf16>, vector<128x384xbf16>, vector<8x384xf32> -> vector<8x384xf32>
    %94 = arith.index_cast %91 : i32 to index
    %c0_35 = arith.constant 0 : index
    %95 = vector.load %arg10[%94, %c0_35] : memref<64x384xf32, #tpu.memory_space<vmem>>, vector<8x384xf32>
    %96 = vector.extract_strided_slice %95 {offsets = [0, 0], sizes = [8, 128], strides = [1, 1]} : vector<8x384xf32> to vector<8x128xf32>
    %97 = vector.extract_strided_slice %93 {offsets = [0, 0], sizes = [8, 128], strides = [1, 1]} : vector<8x384xf32> to vector<8x128xf32>
    %98 = arith.addf %96, %97 : vector<8x128xf32>
    %99 = arith.negf %98 : vector<8x128xf32>
    %100 = math.exp %99 : vector<8x128xf32>
    %cst_36 = arith.constant 1.000000e+00 : f32
    %101 = vector.broadcast %cst_36 : f32 to vector<8x128xf32>
    %102 = arith.addf %101, %100 : vector<8x128xf32>
    %103 = arith.divf %101, %102 : vector<8x128xf32>
    %104 = vector.extract_strided_slice %95 {offsets = [0, 128], sizes = [8, 128], strides = [1, 1]} : vector<8x384xf32> to vector<8x128xf32>
    %105 = vector.extract_strided_slice %93 {offsets = [0, 128], sizes = [8, 128], strides = [1, 1]} : vector<8x384xf32> to vector<8x128xf32>
    %106 = arith.addf %104, %105 : vector<8x128xf32>
    %107 = arith.negf %106 : vector<8x128xf32>
    %108 = math.exp %107 : vector<8x128xf32>
    %cst_37 = arith.constant 1.000000e+00 : f32
    %109 = vector.broadcast %cst_37 : f32 to vector<8x128xf32>
    %110 = arith.addf %109, %108 : vector<8x128xf32>
    %111 = arith.divf %109, %110 : vector<8x128xf32>
    %112 = vector.extract_strided_slice %95 {offsets = [0, 256], sizes = [8, 128], strides = [1, 1]} : vector<8x384xf32> to vector<8x128xf32>
    %113 = vector.extract_strided_slice %93 {offsets = [0, 256], sizes = [8, 128], strides = [1, 1]} : vector<8x384xf32> to vector<8x128xf32>
    %114 = vector.broadcast %15 : vector<1x128xf32> to vector<8x128xf32>
    %115 = arith.addf %113, %114 : vector<8x128xf32>
    %116 = arith.mulf %103, %115 : vector<8x128xf32>
    %117 = arith.addf %112, %116 : vector<8x128xf32>
    %118 = math.tanh %117 : vector<8x128xf32>
    %cst_38 = arith.constant 1.000000e+00 : f32
    %119 = vector.broadcast %cst_38 : f32 to vector<8x128xf32>
    %120 = arith.subf %119, %111 : vector<8x128xf32>
    %121 = arith.mulf %120, %118 : vector<8x128xf32>
    %122 = arith.mulf %111, %87 : vector<8x128xf32>
    %123 = arith.addf %121, %122 : vector<8x128xf32>
    %124 = arith.index_cast %91 : i32 to index
    %c0_39 = arith.constant 0 : index
    %125 = vector.load %arg9[%124, %c0_39] : memref<64x128xf32, #tpu.memory_space<vmem>>, vector<8x128xf32>
    tpu.vector_store %arg9[%124, %c0_39], %123 {strides = array<i32>} : memref<64x128xf32, #tpu.memory_space<vmem>>, vector<8x128xf32>,
    %c3_i32 = arith.constant 3 : i32
    %c8_i32_40 = arith.constant 8 : i32
    %126 = arith.muli %c3_i32, %c8_i32_40 : i32
    %127 = tpu.assume_multiple %126, 8 : i32
    %128 = arith.truncf %123 : vector<8x128xf32> to vector<8x128xbf16>
    %cst_41 = arith.constant dense<0.000000e+00> : vector<8x384xf32>
    %129 = tpu.matmul %128, %13, %cst_41 {dimension_numbers = #tpu.dot_dimension_numbers<[1], [0], [0], [1], [0, 0, 1, 1], [], []>} : vector<8x128xbf16>, vector<128x384xbf16>, vector<8x384xf32> -> vector<8x384xf32>
    %130 = arith.index_cast %127 : i32 to index
    %c0_42 = arith.constant 0 : index
    %131 = vector.load %arg10[%130, %c0_42] : memref<64x384xf32, #tpu.memory_space<vmem>>, vector<8x384xf32>
    %132 = vector.extract_strided_slice %131 {offsets = [0, 0], sizes = [8, 128], strides = [1, 1]} : vector<8x384xf32> to vector<8x128xf32>
    %133 = vector.extract_strided_slice %129 {offsets = [0, 0], sizes = [8, 128], strides = [1, 1]} : vector<8x384xf32> to vector<8x128xf32>
    %134 = arith.addf %132, %133 : vector<8x128xf32>
    %135 = arith.negf %134 : vector<8x128xf32>
    %136 = math.exp %135 : vector<8x128xf32>
    %cst_43 = arith.constant 1.000000e+00 : f32
    %137 = vector.broadcast %cst_43 : f32 to vector<8x128xf32>
    %138 = arith.addf %137, %136 : vector<8x128xf32>
    %139 = arith.divf %137, %138 : vector<8x128xf32>
    %140 = vector.extract_strided_slice %131 {offsets = [0, 128], sizes = [8, 128], strides = [1, 1]} : vector<8x384xf32> to vector<8x128xf32>
    %141 = vector.extract_strided_slice %129 {offsets = [0, 128], sizes = [8, 128], strides = [1, 1]} : vector<8x384xf32> to vector<8x128xf32>
    %142 = arith.addf %140, %141 : vector<8x128xf32>
    %143 = arith.negf %142 : vector<8x128xf32>
    %144 = math.exp %143 : vector<8x128xf32>
    %cst_44 = arith.constant 1.000000e+00 : f32
    %145 = vector.broadcast %cst_44 : f32 to vector<8x128xf32>
    %146 = arith.addf %145, %144 : vector<8x128xf32>
    %147 = arith.divf %145, %146 : vector<8x128xf32>
    %148 = vector.extract_strided_slice %131 {offsets = [0, 256], sizes = [8, 128], strides = [1, 1]} : vector<8x384xf32> to vector<8x128xf32>
    %149 = vector.extract_strided_slice %129 {offsets = [0, 256], sizes = [8, 128], strides = [1, 1]} : vector<8x384xf32> to vector<8x128xf32>
    %150 = vector.broadcast %15 : vector<1x128xf32> to vector<8x128xf32>
    %151 = arith.addf %149, %150 : vector<8x128xf32>
    %152 = arith.mulf %139, %151 : vector<8x128xf32>
    %153 = arith.addf %148, %152 : vector<8x128xf32>
    %154 = math.tanh %153 : vector<8x128xf32>
    %cst_45 = arith.constant 1.000000e+00 : f32
    %155 = vector.broadcast %cst_45 : f32 to vector<8x128xf32>
    %156 = arith.subf %155, %147 : vector<8x128xf32>
    %157 = arith.mulf %156, %154 : vector<8x128xf32>
    %158 = arith.mulf %147, %123 : vector<8x128xf32>
    %159 = arith.addf %157, %158 : vector<8x128xf32>
    %160 = arith.index_cast %127 : i32 to index
    %c0_46 = arith.constant 0 : index
    %161 = vector.load %arg9[%160, %c0_46] : memref<64x128xf32, #tpu.memory_space<vmem>>, vector<8x128xf32>
    tpu.vector_store %arg9[%160, %c0_46], %159 {strides = array<i32>} : memref<64x128xf32, #tpu.memory_space<vmem>>, vector<8x128xf32>,
    %c4_i32 = arith.constant 4 : i32
    %c8_i32_47 = arith.constant 8 : i32
    %162 = arith.muli %c4_i32, %c8_i32_47 : i32
    %163 = tpu.assume_multiple %162, 8 : i32
    %164 = arith.truncf %159 : vector<8x128xf32> to vector<8x128xbf16>
    %cst_48 = arith.constant dense<0.000000e+00> : vector<8x384xf32>
    %165 = tpu.matmul %164, %13, %cst_48 {dimension_numbers = #tpu.dot_dimension_numbers<[1], [0], [0], [1], [0, 0, 1, 1], [], []>} : vector<8x128xbf16>, vector<128x384xbf16>, vector<8x384xf32> -> vector<8x384xf32>
    %166 = arith.index_cast %163 : i32 to index
    %c0_49 = arith.constant 0 : index
    %167 = vector.load %arg10[%166, %c0_49] : memref<64x384xf32, #tpu.memory_space<vmem>>, vector<8x384xf32>
    %168 = vector.extract_strided_slice %167 {offsets = [0, 0], sizes = [8, 128], strides = [1, 1]} : vector<8x384xf32> to vector<8x128xf32>
    %169 = vector.extract_strided_slice %165 {offsets = [0, 0], sizes = [8, 128], strides = [1, 1]} : vector<8x384xf32> to vector<8x128xf32>
    %170 = arith.addf %168, %169 : vector<8x128xf32>
    %171 = arith.negf %170 : vector<8x128xf32>
    %172 = math.exp %171 : vector<8x128xf32>
    %cst_50 = arith.constant 1.000000e+00 : f32
    %173 = vector.broadcast %cst_50 : f32 to vector<8x128xf32>
    %174 = arith.addf %173, %172 : vector<8x128xf32>
    %175 = arith.divf %173, %174 : vector<8x128xf32>
    %176 = vector.extract_strided_slice %167 {offsets = [0, 128], sizes = [8, 128], strides = [1, 1]} : vector<8x384xf32> to vector<8x128xf32>
    %177 = vector.extract_strided_slice %165 {offsets = [0, 128], sizes = [8, 128], strides = [1, 1]} : vector<8x384xf32> to vector<8x128xf32>
    %178 = arith.addf %176, %177 : vector<8x128xf32>
    %179 = arith.negf %178 : vector<8x128xf32>
    %180 = math.exp %179 : vector<8x128xf32>
    %cst_51 = arith.constant 1.000000e+00 : f32
    %181 = vector.broadcast %cst_51 : f32 to vector<8x128xf32>
    %182 = arith.addf %181, %180 : vector<8x128xf32>
    %183 = arith.divf %181, %182 : vector<8x128xf32>
    %184 = vector.extract_strided_slice %167 {offsets = [0, 256], sizes = [8, 128], strides = [1, 1]} : vector<8x384xf32> to vector<8x128xf32>
    %185 = vector.extract_strided_slice %165 {offsets = [0, 256], sizes = [8, 128], strides = [1, 1]} : vector<8x384xf32> to vector<8x128xf32>
    %186 = vector.broadcast %15 : vector<1x128xf32> to vector<8x128xf32>
    %187 = arith.addf %185, %186 : vector<8x128xf32>
    %188 = arith.mulf %175, %187 : vector<8x128xf32>
    %189 = arith.addf %184, %188 : vector<8x128xf32>
    %190 = math.tanh %189 : vector<8x128xf32>
    %cst_52 = arith.constant 1.000000e+00 : f32
    %191 = vector.broadcast %cst_52 : f32 to vector<8x128xf32>
    %192 = arith.subf %191, %183 : vector<8x128xf32>
    %193 = arith.mulf %192, %190 : vector<8x128xf32>
    %194 = arith.mulf %183, %159 : vector<8x128xf32>
    %195 = arith.addf %193, %194 : vector<8x128xf32>
    %196 = arith.index_cast %163 : i32 to index
    %c0_53 = arith.constant 0 : index
    %197 = vector.load %arg9[%196, %c0_53] : memref<64x128xf32, #tpu.memory_space<vmem>>, vector<8x128xf32>
    tpu.vector_store %arg9[%196, %c0_53], %195 {strides = array<i32>} : memref<64x128xf32, #tpu.memory_space<vmem>>, vector<8x128xf32>,
    %c5_i32 = arith.constant 5 : i32
    %c8_i32_54 = arith.constant 8 : i32
    %198 = arith.muli %c5_i32, %c8_i32_54 : i32
    %199 = tpu.assume_multiple %198, 8 : i32
    %200 = arith.truncf %195 : vector<8x128xf32> to vector<8x128xbf16>
    %cst_55 = arith.constant dense<0.000000e+00> : vector<8x384xf32>
    %201 = tpu.matmul %200, %13, %cst_55 {dimension_numbers = #tpu.dot_dimension_numbers<[1], [0], [0], [1], [0, 0, 1, 1], [], []>} : vector<8x128xbf16>, vector<128x384xbf16>, vector<8x384xf32> -> vector<8x384xf32>
    %202 = arith.index_cast %199 : i32 to index
    %c0_56 = arith.constant 0 : index
    %203 = vector.load %arg10[%202, %c0_56] : memref<64x384xf32, #tpu.memory_space<vmem>>, vector<8x384xf32>
    %204 = vector.extract_strided_slice %203 {offsets = [0, 0], sizes = [8, 128], strides = [1, 1]} : vector<8x384xf32> to vector<8x128xf32>
    %205 = vector.extract_strided_slice %201 {offsets = [0, 0], sizes = [8, 128], strides = [1, 1]} : vector<8x384xf32> to vector<8x128xf32>
    %206 = arith.addf %204, %205 : vector<8x128xf32>
    %207 = arith.negf %206 : vector<8x128xf32>
    %208 = math.exp %207 : vector<8x128xf32>
    %cst_57 = arith.constant 1.000000e+00 : f32
    %209 = vector.broadcast %cst_57 : f32 to vector<8x128xf32>
    %210 = arith.addf %209, %208 : vector<8x128xf32>
    %211 = arith.divf %209, %210 : vector<8x128xf32>
    %212 = vector.extract_strided_slice %203 {offsets = [0, 128], sizes = [8, 128], strides = [1, 1]} : vector<8x384xf32> to vector<8x128xf32>
    %213 = vector.extract_strided_slice %201 {offsets = [0, 128], sizes = [8, 128], strides = [1, 1]} : vector<8x384xf32> to vector<8x128xf32>
    %214 = arith.addf %212, %213 : vector<8x128xf32>
    %215 = arith.negf %214 : vector<8x128xf32>
    %216 = math.exp %215 : vector<8x128xf32>
    %cst_58 = arith.constant 1.000000e+00 : f32
    %217 = vector.broadcast %cst_58 : f32 to vector<8x128xf32>
    %218 = arith.addf %217, %216 : vector<8x128xf32>
    %219 = arith.divf %217, %218 : vector<8x128xf32>
    %220 = vector.extract_strided_slice %203 {offsets = [0, 256], sizes = [8, 128], strides = [1, 1]} : vector<8x384xf32> to vector<8x128xf32>
    %221 = vector.extract_strided_slice %201 {offsets = [0, 256], sizes = [8, 128], strides = [1, 1]} : vector<8x384xf32> to vector<8x128xf32>
    %222 = vector.broadcast %15 : vector<1x128xf32> to vector<8x128xf32>
    %223 = arith.addf %221, %222 : vector<8x128xf32>
    %224 = arith.mulf %211, %223 : vector<8x128xf32>
    %225 = arith.addf %220, %224 : vector<8x128xf32>
    %226 = math.tanh %225 : vector<8x128xf32>
    %cst_59 = arith.constant 1.000000e+00 : f32
    %227 = vector.broadcast %cst_59 : f32 to vector<8x128xf32>
    %228 = arith.subf %227, %219 : vector<8x128xf32>
    %229 = arith.mulf %228, %226 : vector<8x128xf32>
    %230 = arith.mulf %219, %195 : vector<8x128xf32>
    %231 = arith.addf %229, %230 : vector<8x128xf32>
    %232 = arith.index_cast %199 : i32 to index
    %c0_60 = arith.constant 0 : index
    %233 = vector.load %arg9[%232, %c0_60] : memref<64x128xf32, #tpu.memory_space<vmem>>, vector<8x128xf32>
    tpu.vector_store %arg9[%232, %c0_60], %231 {strides = array<i32>} : memref<64x128xf32, #tpu.memory_space<vmem>>, vector<8x128xf32>,
    %c6_i32 = arith.constant 6 : i32
    %c8_i32_61 = arith.constant 8 : i32
    %234 = arith.muli %c6_i32, %c8_i32_61 : i32
    %235 = tpu.assume_multiple %234, 8 : i32
    %236 = arith.truncf %231 : vector<8x128xf32> to vector<8x128xbf16>
    %cst_62 = arith.constant dense<0.000000e+00> : vector<8x384xf32>
    %237 = tpu.matmul %236, %13, %cst_62 {dimension_numbers = #tpu.dot_dimension_numbers<[1], [0], [0], [1], [0, 0, 1, 1], [], []>} : vector<8x128xbf16>, vector<128x384xbf16>, vector<8x384xf32> -> vector<8x384xf32>
    %238 = arith.index_cast %235 : i32 to index
    %c0_63 = arith.constant 0 : index
    %239 = vector.load %arg10[%238, %c0_63] : memref<64x384xf32, #tpu.memory_space<vmem>>, vector<8x384xf32>
    %240 = vector.extract_strided_slice %239 {offsets = [0, 0], sizes = [8, 128], strides = [1, 1]} : vector<8x384xf32> to vector<8x128xf32>
    %241 = vector.extract_strided_slice %237 {offsets = [0, 0], sizes = [8, 128], strides = [1, 1]} : vector<8x384xf32> to vector<8x128xf32>
    %242 = arith.addf %240, %241 : vector<8x128xf32>
    %243 = arith.negf %242 : vector<8x128xf32>
    %244 = math.exp %243 : vector<8x128xf32>
    %cst_64 = arith.constant 1.000000e+00 : f32
    %245 = vector.broadcast %cst_64 : f32 to vector<8x128xf32>
    %246 = arith.addf %245, %244 : vector<8x128xf32>
    %247 = arith.divf %245, %246 : vector<8x128xf32>
    %248 = vector.extract_strided_slice %239 {offsets = [0, 128], sizes = [8, 128], strides = [1, 1]} : vector<8x384xf32> to vector<8x128xf32>
    %249 = vector.extract_strided_slice %237 {offsets = [0, 128], sizes = [8, 128], strides = [1, 1]} : vector<8x384xf32> to vector<8x128xf32>
    %250 = arith.addf %248, %249 : vector<8x128xf32>
    %251 = arith.negf %250 : vector<8x128xf32>
    %252 = math.exp %251 : vector<8x128xf32>
    %cst_65 = arith.constant 1.000000e+00 : f32
    %253 = vector.broadcast %cst_65 : f32 to vector<8x128xf32>
    %254 = arith.addf %253, %252 : vector<8x128xf32>
    %255 = arith.divf %253, %254 : vector<8x128xf32>
    %256 = vector.extract_strided_slice %239 {offsets = [0, 256], sizes = [8, 128], strides = [1, 1]} : vector<8x384xf32> to vector<8x128xf32>
    %257 = vector.extract_strided_slice %237 {offsets = [0, 256], sizes = [8, 128], strides = [1, 1]} : vector<8x384xf32> to vector<8x128xf32>
    %258 = vector.broadcast %15 : vector<1x128xf32> to vector<8x128xf32>
    %259 = arith.addf %257, %258 : vector<8x128xf32>
    %260 = arith.mulf %247, %259 : vector<8x128xf32>
    %261 = arith.addf %256, %260 : vector<8x128xf32>
    %262 = math.tanh %261 : vector<8x128xf32>
    %cst_66 = arith.constant 1.000000e+00 : f32
    %263 = vector.broadcast %cst_66 : f32 to vector<8x128xf32>
    %264 = arith.subf %263, %255 : vector<8x128xf32>
    %265 = arith.mulf %264, %262 : vector<8x128xf32>
    %266 = arith.mulf %255, %231 : vector<8x128xf32>
    %267 = arith.addf %265, %266 : vector<8x128xf32>
    %268 = arith.index_cast %235 : i32 to index
    %c0_67 = arith.constant 0 : index
    %269 = vector.load %arg9[%268, %c0_67] : memref<64x128xf32, #tpu.memory_space<vmem>>, vector<8x128xf32>
    tpu.vector_store %arg9[%268, %c0_67], %267 {strides = array<i32>} : memref<64x128xf32, #tpu.memory_space<vmem>>, vector<8x128xf32>,
    %c7_i32 = arith.constant 7 : i32
    %c8_i32_68 = arith.constant 8 : i32
    %270 = arith.muli %c7_i32, %c8_i32_68 : i32
    %271 = tpu.assume_multiple %270, 8 : i32
    %272 = arith.truncf %267 : vector<8x128xf32> to vector<8x128xbf16>
    %cst_69 = arith.constant dense<0.000000e+00> : vector<8x384xf32>
    %273 = tpu.matmul %272, %13, %cst_69 {dimension_numbers = #tpu.dot_dimension_numbers<[1], [0], [0], [1], [0, 0, 1, 1], [], []>} : vector<8x128xbf16>, vector<128x384xbf16>, vector<8x384xf32> -> vector<8x384xf32>
    %274 = arith.index_cast %271 : i32 to index
    %c0_70 = arith.constant 0 : index
    %275 = vector.load %arg10[%274, %c0_70] : memref<64x384xf32, #tpu.memory_space<vmem>>, vector<8x384xf32>
    %276 = vector.extract_strided_slice %275 {offsets = [0, 0], sizes = [8, 128], strides = [1, 1]} : vector<8x384xf32> to vector<8x128xf32>
    %277 = vector.extract_strided_slice %273 {offsets = [0, 0], sizes = [8, 128], strides = [1, 1]} : vector<8x384xf32> to vector<8x128xf32>
    %278 = arith.addf %276, %277 : vector<8x128xf32>
    %279 = arith.negf %278 : vector<8x128xf32>
    %280 = math.exp %279 : vector<8x128xf32>
    %cst_71 = arith.constant 1.000000e+00 : f32
    %281 = vector.broadcast %cst_71 : f32 to vector<8x128xf32>
    %282 = arith.addf %281, %280 : vector<8x128xf32>
    %283 = arith.divf %281, %282 : vector<8x128xf32>
    %284 = vector.extract_strided_slice %275 {offsets = [0, 128], sizes = [8, 128], strides = [1, 1]} : vector<8x384xf32> to vector<8x128xf32>
    %285 = vector.extract_strided_slice %273 {offsets = [0, 128], sizes = [8, 128], strides = [1, 1]} : vector<8x384xf32> to vector<8x128xf32>
    %286 = arith.addf %284, %285 : vector<8x128xf32>
    %287 = arith.negf %286 : vector<8x128xf32>
    %288 = math.exp %287 : vector<8x128xf32>
    %cst_72 = arith.constant 1.000000e+00 : f32
    %289 = vector.broadcast %cst_72 : f32 to vector<8x128xf32>
    %290 = arith.addf %289, %288 : vector<8x128xf32>
    %291 = arith.divf %289, %290 : vector<8x128xf32>
    %292 = vector.extract_strided_slice %275 {offsets = [0, 256], sizes = [8, 128], strides = [1, 1]} : vector<8x384xf32> to vector<8x128xf32>
    %293 = vector.extract_strided_slice %273 {offsets = [0, 256], sizes = [8, 128], strides = [1, 1]} : vector<8x384xf32> to vector<8x128xf32>
    %294 = vector.broadcast %15 : vector<1x128xf32> to vector<8x128xf32>
    %295 = arith.addf %293, %294 : vector<8x128xf32>
    %296 = arith.mulf %283, %295 : vector<8x128xf32>
    %297 = arith.addf %292, %296 : vector<8x128xf32>
    %298 = math.tanh %297 : vector<8x128xf32>
    %cst_73 = arith.constant 1.000000e+00 : f32
    %299 = vector.broadcast %cst_73 : f32 to vector<8x128xf32>
    %300 = arith.subf %299, %291 : vector<8x128xf32>
    %301 = arith.mulf %300, %298 : vector<8x128xf32>
    %302 = arith.mulf %291, %267 : vector<8x128xf32>
    %303 = arith.addf %301, %302 : vector<8x128xf32>
    %304 = arith.index_cast %271 : i32 to index
    %c0_74 = arith.constant 0 : index
    %305 = vector.load %arg9[%304, %c0_74] : memref<64x128xf32, #tpu.memory_space<vmem>>, vector<8x128xf32>
    tpu.vector_store %arg9[%304, %c0_74], %303 {strides = array<i32>} : memref<64x128xf32, #tpu.memory_space<vmem>>, vector<8x128xf32>,
    %c8_i32_75 = arith.constant 8 : i32
    %c0_76 = arith.constant 0 : index
    %c0_77 = arith.constant 0 : index
    %c0_78 = arith.constant 0 : index
    %306 = vector.load %arg8[%c0_76, %c0_77, %c0_78] : memref<2x8x128xf32, #tpu.memory_space<vmem>>, vector<1x8x128xf32>
    %307 = vector.shape_cast %306 : vector<1x8x128xf32> to vector<8x128xf32>
    %308 = vector.shape_cast %303 : vector<8x128xf32> to vector<1x8x128xf32>
    tpu.vector_store %arg8[%c0_76, %c0_77, %c0_78], %308 {strides = array<i32>} : memref<2x8x128xf32, #tpu.memory_space<vmem>>, vector<1x8x128xf32>,
    %c0_79 = arith.constant 0 : index
    %c0_80 = arith.constant 0 : index
    %309 = vector.load %arg9[%c0_79, %c0_80] : memref<64x128xf32, #tpu.memory_space<vmem>>, vector<64x128xf32>
    %310 = arith.truncf %309 : vector<64x128xf32> to vector<64x128xbf16>
    %c1 = arith.constant 1 : index
    %c0_81 = arith.constant 0 : index
    %c0_82 = arith.constant 0 : index
    %311 = vector.load %arg3[%c1, %c0_81, %c0_82] : memref<2x128x384xbf16, #tpu.memory_space<vmem>>, vector<1x128x384xbf16>
    %312 = vector.shape_cast %311 : vector<1x128x384xbf16> to vector<128x384xbf16>
    %cst_83 = arith.constant dense<0.000000e+00> : vector<64x384xf32>
    %313 = tpu.matmul %310, %312, %cst_83 {dimension_numbers = #tpu.dot_dimension_numbers<[1], [0], [0], [1], [0, 0, 1, 1], [], []>} : vector<64x128xbf16>, vector<128x384xbf16>, vector<64x384xf32> -> vector<64x384xf32>
    %c1_84 = arith.constant 1 : index
    %c0_85 = arith.constant 0 : index
    %c0_86 = arith.constant 0 : index
    %314 = vector.load %arg5[%c1_84, %c0_85, %c0_86] : memref<2x1x384xf32, #tpu.memory_space<vmem>>, vector<1x1x384xf32>
    %315 = vector.shape_cast %314 : vector<1x1x384xf32> to vector<1x384xf32>
    %316 = vector.broadcast %315 : vector<1x384xf32> to vector<64x384xf32>
    %317 = arith.addf %313, %316 : vector<64x384xf32>
    %c0_87 = arith.constant 0 : index
    %c0_88 = arith.constant 0 : index
    %318 = vector.load %arg10[%c0_87, %c0_88] : memref<64x384xf32, #tpu.memory_space<vmem>>, vector<64x384xf32>
    tpu.vector_store %arg10[%c0_87, %c0_88], %317 {strides = array<i32>} : memref<64x384xf32, #tpu.memory_space<vmem>>, vector<64x384xf32>,
    %c1_89 = arith.constant 1 : index
    %c0_90 = arith.constant 0 : index
    %c0_91 = arith.constant 0 : index
    %319 = vector.load %arg4[%c1_89, %c0_90, %c0_91] : memref<2x128x384xbf16, #tpu.memory_space<vmem>>, vector<1x128x384xbf16>
    %320 = vector.shape_cast %319 : vector<1x128x384xbf16> to vector<128x384xbf16>
    %c1_92 = arith.constant 1 : index
    %c0_93 = arith.constant 0 : index
    %c0_94 = arith.constant 0 : index
    %321 = vector.load %arg6[%c1_92, %c0_93, %c0_94] : memref<2x1x128xf32, #tpu.memory_space<vmem>>, vector<1x1x128xf32>
    %322 = vector.shape_cast %321 : vector<1x1x128xf32> to vector<1x128xf32>
    %c1_95 = arith.constant 1 : index
    %c0_96 = arith.constant 0 : index
    %c0_97 = arith.constant 0 : index
    %323 = vector.load %arg8[%c1_95, %c0_96, %c0_97] : memref<2x8x128xf32, #tpu.memory_space<vmem>>, vector<1x8x128xf32>
    %324 = vector.shape_cast %323 : vector<1x8x128xf32> to vector<8x128xf32>
    %c0_i32_98 = arith.constant 0 : i32
    %c8_i32_99 = arith.constant 8 : i32
    %325 = arith.muli %c0_i32_98, %c8_i32_99 : i32
    %326 = tpu.assume_multiple %325, 8 : i32
    %327 = arith.truncf %324 : vector<8x128xf32> to vector<8x128xbf16>
    %cst_100 = arith.constant dense<0.000000e+00> : vector<8x384xf32>
    %328 = tpu.matmul %327, %320, %cst_100 {dimension_numbers = #tpu.dot_dimension_numbers<[1], [0], [0], [1], [0, 0, 1, 1], [], []>} : vector<8x128xbf16>, vector<128x384xbf16>, vector<8x384xf32> -> vector<8x384xf32>
    %329 = arith.index_cast %326 : i32 to index
    %c0_101 = arith.constant 0 : index
    %330 = vector.load %arg10[%329, %c0_101] : memref<64x384xf32, #tpu.memory_space<vmem>>, vector<8x384xf32>
    %331 = vector.extract_strided_slice %330 {offsets = [0, 0], sizes = [8, 128], strides = [1, 1]} : vector<8x384xf32> to vector<8x128xf32>
    %332 = vector.extract_strided_slice %328 {offsets = [0, 0], sizes = [8, 128], strides = [1, 1]} : vector<8x384xf32> to vector<8x128xf32>
    %333 = arith.addf %331, %332 : vector<8x128xf32>
    %334 = arith.negf %333 : vector<8x128xf32>
    %335 = math.exp %334 : vector<8x128xf32>
    %cst_102 = arith.constant 1.000000e+00 : f32
    %336 = vector.broadcast %cst_102 : f32 to vector<8x128xf32>
    %337 = arith.addf %336, %335 : vector<8x128xf32>
    %338 = arith.divf %336, %337 : vector<8x128xf32>
    %339 = vector.extract_strided_slice %330 {offsets = [0, 128], sizes = [8, 128], strides = [1, 1]} : vector<8x384xf32> to vector<8x128xf32>
    %340 = vector.extract_strided_slice %328 {offsets = [0, 128], sizes = [8, 128], strides = [1, 1]} : vector<8x384xf32> to vector<8x128xf32>
    %341 = arith.addf %339, %340 : vector<8x128xf32>
    %342 = arith.negf %341 : vector<8x128xf32>
    %343 = math.exp %342 : vector<8x128xf32>
    %cst_103 = arith.constant 1.000000e+00 : f32
    %344 = vector.broadcast %cst_103 : f32 to vector<8x128xf32>
    %345 = arith.addf %344, %343 : vector<8x128xf32>
    %346 = arith.divf %344, %345 : vector<8x128xf32>
    %347 = vector.extract_strided_slice %330 {offsets = [0, 256], sizes = [8, 128], strides = [1, 1]} : vector<8x384xf32> to vector<8x128xf32>
    %348 = vector.extract_strided_slice %328 {offsets = [0, 256], sizes = [8, 128], strides = [1, 1]} : vector<8x384xf32> to vector<8x128xf32>
    %349 = vector.broadcast %322 : vector<1x128xf32> to vector<8x128xf32>
    %350 = arith.addf %348, %349 : vector<8x128xf32>
    %351 = arith.mulf %338, %350 : vector<8x128xf32>
    %352 = arith.addf %347, %351 : vector<8x128xf32>
    %353 = math.tanh %352 : vector<8x128xf32>
    %cst_104 = arith.constant 1.000000e+00 : f32
    %354 = vector.broadcast %cst_104 : f32 to vector<8x128xf32>
    %355 = arith.subf %354, %346 : vector<8x128xf32>
    %356 = arith.mulf %355, %353 : vector<8x128xf32>
    %357 = arith.mulf %346, %324 : vector<8x128xf32>
    %358 = arith.addf %356, %357 : vector<8x128xf32>
    %359 = arith.index_cast %326 : i32 to index
    %c0_105 = arith.constant 0 : index
    %360 = vector.load %arg9[%359, %c0_105] : memref<64x128xf32, #tpu.memory_space<vmem>>, vector<8x128xf32>
    tpu.vector_store %arg9[%359, %c0_105], %358 {strides = array<i32>} : memref<64x128xf32, #tpu.memory_space<vmem>>, vector<8x128xf32>,
    %c1_i32_106 = arith.constant 1 : i32
    %c8_i32_107 = arith.constant 8 : i32
    %361 = arith.muli %c1_i32_106, %c8_i32_107 : i32
    %362 = tpu.assume_multiple %361, 8 : i32
    %363 = arith.truncf %358 : vector<8x128xf32> to vector<8x128xbf16>
    %cst_108 = arith.constant dense<0.000000e+00> : vector<8x384xf32>
    %364 = tpu.matmul %363, %320, %cst_108 {dimension_numbers = #tpu.dot_dimension_numbers<[1], [0], [0], [1], [0, 0, 1, 1], [], []>} : vector<8x128xbf16>, vector<128x384xbf16>, vector<8x384xf32> -> vector<8x384xf32>
    %365 = arith.index_cast %362 : i32 to index
    %c0_109 = arith.constant 0 : index
    %366 = vector.load %arg10[%365, %c0_109] : memref<64x384xf32, #tpu.memory_space<vmem>>, vector<8x384xf32>
    %367 = vector.extract_strided_slice %366 {offsets = [0, 0], sizes = [8, 128], strides = [1, 1]} : vector<8x384xf32> to vector<8x128xf32>
    %368 = vector.extract_strided_slice %364 {offsets = [0, 0], sizes = [8, 128], strides = [1, 1]} : vector<8x384xf32> to vector<8x128xf32>
    %369 = arith.addf %367, %368 : vector<8x128xf32>
    %370 = arith.negf %369 : vector<8x128xf32>
    %371 = math.exp %370 : vector<8x128xf32>
    %cst_110 = arith.constant 1.000000e+00 : f32
    %372 = vector.broadcast %cst_110 : f32 to vector<8x128xf32>
    %373 = arith.addf %372, %371 : vector<8x128xf32>
    %374 = arith.divf %372, %373 : vector<8x128xf32>
    %375 = vector.extract_strided_slice %366 {offsets = [0, 128], sizes = [8, 128], strides = [1, 1]} : vector<8x384xf32> to vector<8x128xf32>
    %376 = vector.extract_strided_slice %364 {offsets = [0, 128], sizes = [8, 128], strides = [1, 1]} : vector<8x384xf32> to vector<8x128xf32>
    %377 = arith.addf %375, %376 : vector<8x128xf32>
    %378 = arith.negf %377 : vector<8x128xf32>
    %379 = math.exp %378 : vector<8x128xf32>
    %cst_111 = arith.constant 1.000000e+00 : f32
    %380 = vector.broadcast %cst_111 : f32 to vector<8x128xf32>
    %381 = arith.addf %380, %379 : vector<8x128xf32>
    %382 = arith.divf %380, %381 : vector<8x128xf32>
    %383 = vector.extract_strided_slice %366 {offsets = [0, 256], sizes = [8, 128], strides = [1, 1]} : vector<8x384xf32> to vector<8x128xf32>
    %384 = vector.extract_strided_slice %364 {offsets = [0, 256], sizes = [8, 128], strides = [1, 1]} : vector<8x384xf32> to vector<8x128xf32>
    %385 = vector.broadcast %322 : vector<1x128xf32> to vector<8x128xf32>
    %386 = arith.addf %384, %385 : vector<8x128xf32>
    %387 = arith.mulf %374, %386 : vector<8x128xf32>
    %388 = arith.addf %383, %387 : vector<8x128xf32>
    %389 = math.tanh %388 : vector<8x128xf32>
    %cst_112 = arith.constant 1.000000e+00 : f32
    %390 = vector.broadcast %cst_112 : f32 to vector<8x128xf32>
    %391 = arith.subf %390, %382 : vector<8x128xf32>
    %392 = arith.mulf %391, %389 : vector<8x128xf32>
    %393 = arith.mulf %382, %358 : vector<8x128xf32>
    %394 = arith.addf %392, %393 : vector<8x128xf32>
    %395 = arith.index_cast %362 : i32 to index
    %c0_113 = arith.constant 0 : index
    %396 = vector.load %arg9[%395, %c0_113] : memref<64x128xf32, #tpu.memory_space<vmem>>, vector<8x128xf32>
    tpu.vector_store %arg9[%395, %c0_113], %394 {strides = array<i32>} : memref<64x128xf32, #tpu.memory_space<vmem>>, vector<8x128xf32>,
    %c2_i32_114 = arith.constant 2 : i32
    %c8_i32_115 = arith.constant 8 : i32
    %397 = arith.muli %c2_i32_114, %c8_i32_115 : i32
    %398 = tpu.assume_multiple %397, 8 : i32
    %399 = arith.truncf %394 : vector<8x128xf32> to vector<8x128xbf16>
    %cst_116 = arith.constant dense<0.000000e+00> : vector<8x384xf32>
    %400 = tpu.matmul %399, %320, %cst_116 {dimension_numbers = #tpu.dot_dimension_numbers<[1], [0], [0], [1], [0, 0, 1, 1], [], []>} : vector<8x128xbf16>, vector<128x384xbf16>, vector<8x384xf32> -> vector<8x384xf32>
    %401 = arith.index_cast %398 : i32 to index
    %c0_117 = arith.constant 0 : index
    %402 = vector.load %arg10[%401, %c0_117] : memref<64x384xf32, #tpu.memory_space<vmem>>, vector<8x384xf32>
    %403 = vector.extract_strided_slice %402 {offsets = [0, 0], sizes = [8, 128], strides = [1, 1]} : vector<8x384xf32> to vector<8x128xf32>
    %404 = vector.extract_strided_slice %400 {offsets = [0, 0], sizes = [8, 128], strides = [1, 1]} : vector<8x384xf32> to vector<8x128xf32>
    %405 = arith.addf %403, %404 : vector<8x128xf32>
    %406 = arith.negf %405 : vector<8x128xf32>
    %407 = math.exp %406 : vector<8x128xf32>
    %cst_118 = arith.constant 1.000000e+00 : f32
    %408 = vector.broadcast %cst_118 : f32 to vector<8x128xf32>
    %409 = arith.addf %408, %407 : vector<8x128xf32>
    %410 = arith.divf %408, %409 : vector<8x128xf32>
    %411 = vector.extract_strided_slice %402 {offsets = [0, 128], sizes = [8, 128], strides = [1, 1]} : vector<8x384xf32> to vector<8x128xf32>
    %412 = vector.extract_strided_slice %400 {offsets = [0, 128], sizes = [8, 128], strides = [1, 1]} : vector<8x384xf32> to vector<8x128xf32>
    %413 = arith.addf %411, %412 : vector<8x128xf32>
    %414 = arith.negf %413 : vector<8x128xf32>
    %415 = math.exp %414 : vector<8x128xf32>
    %cst_119 = arith.constant 1.000000e+00 : f32
    %416 = vector.broadcast %cst_119 : f32 to vector<8x128xf32>
    %417 = arith.addf %416, %415 : vector<8x128xf32>
    %418 = arith.divf %416, %417 : vector<8x128xf32>
    %419 = vector.extract_strided_slice %402 {offsets = [0, 256], sizes = [8, 128], strides = [1, 1]} : vector<8x384xf32> to vector<8x128xf32>
    %420 = vector.extract_strided_slice %400 {offsets = [0, 256], sizes = [8, 128], strides = [1, 1]} : vector<8x384xf32> to vector<8x128xf32>
    %421 = vector.broadcast %322 : vector<1x128xf32> to vector<8x128xf32>
    %422 = arith.addf %420, %421 : vector<8x128xf32>
    %423 = arith.mulf %410, %422 : vector<8x128xf32>
    %424 = arith.addf %419, %423 : vector<8x128xf32>
    %425 = math.tanh %424 : vector<8x128xf32>
    %cst_120 = arith.constant 1.000000e+00 : f32
    %426 = vector.broadcast %cst_120 : f32 to vector<8x128xf32>
    %427 = arith.subf %426, %418 : vector<8x128xf32>
    %428 = arith.mulf %427, %425 : vector<8x128xf32>
    %429 = arith.mulf %418, %394 : vector<8x128xf32>
    %430 = arith.addf %428, %429 : vector<8x128xf32>
    %431 = arith.index_cast %398 : i32 to index
    %c0_121 = arith.constant 0 : index
    %432 = vector.load %arg9[%431, %c0_121] : memref<64x128xf32, #tpu.memory_space<vmem>>, vector<8x128xf32>
    tpu.vector_store %arg9[%431, %c0_121], %430 {strides = array<i32>} : memref<64x128xf32, #tpu.memory_space<vmem>>, vector<8x128xf32>,
    %c3_i32_122 = arith.constant 3 : i32
    %c8_i32_123 = arith.constant 8 : i32
    %433 = arith.muli %c3_i32_122, %c8_i32_123 : i32
    %434 = tpu.assume_multiple %433, 8 : i32
    %435 = arith.truncf %430 : vector<8x128xf32> to vector<8x128xbf16>
    %cst_124 = arith.constant dense<0.000000e+00> : vector<8x384xf32>
    %436 = tpu.matmul %435, %320, %cst_124 {dimension_numbers = #tpu.dot_dimension_numbers<[1], [0], [0], [1], [0, 0, 1, 1], [], []>} : vector<8x128xbf16>, vector<128x384xbf16>, vector<8x384xf32> -> vector<8x384xf32>
    %437 = arith.index_cast %434 : i32 to index
    %c0_125 = arith.constant 0 : index
    %438 = vector.load %arg10[%437, %c0_125] : memref<64x384xf32, #tpu.memory_space<vmem>>, vector<8x384xf32>
    %439 = vector.extract_strided_slice %438 {offsets = [0, 0], sizes = [8, 128], strides = [1, 1]} : vector<8x384xf32> to vector<8x128xf32>
    %440 = vector.extract_strided_slice %436 {offsets = [0, 0], sizes = [8, 128], strides = [1, 1]} : vector<8x384xf32> to vector<8x128xf32>
    %441 = arith.addf %439, %440 : vector<8x128xf32>
    %442 = arith.negf %441 : vector<8x128xf32>
    %443 = math.exp %442 : vector<8x128xf32>
    %cst_126 = arith.constant 1.000000e+00 : f32
    %444 = vector.broadcast %cst_126 : f32 to vector<8x128xf32>
    %445 = arith.addf %444, %443 : vector<8x128xf32>
    %446 = arith.divf %444, %445 : vector<8x128xf32>
    %447 = vector.extract_strided_slice %438 {offsets = [0, 128], sizes = [8, 128], strides = [1, 1]} : vector<8x384xf32> to vector<8x128xf32>
    %448 = vector.extract_strided_slice %436 {offsets = [0, 128], sizes = [8, 128], strides = [1, 1]} : vector<8x384xf32> to vector<8x128xf32>
    %449 = arith.addf %447, %448 : vector<8x128xf32>
    %450 = arith.negf %449 : vector<8x128xf32>
    %451 = math.exp %450 : vector<8x128xf32>
    %cst_127 = arith.constant 1.000000e+00 : f32
    %452 = vector.broadcast %cst_127 : f32 to vector<8x128xf32>
    %453 = arith.addf %452, %451 : vector<8x128xf32>
    %454 = arith.divf %452, %453 : vector<8x128xf32>
    %455 = vector.extract_strided_slice %438 {offsets = [0, 256], sizes = [8, 128], strides = [1, 1]} : vector<8x384xf32> to vector<8x128xf32>
    %456 = vector.extract_strided_slice %436 {offsets = [0, 256], sizes = [8, 128], strides = [1, 1]} : vector<8x384xf32> to vector<8x128xf32>
    %457 = vector.broadcast %322 : vector<1x128xf32> to vector<8x128xf32>
    %458 = arith.addf %456, %457 : vector<8x128xf32>
    %459 = arith.mulf %446, %458 : vector<8x128xf32>
    %460 = arith.addf %455, %459 : vector<8x128xf32>
    %461 = math.tanh %460 : vector<8x128xf32>
    %cst_128 = arith.constant 1.000000e+00 : f32
    %462 = vector.broadcast %cst_128 : f32 to vector<8x128xf32>
    %463 = arith.subf %462, %454 : vector<8x128xf32>
    %464 = arith.mulf %463, %461 : vector<8x128xf32>
    %465 = arith.mulf %454, %430 : vector<8x128xf32>
    %466 = arith.addf %464, %465 : vector<8x128xf32>
    %467 = arith.index_cast %434 : i32 to index
    %c0_129 = arith.constant 0 : index
    %468 = vector.load %arg9[%467, %c0_129] : memref<64x128xf32, #tpu.memory_space<vmem>>, vector<8x128xf32>
    tpu.vector_store %arg9[%467, %c0_129], %466 {strides = array<i32>} : memref<64x128xf32, #tpu.memory_space<vmem>>, vector<8x128xf32>,
    %c4_i32_130 = arith.constant 4 : i32
    %c8_i32_131 = arith.constant 8 : i32
    %469 = arith.muli %c4_i32_130, %c8_i32_131 : i32
    %470 = tpu.assume_multiple %469, 8 : i32
    %471 = arith.truncf %466 : vector<8x128xf32> to vector<8x128xbf16>
    %cst_132 = arith.constant dense<0.000000e+00> : vector<8x384xf32>
    %472 = tpu.matmul %471, %320, %cst_132 {dimension_numbers = #tpu.dot_dimension_numbers<[1], [0], [0], [1], [0, 0, 1, 1], [], []>} : vector<8x128xbf16>, vector<128x384xbf16>, vector<8x384xf32> -> vector<8x384xf32>
    %473 = arith.index_cast %470 : i32 to index
    %c0_133 = arith.constant 0 : index
    %474 = vector.load %arg10[%473, %c0_133] : memref<64x384xf32, #tpu.memory_space<vmem>>, vector<8x384xf32>
    %475 = vector.extract_strided_slice %474 {offsets = [0, 0], sizes = [8, 128], strides = [1, 1]} : vector<8x384xf32> to vector<8x128xf32>
    %476 = vector.extract_strided_slice %472 {offsets = [0, 0], sizes = [8, 128], strides = [1, 1]} : vector<8x384xf32> to vector<8x128xf32>
    %477 = arith.addf %475, %476 : vector<8x128xf32>
    %478 = arith.negf %477 : vector<8x128xf32>
    %479 = math.exp %478 : vector<8x128xf32>
    %cst_134 = arith.constant 1.000000e+00 : f32
    %480 = vector.broadcast %cst_134 : f32 to vector<8x128xf32>
    %481 = arith.addf %480, %479 : vector<8x128xf32>
    %482 = arith.divf %480, %481 : vector<8x128xf32>
    %483 = vector.extract_strided_slice %474 {offsets = [0, 128], sizes = [8, 128], strides = [1, 1]} : vector<8x384xf32> to vector<8x128xf32>
    %484 = vector.extract_strided_slice %472 {offsets = [0, 128], sizes = [8, 128], strides = [1, 1]} : vector<8x384xf32> to vector<8x128xf32>
    %485 = arith.addf %483, %484 : vector<8x128xf32>
    %486 = arith.negf %485 : vector<8x128xf32>
    %487 = math.exp %486 : vector<8x128xf32>
    %cst_135 = arith.constant 1.000000e+00 : f32
    %488 = vector.broadcast %cst_135 : f32 to vector<8x128xf32>
    %489 = arith.addf %488, %487 : vector<8x128xf32>
    %490 = arith.divf %488, %489 : vector<8x128xf32>
    %491 = vector.extract_strided_slice %474 {offsets = [0, 256], sizes = [8, 128], strides = [1, 1]} : vector<8x384xf32> to vector<8x128xf32>
    %492 = vector.extract_strided_slice %472 {offsets = [0, 256], sizes = [8, 128], strides = [1, 1]} : vector<8x384xf32> to vector<8x128xf32>
    %493 = vector.broadcast %322 : vector<1x128xf32> to vector<8x128xf32>
    %494 = arith.addf %492, %493 : vector<8x128xf32>
    %495 = arith.mulf %482, %494 : vector<8x128xf32>
    %496 = arith.addf %491, %495 : vector<8x128xf32>
    %497 = math.tanh %496 : vector<8x128xf32>
    %cst_136 = arith.constant 1.000000e+00 : f32
    %498 = vector.broadcast %cst_136 : f32 to vector<8x128xf32>
    %499 = arith.subf %498, %490 : vector<8x128xf32>
    %500 = arith.mulf %499, %497 : vector<8x128xf32>
    %501 = arith.mulf %490, %466 : vector<8x128xf32>
    %502 = arith.addf %500, %501 : vector<8x128xf32>
    %503 = arith.index_cast %470 : i32 to index
    %c0_137 = arith.constant 0 : index
    %504 = vector.load %arg9[%503, %c0_137] : memref<64x128xf32, #tpu.memory_space<vmem>>, vector<8x128xf32>
    tpu.vector_store %arg9[%503, %c0_137], %502 {strides = array<i32>} : memref<64x128xf32, #tpu.memory_space<vmem>>, vector<8x128xf32>,
    %c5_i32_138 = arith.constant 5 : i32
    %c8_i32_139 = arith.constant 8 : i32
    %505 = arith.muli %c5_i32_138, %c8_i32_139 : i32
    %506 = tpu.assume_multiple %505, 8 : i32
    %507 = arith.truncf %502 : vector<8x128xf32> to vector<8x128xbf16>
    %cst_140 = arith.constant dense<0.000000e+00> : vector<8x384xf32>
    %508 = tpu.matmul %507, %320, %cst_140 {dimension_numbers = #tpu.dot_dimension_numbers<[1], [0], [0], [1], [0, 0, 1, 1], [], []>} : vector<8x128xbf16>, vector<128x384xbf16>, vector<8x384xf32> -> vector<8x384xf32>
    %509 = arith.index_cast %506 : i32 to index
    %c0_141 = arith.constant 0 : index
    %510 = vector.load %arg10[%509, %c0_141] : memref<64x384xf32, #tpu.memory_space<vmem>>, vector<8x384xf32>
    %511 = vector.extract_strided_slice %510 {offsets = [0, 0], sizes = [8, 128], strides = [1, 1]} : vector<8x384xf32> to vector<8x128xf32>
    %512 = vector.extract_strided_slice %508 {offsets = [0, 0], sizes = [8, 128], strides = [1, 1]} : vector<8x384xf32> to vector<8x128xf32>
    %513 = arith.addf %511, %512 : vector<8x128xf32>
    %514 = arith.negf %513 : vector<8x128xf32>
    %515 = math.exp %514 : vector<8x128xf32>
    %cst_142 = arith.constant 1.000000e+00 : f32
    %516 = vector.broadcast %cst_142 : f32 to vector<8x128xf32>
    %517 = arith.addf %516, %515 : vector<8x128xf32>
    %518 = arith.divf %516, %517 : vector<8x128xf32>
    %519 = vector.extract_strided_slice %510 {offsets = [0, 128], sizes = [8, 128], strides = [1, 1]} : vector<8x384xf32> to vector<8x128xf32>
    %520 = vector.extract_strided_slice %508 {offsets = [0, 128], sizes = [8, 128], strides = [1, 1]} : vector<8x384xf32> to vector<8x128xf32>
    %521 = arith.addf %519, %520 : vector<8x128xf32>
    %522 = arith.negf %521 : vector<8x128xf32>
    %523 = math.exp %522 : vector<8x128xf32>
    %cst_143 = arith.constant 1.000000e+00 : f32
    %524 = vector.broadcast %cst_143 : f32 to vector<8x128xf32>
    %525 = arith.addf %524, %523 : vector<8x128xf32>
    %526 = arith.divf %524, %525 : vector<8x128xf32>
    %527 = vector.extract_strided_slice %510 {offsets = [0, 256], sizes = [8, 128], strides = [1, 1]} : vector<8x384xf32> to vector<8x128xf32>
    %528 = vector.extract_strided_slice %508 {offsets = [0, 256], sizes = [8, 128], strides = [1, 1]} : vector<8x384xf32> to vector<8x128xf32>
    %529 = vector.broadcast %322 : vector<1x128xf32> to vector<8x128xf32>
    %530 = arith.addf %528, %529 : vector<8x128xf32>
    %531 = arith.mulf %518, %530 : vector<8x128xf32>
    %532 = arith.addf %527, %531 : vector<8x128xf32>
    %533 = math.tanh %532 : vector<8x128xf32>
    %cst_144 = arith.constant 1.000000e+00 : f32
    %534 = vector.broadcast %cst_144 : f32 to vector<8x128xf32>
    %535 = arith.subf %534, %526 : vector<8x128xf32>
    %536 = arith.mulf %535, %533 : vector<8x128xf32>
    %537 = arith.mulf %526, %502 : vector<8x128xf32>
    %538 = arith.addf %536, %537 : vector<8x128xf32>
    %539 = arith.index_cast %506 : i32 to index
    %c0_145 = arith.constant 0 : index
    %540 = vector.load %arg9[%539, %c0_145] : memref<64x128xf32, #tpu.memory_space<vmem>>, vector<8x128xf32>
    tpu.vector_store %arg9[%539, %c0_145], %538 {strides = array<i32>} : memref<64x128xf32, #tpu.memory_space<vmem>>, vector<8x128xf32>,
    %c6_i32_146 = arith.constant 6 : i32
    %c8_i32_147 = arith.constant 8 : i32
    %541 = arith.muli %c6_i32_146, %c8_i32_147 : i32
    %542 = tpu.assume_multiple %541, 8 : i32
    %543 = arith.truncf %538 : vector<8x128xf32> to vector<8x128xbf16>
    %cst_148 = arith.constant dense<0.000000e+00> : vector<8x384xf32>
    %544 = tpu.matmul %543, %320, %cst_148 {dimension_numbers = #tpu.dot_dimension_numbers<[1], [0], [0], [1], [0, 0, 1, 1], [], []>} : vector<8x128xbf16>, vector<128x384xbf16>, vector<8x384xf32> -> vector<8x384xf32>
    %545 = arith.index_cast %542 : i32 to index
    %c0_149 = arith.constant 0 : index
    %546 = vector.load %arg10[%545, %c0_149] : memref<64x384xf32, #tpu.memory_space<vmem>>, vector<8x384xf32>
    %547 = vector.extract_strided_slice %546 {offsets = [0, 0], sizes = [8, 128], strides = [1, 1]} : vector<8x384xf32> to vector<8x128xf32>
    %548 = vector.extract_strided_slice %544 {offsets = [0, 0], sizes = [8, 128], strides = [1, 1]} : vector<8x384xf32> to vector<8x128xf32>
    %549 = arith.addf %547, %548 : vector<8x128xf32>
    %550 = arith.negf %549 : vector<8x128xf32>
    %551 = math.exp %550 : vector<8x128xf32>
    %cst_150 = arith.constant 1.000000e+00 : f32
    %552 = vector.broadcast %cst_150 : f32 to vector<8x128xf32>
    %553 = arith.addf %552, %551 : vector<8x128xf32>
    %554 = arith.divf %552, %553 : vector<8x128xf32>
    %555 = vector.extract_strided_slice %546 {offsets = [0, 128], sizes = [8, 128], strides = [1, 1]} : vector<8x384xf32> to vector<8x128xf32>
    %556 = vector.extract_strided_slice %544 {offsets = [0, 128], sizes = [8, 128], strides = [1, 1]} : vector<8x384xf32> to vector<8x128xf32>
    %557 = arith.addf %555, %556 : vector<8x128xf32>
    %558 = arith.negf %557 : vector<8x128xf32>
    %559 = math.exp %558 : vector<8x128xf32>
    %cst_151 = arith.constant 1.000000e+00 : f32
    %560 = vector.broadcast %cst_151 : f32 to vector<8x128xf32>
    %561 = arith.addf %560, %559 : vector<8x128xf32>
    %562 = arith.divf %560, %561 : vector<8x128xf32>
    %563 = vector.extract_strided_slice %546 {offsets = [0, 256], sizes = [8, 128], strides = [1, 1]} : vector<8x384xf32> to vector<8x128xf32>
    %564 = vector.extract_strided_slice %544 {offsets = [0, 256], sizes = [8, 128], strides = [1, 1]} : vector<8x384xf32> to vector<8x128xf32>
    %565 = vector.broadcast %322 : vector<1x128xf32> to vector<8x128xf32>
    %566 = arith.addf %564, %565 : vector<8x128xf32>
    %567 = arith.mulf %554, %566 : vector<8x128xf32>
    %568 = arith.addf %563, %567 : vector<8x128xf32>
    %569 = math.tanh %568 : vector<8x128xf32>
    %cst_152 = arith.constant 1.000000e+00 : f32
    %570 = vector.broadcast %cst_152 : f32 to vector<8x128xf32>
    %571 = arith.subf %570, %562 : vector<8x128xf32>
    %572 = arith.mulf %571, %569 : vector<8x128xf32>
    %573 = arith.mulf %562, %538 : vector<8x128xf32>
    %574 = arith.addf %572, %573 : vector<8x128xf32>
    %575 = arith.index_cast %542 : i32 to index
    %c0_153 = arith.constant 0 : index
    %576 = vector.load %arg9[%575, %c0_153] : memref<64x128xf32, #tpu.memory_space<vmem>>, vector<8x128xf32>
    tpu.vector_store %arg9[%575, %c0_153], %574 {strides = array<i32>} : memref<64x128xf32, #tpu.memory_space<vmem>>, vector<8x128xf32>,
    %c7_i32_154 = arith.constant 7 : i32
    %c8_i32_155 = arith.constant 8 : i32
    %577 = arith.muli %c7_i32_154, %c8_i32_155 : i32
    %578 = tpu.assume_multiple %577, 8 : i32
    %579 = arith.truncf %574 : vector<8x128xf32> to vector<8x128xbf16>
    %cst_156 = arith.constant dense<0.000000e+00> : vector<8x384xf32>
    %580 = tpu.matmul %579, %320, %cst_156 {dimension_numbers = #tpu.dot_dimension_numbers<[1], [0], [0], [1], [0, 0, 1, 1], [], []>} : vector<8x128xbf16>, vector<128x384xbf16>, vector<8x384xf32> -> vector<8x384xf32>
    %581 = arith.index_cast %578 : i32 to index
    %c0_157 = arith.constant 0 : index
    %582 = vector.load %arg10[%581, %c0_157] : memref<64x384xf32, #tpu.memory_space<vmem>>, vector<8x384xf32>
    %583 = vector.extract_strided_slice %582 {offsets = [0, 0], sizes = [8, 128], strides = [1, 1]} : vector<8x384xf32> to vector<8x128xf32>
    %584 = vector.extract_strided_slice %580 {offsets = [0, 0], sizes = [8, 128], strides = [1, 1]} : vector<8x384xf32> to vector<8x128xf32>
    %585 = arith.addf %583, %584 : vector<8x128xf32>
    %586 = arith.negf %585 : vector<8x128xf32>
    %587 = math.exp %586 : vector<8x128xf32>
    %cst_158 = arith.constant 1.000000e+00 : f32
    %588 = vector.broadcast %cst_158 : f32 to vector<8x128xf32>
    %589 = arith.addf %588, %587 : vector<8x128xf32>
    %590 = arith.divf %588, %589 : vector<8x128xf32>
    %591 = vector.extract_strided_slice %582 {offsets = [0, 128], sizes = [8, 128], strides = [1, 1]} : vector<8x384xf32> to vector<8x128xf32>
    %592 = vector.extract_strided_slice %580 {offsets = [0, 128], sizes = [8, 128], strides = [1, 1]} : vector<8x384xf32> to vector<8x128xf32>
    %593 = arith.addf %591, %592 : vector<8x128xf32>
    %594 = arith.negf %593 : vector<8x128xf32>
    %595 = math.exp %594 : vector<8x128xf32>
    %cst_159 = arith.constant 1.000000e+00 : f32
    %596 = vector.broadcast %cst_159 : f32 to vector<8x128xf32>
    %597 = arith.addf %596, %595 : vector<8x128xf32>
    %598 = arith.divf %596, %597 : vector<8x128xf32>
    %599 = vector.extract_strided_slice %582 {offsets = [0, 256], sizes = [8, 128], strides = [1, 1]} : vector<8x384xf32> to vector<8x128xf32>
    %600 = vector.extract_strided_slice %580 {offsets = [0, 256], sizes = [8, 128], strides = [1, 1]} : vector<8x384xf32> to vector<8x128xf32>
    %601 = vector.broadcast %322 : vector<1x128xf32> to vector<8x128xf32>
    %602 = arith.addf %600, %601 : vector<8x128xf32>
    %603 = arith.mulf %590, %602 : vector<8x128xf32>
    %604 = arith.addf %599, %603 : vector<8x128xf32>
    %605 = math.tanh %604 : vector<8x128xf32>
    %cst_160 = arith.constant 1.000000e+00 : f32
    %606 = vector.broadcast %cst_160 : f32 to vector<8x128xf32>
    %607 = arith.subf %606, %598 : vector<8x128xf32>
    %608 = arith.mulf %607, %605 : vector<8x128xf32>
    %609 = arith.mulf %598, %574 : vector<8x128xf32>
    %610 = arith.addf %608, %609 : vector<8x128xf32>
    %611 = arith.index_cast %578 : i32 to index
    %c0_161 = arith.constant 0 : index
    %612 = vector.load %arg9[%611, %c0_161] : memref<64x128xf32, #tpu.memory_space<vmem>>, vector<8x128xf32>
    tpu.vector_store %arg9[%611, %c0_161], %610 {strides = array<i32>} : memref<64x128xf32, #tpu.memory_space<vmem>>, vector<8x128xf32>,
    %c8_i32_162 = arith.constant 8 : i32
    %c1_163 = arith.constant 1 : index
    %c0_164 = arith.constant 0 : index
    %c0_165 = arith.constant 0 : index
    %613 = vector.load %arg8[%c1_163, %c0_164, %c0_165] : memref<2x8x128xf32, #tpu.memory_space<vmem>>, vector<1x8x128xf32>
    %614 = vector.shape_cast %613 : vector<1x8x128xf32> to vector<8x128xf32>
    %615 = vector.shape_cast %610 : vector<8x128xf32> to vector<1x8x128xf32>
    tpu.vector_store %arg8[%c1_163, %c0_164, %c0_165], %615 {strides = array<i32>} : memref<2x8x128xf32, #tpu.memory_space<vmem>>, vector<1x8x128xf32>,
    %c0_166 = arith.constant 0 : index
    %c0_167 = arith.constant 0 : index
    %616 = vector.load %arg9[%c0_166, %c0_167] : memref<64x128xf32, #tpu.memory_space<vmem>>, vector<64x128xf32>
    %617 = arith.truncf %616 : vector<64x128xf32> to vector<64x128xbf16>
    %c0_168 = arith.constant 0 : index
    %c0_169 = arith.constant 0 : index
    %618 = vector.load %arg7[%c0_168, %c0_169] : memref<64x128xbf16, #tpu.memory_space<vmem>>, vector<64x128xbf16>
    tpu.vector_store %arg7[%c0_168, %c0_169], %617 {strides = array<i32>} : memref<64x128xbf16, #tpu.memory_space<vmem>>, vector<64x128xbf16>,
    return
  }
  func.func @transform_0(%arg0: i32) -> (i32, i32) {
    %c0_i32 = arith.constant 0 : i32
    %c0_i32_0 = arith.constant 0 : i32
    return %arg0, %c0_i32 : i32, i32
  }
  func.func @transform_1(%arg0: i32) -> (i32, i32, i32) {
    %c0_i32 = arith.constant 0 : i32
    %c0_i32_0 = arith.constant 0 : i32
    %c0_i32_1 = arith.constant 0 : i32
    %c0_i32_2 = arith.constant 0 : i32
    return %c0_i32, %c0_i32_0, %c0_i32_1 : i32, i32, i32
  }
  func.func @transform_2(%arg0: i32) -> (i32, i32, i32) {
    %c0_i32 = arith.constant 0 : i32
    %c0_i32_0 = arith.constant 0 : i32
    %c0_i32_1 = arith.constant 0 : i32
    %c0_i32_2 = arith.constant 0 : i32
    return %c0_i32, %c0_i32_0, %c0_i32_1 : i32, i32, i32
  }
  func.func @transform_3(%arg0: i32) -> (i32, i32, i32) {
    %c0_i32 = arith.constant 0 : i32
    %c0_i32_0 = arith.constant 0 : i32
    %c0_i32_1 = arith.constant 0 : i32
    %c0_i32_2 = arith.constant 0 : i32
    return %c0_i32, %c0_i32_0, %c0_i32_1 : i32, i32, i32
  }
  func.func @transform_4(%arg0: i32) -> (i32, i32, i32) {
    %c0_i32 = arith.constant 0 : i32
    %c0_i32_0 = arith.constant 0 : i32
    %c0_i32_1 = arith.constant 0 : i32
    %c0_i32_2 = arith.constant 0 : i32
    return %c0_i32, %c0_i32_0, %c0_i32_1 : i32, i32, i32
  }
  func.func @transform_5(%arg0: i32) -> (i32, i32, i32) {
    %c0_i32 = arith.constant 0 : i32
    %c0_i32_0 = arith.constant 0 : i32
    %c0_i32_1 = arith.constant 0 : i32
    %c0_i32_2 = arith.constant 0 : i32
    return %c0_i32, %c0_i32_0, %c0_i32_1 : i32, i32, i32
  }
  func.func @transform_6(%arg0: i32) -> (i32, i32) {
    %c0_i32 = arith.constant 0 : i32
    %c0_i32_0 = arith.constant 0 : i32
    return %arg0, %c0_i32 : i32, i32
  }
  func.func @transform_7(%arg0: i32) -> (i32, i32, i32) {
    %c0_i32 = arith.constant 0 : i32
    %c0_i32_0 = arith.constant 0 : i32
    %c0_i32_1 = arith.constant 0 : i32
    %c0_i32_2 = arith.constant 0 : i32
    return %c0_i32, %c0_i32_0, %c0_i32_1 : i32, i32, i32
  }
}

</mosaic_0001>

<bundles_post_ra>
// kernel: char_rnn_forward.3
= control target key start
LH: loop header
LB: loop body
LE: loop exit
PB: predicated region body
PF: predicated region fallthrough
CT: control target
= control target key end

     0   :  { %8 = vsyncpa [#allocation3], 0  ;;  %s286_s15 = smov [#allocation2]   ;;  %s287_s17 = smov 64   ;;  %s351_s0 = inlined_call_operand.vmem [shape: bf16[64,128], index: 0, kind: input, shape index: {}]   ;;  %s352_s1 = inlined_call_operand.hbm [shape: bf16[128,128], index: 1, kind: input, shape index: {}]   ;;  %s353_s2 = inlined_call_operand.vmem [shape: f32[1,128], index: 2, kind: input, shape index: {}]   ;;  %s354_s3 = inlined_call_operand.vmem [shape: f32[64,128], index: 3, kind: output, shape index: {}]  }
   0x1   :  { %s15_s14 = sshll.u32 %s352_s1, 4  ;;  %s17_s16 = sshll.u32 %s286_s15, 4  ;;  %s16_s14 = int_to_ptr.hbm [resolvable:$true] %s15_s14  ;;  %s18_s16 = int_to_ptr.vmem [resolvable:$true] %s17_s16 }
   0x2   :  { %s288_s18 = smov 4  }
   0x3   :  { %23 = dma.hbm_to_vmem [thread:$0]  %s16_s14, 1024, %s18_s16, [#allocation3], %s287_s17, %s287_s17, %s288_s18  }
   0x4   :  { %284 = dma.done.wait [#allocation3], 1024  }
   0x5   :  { %285 = vsyncadd [#allocation3], 4294966272  ;;  %v231_v0 = vld [vmem:[#allocation2 + $0x38] sm:$0xff]  ;;  %v230_v1 = vld [vmem:[#allocation2 + $0x30] sm:$0xff] }
   0x6   :  { %130 = vmatpush.bf16.msra.mxu0 %v231_v0  ;;  %232 = vmatpush.bf16.msra.mxu1 %v231_v0  ;;  %v229_v2 = vld [vmem:[#allocation2 + $0x28] sm:$0xff]  ;;  %v228_v3 = vld [vmem:[#allocation2 + $0x20] sm:$0xff]  ;;  %v227_v4 = vld [vmem:[#allocation2 + $0x18] sm:$0xff] }
   0x7   :  { %233 = vmatpush.bf16.msra.mxu2 %v231_v0  ;;  %234 = vmatpush.bf16.msra.mxu3 %v231_v0  ;;  %v226_v5 = vld [vmem:[#allocation2 + $0x10] sm:$0xff]  ;;  %v225_v6 = vld [vmem:[#allocation2 + $0x8] sm:$0xff]  ;;  %v224_v7 = vld [vmem:[#allocation2] sm:$0xff] }
   0x8   :  { %v220_v8 = vld [vmem:[%s351_s0] sm:$0xff]  ;;  %v221_v9 = vld [vmem:[%s351_s0 + $0x8] sm:$0xff]  ;;  %v222_v10 = vld [vmem:[%s351_s0 + $0x10] sm:$0xff] }
   0x9   :  { %v223_v11 = vld [vmem:[%s351_s0 + $0x18] sm:$0xff]  ;;  %v259_v12 = vld [vmem:[%s353_s2] ss:$0 sm:$0xff] }
   0xa   :  { %131 = vmatpush.bf16.msra.mxu0 %v230_v1  ;;  %235 = vmatpush.bf16.msra.mxu1 %v230_v1 }
   0xb   :  { %236 = vmatpush.bf16.msra.mxu2 %v230_v1  ;;  %237 = vmatpush.bf16.msra.mxu3 %v230_v1 }
   0xe   :  { %132 = vmatpush.bf16.msra.mxu0 %v229_v2  ;;  %238 = vmatpush.bf16.msra.mxu1 %v229_v2 }
   0xf   :  { %239 = vmatpush.bf16.msra.mxu2 %v229_v2  ;;  %240 = vmatpush.bf16.msra.mxu3 %v229_v2 }
  0x12   :  { %133 = vmatpush.bf16.msra.mxu0 %v228_v3  ;;  %241 = vmatpush.bf16.msra.mxu1 %v228_v3 }
  0x13   :  { %242 = vmatpush.bf16.msra.mxu2 %v228_v3  ;;  %243 = vmatpush.bf16.msra.mxu3 %v228_v3 }
  0x16   :  { %134 = vmatpush.bf16.msra.mxu0 %v227_v4  ;;  %244 = vmatpush.bf16.msra.mxu1 %v227_v4 }
  0x17   :  { %245 = vmatpush.bf16.msra.mxu2 %v227_v4  ;;  %246 = vmatpush.bf16.msra.mxu3 %v227_v4 }
  0x1a   :  { %135 = vmatpush.bf16.msra.mxu0 %v226_v5  ;;  %247 = vmatpush.bf16.msra.mxu1 %v226_v5 }
  0x1b   :  { %248 = vmatpush.bf16.msra.mxu2 %v226_v5  ;;  %249 = vmatpush.bf16.msra.mxu3 %v226_v5 }
  0x1e   :  { %136 = vmatpush.bf16.msra.mxu0 %v225_v6  ;;  %250 = vmatpush.bf16.msra.mxu1 %v225_v6 }
  0x1f   :  { %251 = vmatpush.bf16.msra.mxu2 %v225_v6  ;;  %252 = vmatpush.bf16.msra.mxu3 %v225_v6 }
  0x22   :  { %137 = vmatpush.bf16.msra.mxu0 %v224_v7  ;;  %253 = vmatpush.bf16.msra.mxu1 %v224_v7 }
  0x23   :  { %254 = vmatpush.bf16.msra.mxu2 %v224_v7  ;;  %255 = vmatpush.bf16.msra.mxu3 %v224_v7 }
  0x25   :  { %138 = vmatmul.bf16.vlgmr.msra.gmra.mxu0 %v220_v8  ;;  %143 = vmatmul.bf16.vlgmr.msra.gmra.mxu1 %v221_v9 }
  0x26   :  { %148 = vmatmul.bf16.vlgmr.msra.gmra.mxu2 %v222_v10  ;;  %153 = vmatmul.bf16.vlgmr.msra.gmra.mxu3 %v223_v11 }
  0xa2   :  { %v139_v13 = vpop.f32.mrf.mxu0  ;;  %v144_v14 = vpop.f32.mrf.mxu1 }
  0xa3   :  { %v140_v15 = vadd.f32 %v259_v12, %v139_v13  ;;  %v145_v16 = vadd.f32 %v259_v12, %v144_v14 }
  0xa5   :  { %159 = vst [vmem:[%s354_s3] sm:$0xff] %v140_v15 }
  0xa6   :  { %161 = vst [vmem:[%s354_s3 + $0x10] sm:$0xff] %v145_v16 }
  0xa9   :  { %v149_v17 = vpop.f32.mrf.mxu2  ;;  %v154_v18 = vpop.f32.mrf.mxu3 }
  0xaa   :  { %v150_v19 = vadd.f32 %v259_v12, %v149_v17  ;;  %v155_v20 = vadd.f32 %v259_v12, %v154_v18  ;;  %v141_v21 = vpop.f32.mrf.mxu0  ;;  %v146_v22 = vpop.f32.mrf.mxu1 }
  0xab   :  { %v142_v23 = vadd.f32 %v259_v12, %v141_v21  ;;  %v147_v24 = vadd.f32 %v259_v12, %v146_v22 }
  0xac   :  { %163 = vst [vmem:[%s354_s3 + $0x20] sm:$0xff] %v150_v19 }
  0xad   :  { %165 = vst [vmem:[%s354_s3 + $0x30] sm:$0xff] %v155_v20 }
  0xae   :  { %160 = vst [vmem:[%s354_s3 + $0x8] sm:$0xff] %v142_v23 }
  0xaf   :  { %162 = vst [vmem:[%s354_s3 + $0x18] sm:$0xff] %v147_v24 }
  0xb1   :  { %v151_v25 = vpop.f32.mrf.mxu2  ;;  %v156_v26 = vpop.f32.mrf.mxu3 }
  0xb2   :  { %v152_v27 = vadd.f32 %v259_v12, %v151_v25  ;;  %v157_v28 = vadd.f32 %v259_v12, %v156_v26 }
  0xb4   :  { %164 = vst [vmem:[%s354_s3 + $0x28] sm:$0xff] %v152_v27 }
  0xb5   :  { %166 = vst [vmem:[%s354_s3 + $0x38] sm:$0xff] %v157_v28 }
  0xb6   :  { %171 = vsyncpa [#allocation3], 1 }

// kernel: char_rnn_forward.2
= control target key start
LH: loop header
LB: loop body
LE: loop exit
PB: predicated region body
PF: predicated region fallthrough
CT: control target
= control target key end

     0   :  { %13 = vsyncpa [#allocation5], 0  ;;  %s3315_s27 = smov [#allocation4]   ;;  %s3316_s29 = smov 192   ;;  %s4538_s0 = inlined_call_operand.vmem [shape: bf16[64,128], index: 0, kind: input, shape index: {}]   ;;  %s4539_s1 = inlined_call_operand.vmem [shape: f32[2,8,128], index: 1, kind: input, shape index: {}]   ;;  %s4540_s2 = inlined_call_operand.hbm [shape: bf16[2,128,384], index: 2, kind: input, shape index: {}]   ;;  %s4541_s3 = inlined_call_operand.vmem [shape: bf16[2,128,384], index: 3, kind: input, shape index: {}]   ;;  %s4542_s4 = inlined_call_operand.vmem [shape: f32[2,1,384], index: 4, kind: input, shape index: {}]   ;;  %s4543_s5 = inlined_call_operand.vmem [shape: f32[2,1,128], index: 5, kind: input, shape index: {}]   ;;  %s4544_s6 = inlined_call_operand.vmem [shape: bf16[64,128], index: 6, kind: output, shape index: {0}]   ;;  %s4545_s7 = inlined_call_operand.vmem [shape: f32[2,8,128], index: 7, kind: output, shape index: {1}]  }
   0x1   :  { %s22_s26 = sshll.u32 %s4540_s2, 4  ;;  %s24_s28 = sshll.u32 %s3315_s27, 4  ;;  %s23_s26 = int_to_ptr.hbm [resolvable:$true] %s22_s26  ;;  %s25_s28 = int_to_ptr.vmem [resolvable:$true] %s24_s28 }
   0x2   :  { %s3317_s30 = smov 12  }
   0x3   :  { %30 = dma.hbm_to_vmem [thread:$0]  %s23_s26, 6144, %s25_s28, [#allocation5], %s3316_s29, %s3316_s29, %s3317_s30  }
   0x4   :  { %3313 = dma.done.wait [#allocation5], 6144  }
   0x5   :  { %3314 = vsyncadd [#allocation5], 4294961152  ;;  %v2633_v0 = vld [vmem:[#allocation4 + $0xa8] sm:$0xf]  ;;  %v3025_v1 = vld [vmem:[#allocation4 + $0xb0] sm:$0xf0] }
   0x6   :  { %v2729_v2 = vld [vmem:[%s4541_s3 + $0xa8] sm:$0xf]  ;;  %v2634_v3 = vor.u32 %v3025_v1, %v2633_v0  ;;  %v3049_v4 = vld [vmem:[%s4541_s3 + $0xb0] sm:$0xf0]  ;;  %v2621_v5 = vld [vmem:[#allocation4 + $0x90] sm:$0xf] }
   0x7   :  { %v3022_v6 = vld [vmem:[#allocation4 + $0x98] sm:$0xf0]  ;;  %v3367_v7 = vor.u32 %v3049_v4, %v2729_v2  ;;  %v2717_v8 = vld [vmem:[%s4541_s3 + $0x90] sm:$0xf]  ;;  %v2609_v12 = vld [vmem:[#allocation4 + $0x78] sm:$0xf] }
   0x8   :  { %v3046_v9 = vld [vmem:[%s4541_s3 + $0x98] sm:$0xf0]  ;;  %249 = vmatpush.bf16.msra.mxu0 %v2634_v3  ;;  %v2622_v10 = vor.u32 %v3022_v6, %v2621_v5  ;;  %v3019_v13 = vld [vmem:[#allocation4 + $0x80] sm:$0xf0]  ;;  %v2705_v14 = vld [vmem:[%s4541_s3 + $0x78] sm:$0xf] }
   0x9   :  { %523 = vmatpush.bf16.msra.mxu3 %v3367_v7  ;;  %v3376_v11 = vor.u32 %v3046_v9, %v2717_v8  ;;  %v3043_v15 = vld [vmem:[%s4541_s3 + $0x80] sm:$0xf0]  ;;  %v2610_v16 = vor.u32 %v3019_v13, %v2609_v12  ;;  %v2597_v18 = vld [vmem:[#allocation4 + $0x60] sm:$0xf]  ;;  %v3016_v19 = vld [vmem:[#allocation4 + $0x68] sm:$0xf0] }
   0xa   :  { %v3385_v17 = vor.u32 %v3043_v15, %v2705_v14  ;;  %v2693_v20 = vld [vmem:[%s4541_s3 + $0x60] sm:$0xf]  ;;  %v3040_v21 = vld [vmem:[%s4541_s3 + $0x68] sm:$0xf0]  ;;  %v2598_v22 = vor.u32 %v3016_v19, %v2597_v18  ;;  %v2585_v24 = vld [vmem:[#allocation4 + $0x48] sm:$0xf] }
   0xb   :  { %v3394_v23 = vor.u32 %v3040_v21, %v2693_v20  ;;  %v3013_v25 = vld [vmem:[#allocation4 + $0x50] sm:$0xf0]  ;;  %v3024_v26 = vld [vmem:[#allocation4 + $0xac] sm:$0xf]  ;;  %v2681_v27 = vld [vmem:[%s4541_s3 + $0x48] sm:$0xf] }
   0xc   :  { %250 = vmatpush.bf16.msra.mxu0 %v2622_v10  ;;  %v3037_v28 = vld [vmem:[%s4541_s3 + $0x50] sm:$0xf0]  ;;  %v2635_v29 = vld [vmem:[#allocation4 + $0xb4] sm:$0xf0]  ;;  %v2623_v32 = vld [vmem:[#allocation4 + $0x9c] sm:$0xf0]  ;;  %v2586_v33 = vor.u32 %v3013_v25, %v2585_v24 }
   0xd   :  { %524 = vmatpush.bf16.msra.mxu3 %v3376_v11  ;;  %v2638_v30 = vor.u32 %v3024_v26, %v2635_v29  ;;  %v3021_v31 = vld [vmem:[#allocation4 + $0x94] sm:$0xf]  ;;  %v3403_v34 = vor.u32 %v3037_v28, %v2681_v27  ;;  %v2573_v35 = vld [vmem:[#allocation4 + $0x30] sm:$0xf]  ;;  %v3010_v36 = vld [vmem:[#allocation4 + $0x38] sm:$0xf0] }
   0xe   :  { %v2669_v37 = vld [vmem:[%s4541_s3 + $0x30] sm:$0xf]  ;;  %v2626_v38 = vor.u32 %v3021_v31, %v2623_v32  ;;  %v3034_v39 = vld [vmem:[%s4541_s3 + $0x38] sm:$0xf0]  ;;  %v2611_v41 = vld [vmem:[#allocation4 + $0x84] sm:$0xf0]  ;;  %v2574_v42 = vor.u32 %v3010_v36, %v2573_v35 }
   0xf   :  { %278 = vmatpush.bf16.msra.mxu1 %v2638_v30  ;;  %v3018_v40 = vld [vmem:[#allocation4 + $0x7c] sm:$0xf]  ;;  %v2561_v43 = vld [vmem:[#allocation4 + $0x18] sm:$0xf]  ;;  %v3007_v44 = vld [vmem:[#allocation4 + $0x20] sm:$0xf0]  ;;  %v3412_v45 = vor.u32 %v3034_v39, %v2669_v37 }
  0x10   :  { %251 = vmatpush.bf16.msra.mxu0 %v2610_v16  ;;  %v2657_v46 = vld [vmem:[%s4541_s3 + $0x18] sm:$0xf]  ;;  %v3031_v47 = vld [vmem:[%s4541_s3 + $0x20] sm:$0xf0]  ;;  %v2614_v48 = vor.u32 %v3018_v40, %v2611_v41  ;;  %v2599_v50 = vld [vmem:[#allocation4 + $0x6c] sm:$0xf0]  ;;  %v2562_v56 = vor.u32 %v3007_v44, %v2561_v43 }
  0x11   :  { %525 = vmatpush.bf16.msra.mxu3 %v3385_v17  ;;  %v3015_v49 = vld [vmem:[#allocation4 + $0x64] sm:$0xf]  ;;  %v2641_v51 = vld [vmem:[#allocation4 + $0xb0] sm:$0xf]  ;;  %v3026_v52 = vld [vmem:[#allocation4 + $0xb8] sm:$0xf0]  ;;  %v3424_v58 = vor.u32 %v3031_v47, %v2657_v46 }
  0x12   :  { %v2549_v53 = vld [vmem:[#allocation4] sm:$0xf]  ;;  %v3004_v54 = vld [vmem:[#allocation4 + $0x8] sm:$0xf0]  ;;  %v2642_v55 = vor.u32 %v3026_v52, %v2641_v51  ;;  %v2731_v61 = vld [vmem:[%s4541_s3 + $0xb4] sm:$0xf0]  ;;  %v2602_v62 = vor.u32 %v3015_v49, %v2599_v50 }
  0x13   :  { %279 = vmatpush.bf16.msra.mxu1 %v2626_v38  ;;  %v2645_v57 = vld [vmem:[%s4541_s3] sm:$0xf]  ;;  %v3028_v59 = vld [vmem:[%s4541_s3 + $0x8] sm:$0xf0]  ;;  %v2737_v63 = vld [vmem:[%s4541_s3 + $0xb0] sm:$0xf]  ;;  %v2550_v5 = vor.u32 %v3004_v54, %v2549_v53 }
  0x14   :  { %252 = vmatpush.bf16.msra.mxu0 %v2598_v22  ;;  %v3048_v60 = vld [vmem:[%s4541_s3 + $0xac] sm:$0xf]  ;;  %v3050_v0 = vld [vmem:[%s4541_s3 + $0xb8] sm:$0xf0]  ;;  %307 = vmatpush.bf16.msra.mxu2 %v2642_v55  ;;  %v2629_v1 = vld [vmem:[#allocation4 + $0x98] sm:$0xf]  ;;  %v3442_v8 = vor.u32 %v3028_v59, %v2645_v57 }
  0x15   :  { %526 = vmatpush.bf16.msra.mxu3 %v3394_v23  ;;  %v3012_v2 = vld [vmem:[#allocation4 + $0x4c] sm:$0xf]  ;;  %v2587_v3 = vld [vmem:[#allocation4 + $0x54] sm:$0xf0]  ;;  %v3023_v4 = vld [vmem:[#allocation4 + $0xa0] sm:$0xf0]  ;;  %v3454_v12 = vor.u32 %v3050_v0, %v2737_v63  ;;  %v3462_v15 = vor.u32 %v3048_v60, %v2731_v61 }
  0x16   :  { %v2630_v6 = vor.u32 %v3023_v4, %v2629_v1  ;;  %v3447_v9 = vld [vmem:[%s4538_s0] sm:$0xff]  ;;  %v3045_v13 = vld [vmem:[%s4541_s3 + $0x94] sm:$0xf]  ;;  %v2725_v14 = vld [vmem:[%s4541_s3 + $0x98] sm:$0xf]  ;;  %v2590_v18 = vor.u32 %v3012_v2, %v2587_v3 }
  0x17   :  { %280 = vmatpush.bf16.msra.mxu1 %v2614_v48  ;;  %v3452_v10 = vld [vmem:[%s4539_s1] sm:$0xff]  ;;  %v3020_v20 = vld [vmem:[#allocation4 + $0x88] sm:$0xf0]  ;;  %v3009_v22 = vld [vmem:[#allocation4 + $0x34] sm:$0xf] }
  0x18   :  { %253 = vmatpush.bf16.msra.mxu0 %v2586_v33  ;;  %v3047_v16 = vld [vmem:[%s4541_s3 + $0xa0] sm:$0xf0]  ;;  %308 = vmatpush.bf16.msra.mxu2 %v2630_v6  ;;  %v2617_v19 = vld [vmem:[#allocation4 + $0x80] sm:$0xf]  ;;  %v3472_v26 = vpack.c.bf16 %v3452_v10, %v3452_v10  ;;  %v3042_v27 = vld [vmem:[%s4541_s3 + $0x7c] sm:$0xf] }
  0x19   :  { %527 = vmatpush.bf16.msra.mxu3 %v3403_v34  ;;  %v2719_v21 = vld [vmem:[%s4541_s3 + $0x9c] sm:$0xf0]  ;;  %v2618_v25 = vor.u32 %v3020_v20, %v2617_v19  ;;  %v3479_v28 = vor.u32 %v3047_v16, %v2725_v14  ;;  %v3044_v31 = vld [vmem:[%s4541_s3 + $0x88] sm:$0xf0]  ;;  %v2605_v33 = vld [vmem:[#allocation4 + $0x68] sm:$0xf] }
  0x1a   :  { %v2575_v24 = vld [vmem:[#allocation4 + $0x3c] sm:$0xf0]  ;;  %v3485_v30 = vor.u32 %v3045_v13, %v2719_v21  ;;  %v3017_v35 = vld [vmem:[#allocation4 + $0x70] sm:$0xf0]  ;;  %v2707_v36 = vld [vmem:[%s4541_s3 + $0x84] sm:$0xf0] }
  0x1b   :  { %281 = vmatpush.bf16.msra.mxu1 %v2602_v62  ;;  %v2713_v29 = vld [vmem:[%s4541_s3 + $0x80] sm:$0xf]  ;;  %v2578_v32 = vor.u32 %v3009_v22, %v2575_v24  ;;  %v3006_v37 = vld [vmem:[#allocation4 + $0x1c] sm:$0xf]  ;;  %v2563_v38 = vld [vmem:[#allocation4 + $0x24] sm:$0xf0]  ;;  %v2606_v39 = vor.u32 %v3017_v35, %v2605_v33  ;;  %v3499_v43 = vor.u32 %v3042_v27, %v2707_v36 }
  0x1c   :  { %254 = vmatpush.bf16.msra.mxu0 %v2574_v42  ;;  %309 = vmatpush.bf16.msra.mxu2 %v2618_v25  ;;  %v2593_v40 = vld [vmem:[#allocation4 + $0x50] sm:$0xf]  ;;  %v3014_v41 = vld [vmem:[#allocation4 + $0x58] sm:$0xf0]  ;;  %v3496_v42 = vor.u32 %v3044_v31, %v2713_v29  ;;  %v3039_v44 = vld [vmem:[%s4541_s3 + $0x64] sm:$0xf]  ;;  %v2566_v48 = vor.u32 %v3006_v37, %v2563_v38 }
  0x1d   :  { %528 = vmatpush.bf16.msra.mxu3 %v3412_v45  ;;  %v2701_v46 = vld [vmem:[%s4541_s3 + $0x68] sm:$0xf]  ;;  %v3041_v47 = vld [vmem:[%s4541_s3 + $0x70] sm:$0xf0]  ;;  %v2695_v49 = vld [vmem:[%s4541_s3 + $0x6c] sm:$0xf0]  ;;  %v2594_v52 = vor.u32 %v3014_v41, %v2593_v40 }
  0x1e   :  { %v3003_v50 = vld [vmem:[#allocation4 + $0x4] sm:$0xf]  ;;  %v2551_v51 = vld [vmem:[#allocation4 + $0xc] sm:$0xf0]  ;;  %v2581_v53 = vld [vmem:[#allocation4 + $0x38] sm:$0xf]  ;;  %v3514_v55 = vor.u32 %v3041_v47, %v2701_v46 }
  0x1f   :  { %282 = vmatpush.bf16.msra.mxu1 %v2590_v18  ;;  %v3011_v54 = vld [vmem:[#allocation4 + $0x40] sm:$0xf0]  ;;  %v2554_v57 = vor.u32 %v3003_v50, %v2551_v51  ;;  %v2689_v59 = vld [vmem:[%s4541_s3 + $0x50] sm:$0xf]  ;;  %v3038_v60 = vld [vmem:[%s4541_s3 + $0x58] sm:$0xf0] }
  0x20   :  { %255 = vmatpush.bf16.msra.mxu0 %v2562_v56  ;;  %310 = vmatpush.bf16.msra.mxu2 %v2606_v39  ;;  %v3517_v56 = vor.u32 %v3039_v44, %v2695_v49  ;;  %v3036_v61 = vld [vmem:[%s4541_s3 + $0x4c] sm:$0xf]  ;;  %v2683_v62 = vld [vmem:[%s4541_s3 + $0x54] sm:$0xf0]  ;;  %v2582_v63 = vor.u32 %v3011_v54, %v2581_v53  ;;  %v2569_v0 = vld [vmem:[#allocation4 + $0x20] sm:$0xf]  ;;  %v3532_v2 = vor.u32 %v3038_v60, %v2689_v59 }
  0x21   :  { %529 = vmatpush.bf16.msra.mxu3 %v3424_v58  ;;  %v3008_v1 = vld [vmem:[#allocation4 + $0x28] sm:$0xf0]  ;;  %v3535_v3 = vor.u32 %v3036_v61, %v2683_v62  ;;  %v2677_v4 = vld [vmem:[%s4541_s3 + $0x38] sm:$0xf]  ;;  %v3033_v13 = vld [vmem:[%s4541_s3 + $0x34] sm:$0xf] }
  0x22   :  { %v3000_v6 = vld [vmem:[%s4538_s0 + $0x8] sm:$0xff]  ;;  %v2671_v14 = vld [vmem:[%s4541_s3 + $0x3c] sm:$0xf0]  ;;  %v2570_v16 = vor.u32 %v3008_v1, %v2569_v0  ;;  %v3030_v20 = vld [vmem:[%s4541_s3 + $0x1c] sm:$0xf] }
  0x23   :  { %283 = vmatpush.bf16.msra.mxu1 %v2578_v32  ;;  %v3558_v19 = vor.u32 %v3033_v13, %v2671_v14  ;;  %v2557_v21 = vld [vmem:[#allocation4 + $0x8] sm:$0xf]  ;;  %v3005_v22 = vld [vmem:[#allocation4 + $0x10] sm:$0xf0]  ;;  %v2665_v25 = vld [vmem:[%s4541_s3 + $0x20] sm:$0xf] }
  0x24   :  { %256 = vmatpush.bf16.msra.mxu0 %v2550_v5  ;;  %311 = vmatpush.bf16.msra.mxu2 %v2594_v52  ;;  %v3035_v5 = vld [vmem:[%s4541_s3 + $0x40] sm:$0xf0]  ;;  %v2659_v24 = vld [vmem:[%s4541_s3 + $0x24] sm:$0xf0]  ;;  %v3032_v27 = vld [vmem:[%s4541_s3 + $0x28] sm:$0xf0]  ;;  %v2558_v29 = vor.u32 %v3005_v22, %v2557_v21 }
  0x25   :  { %530 = vmatpush.bf16.msra.mxu3 %v3442_v8  ;;  %v3555_v18 = vor.u32 %v3035_v5, %v2677_v4  ;;  %v3574_v31 = vor.u32 %v3032_v27, %v2665_v25  ;;  %v3577_v32 = vor.u32 %v3030_v20, %v2659_v24  ;;  %v2653_v33 = vld [vmem:[%s4541_s3 + $0x8] sm:$0xf]  ;;  %v3029_v35 = vld [vmem:[%s4541_s3 + $0x10] sm:$0xf0]  ;;  %v3027_v36 = vld [vmem:[%s4541_s3 + $0x4] sm:$0xf] }
  0x26   :  { %v2647_v37 = vld [vmem:[%s4541_s3 + $0xc] sm:$0xf0]  ;;  %v3594_v38 = vor.u32 %v3029_v35, %v2653_v33  ;;  %v89_v44 = vld [vmem:[%s4542_s4] sm:$0x7] }
  0x27   :  { %257 = vmatmul.bf16.vlgmr.msra.gmra.mxu0 %v3447_v9  ;;  %284 = vmatpush.bf16.msra.mxu1 %v2566_v48  ;;  %v3597_v39 = vor.u32 %v3027_v36, %v2647_v37  ;;  %v3001_v40 = vld [vmem:[%s4538_s0 + $0x10] sm:$0xff]  ;;  %v3675_v47 = vperm.slane %v89_v44, 0  ;;  %v3696_v33 = vperm.slane %v89_v44, 2 }
  0x28   :  { %549 = vmatpush.bf16.msrb.mxu0 %v3454_v12  ;;  %531 = vmatmul.bf16.vlgmr.msra.gmra.mxu3 %v3472_v26 }
  0x29   :  { %536 = vmatpush.bf16.msrb.mxu3 %v3462_v15  ;;  %312 = vmatpush.bf16.msra.mxu2 %v2582_v63 }
  0x2b   :  { %285 = vmatpush.bf16.msra.mxu1 %v2554_v57  ;;  %v3683_v57 = vperm.slane %v89_v44, 1  ;;  %v3706_v44 = vld [vmem:[%s4543_s5] ss:$0 sm:$0xff] }
  0x2c   :  { %550 = vmatpush.bf16.msrb.mxu0 %v3479_v28 }
  0x2d   :  { %537 = vmatpush.bf16.msrb.mxu3 %v3485_v30  ;;  %313 = vmatpush.bf16.msra.mxu2 %v2570_v16 }
  0x2e   :  { %286 = vmatmul.bf16.vlgmr.msra.gmra.mxu1 %v3447_v9 }
  0x2f   :  { %621 = vmatpush.bf16.msrb.mxu1 %v3367_v7 }
  0x30   :  { %551 = vmatpush.bf16.msrb.mxu0 %v3496_v42 }
  0x31   :  { %538 = vmatpush.bf16.msrb.mxu3 %v3499_v43  ;;  %314 = vmatpush.bf16.msra.mxu2 %v2558_v29 }
  0x33   :  { %622 = vmatpush.bf16.msrb.mxu1 %v3376_v11 }
  0x34   :  { %552 = vmatpush.bf16.msrb.mxu0 %v3514_v55  ;;  %315 = vmatmul.bf16.vlgmr.msra.gmra.mxu2 %v3447_v9  ;;  %v3002_v9 = vld [vmem:[%s4538_s0 + $0x18] sm:$0xff] }
  0x35   :  { %539 = vmatpush.bf16.msrb.mxu3 %v3517_v56  ;;  %634 = vmatpush.bf16.msrb.mxu2 %v3462_v15 }
  0x37   :  { %262 = vmatmul.bf16.gmra.mxu0 %v3000_v6  ;;  %623 = vmatpush.bf16.msrb.mxu1 %v3385_v17 }
  0x38   :  { %553 = vmatpush.bf16.msrb.mxu0 %v3532_v2 }
  0x39   :  { %540 = vmatpush.bf16.msrb.mxu3 %v3535_v3  ;;  %635 = vmatpush.bf16.msrb.mxu2 %v3485_v30 }
  0x3b   :  { %624 = vmatpush.bf16.msrb.mxu1 %v3394_v23 }
  0x3c   :  { %554 = vmatpush.bf16.msrb.mxu0 %v3555_v18 }
  0x3d   :  { %541 = vmatpush.bf16.msrb.mxu3 %v3558_v19  ;;  %636 = vmatpush.bf16.msrb.mxu2 %v3499_v43 }
  0x3e   :  { %291 = vmatmul.bf16.gmra.mxu1 %v3000_v6 }
  0x3f   :  { %625 = vmatpush.bf16.msrb.mxu1 %v3403_v34 }
  0x40   :  { %555 = vmatpush.bf16.msrb.mxu0 %v3574_v31 }
  0x41   :  { %542 = vmatpush.bf16.msrb.mxu3 %v3577_v32  ;;  %637 = vmatpush.bf16.msrb.mxu2 %v3517_v56 }
  0x43   :  { %626 = vmatpush.bf16.msrb.mxu1 %v3412_v45 }
  0x44   :  { %556 = vmatpush.bf16.msrb.mxu0 %v3594_v38  ;;  %320 = vmatmul.bf16.gmra.mxu2 %v3000_v6 }
  0x45   :  { %543 = vmatpush.bf16.msrb.mxu3 %v3597_v39  ;;  %638 = vmatpush.bf16.msrb.mxu2 %v3535_v3 }
  0x47   :  { %267 = vmatmul.bf16.gmra.mxu0 %v3001_v40  ;;  %627 = vmatpush.bf16.msrb.mxu1 %v3424_v58 }
  0x48   :  { %717 = vmatpush.bf16.msra.mxu0 %v3367_v7  ;;  %544 = vmatmul.bf16.vlgmr.msrb.gmra.mxu3 %v3472_v26 }
  0x49   :  { %647 = vmatpush.bf16.msra.mxu3 %v3454_v12  ;;  %639 = vmatpush.bf16.msrb.mxu2 %v3558_v19 }
  0x4b   :  { %628 = vmatpush.bf16.msrb.mxu1 %v3442_v8 }
  0x4c   :  { %718 = vmatpush.bf16.msra.mxu0 %v3376_v11 }
  0x4d   :  { %648 = vmatpush.bf16.msra.mxu3 %v3479_v28  ;;  %640 = vmatpush.bf16.msrb.mxu2 %v3577_v32 }
  0x4e   :  { %296 = vmatmul.bf16.gmra.mxu1 %v3001_v40 }
  0x4f   :  { %730 = vmatpush.bf16.msra.mxu1 %v3462_v15 }
  0x50   :  { %719 = vmatpush.bf16.msra.mxu0 %v3385_v17 }
  0x51   :  { %649 = vmatpush.bf16.msra.mxu3 %v3496_v42  ;;  %641 = vmatpush.bf16.msrb.mxu2 %v3597_v39 }
  0x53   :  { %731 = vmatpush.bf16.msra.mxu1 %v3485_v30 }
  0x54   :  { %720 = vmatpush.bf16.msra.mxu0 %v3394_v23  ;;  %325 = vmatmul.bf16.gmra.mxu2 %v3001_v40 }
  0x55   :  { %650 = vmatpush.bf16.msra.mxu3 %v3514_v55  ;;  %743 = vmatpush.bf16.msra.mxu2 %v3454_v12 }
  0x57   :  { %272 = vmatmul.bf16.gmra.mxu0 %v3002_v9  ;;  %732 = vmatpush.bf16.msra.mxu1 %v3499_v43 }
  0x58   :  { %721 = vmatpush.bf16.msra.mxu0 %v3403_v34 }
  0x59   :  { %651 = vmatpush.bf16.msra.mxu3 %v3532_v2  ;;  %744 = vmatpush.bf16.msra.mxu2 %v3479_v28 }
  0x5b   :  { %733 = vmatpush.bf16.msra.mxu1 %v3517_v56 }
  0x5c   :  { %722 = vmatpush.bf16.msra.mxu0 %v3412_v45 }
  0x5d   :  { %652 = vmatpush.bf16.msra.mxu3 %v3555_v18  ;;  %745 = vmatpush.bf16.msra.mxu2 %v3496_v42 }
  0x5e   :  { %301 = vmatmul.bf16.gmra.mxu1 %v3002_v9 }
  0x5f   :  { %734 = vmatpush.bf16.msra.mxu1 %v3535_v3 }
  0x60   :  { %723 = vmatpush.bf16.msra.mxu0 %v3424_v58 }
  0x61   :  { %653 = vmatpush.bf16.msra.mxu3 %v3574_v31  ;;  %746 = vmatpush.bf16.msra.mxu2 %v3514_v55 }
  0x63   :  { %735 = vmatpush.bf16.msra.mxu1 %v3558_v19 }
  0x64   :  { %724 = vmatpush.bf16.msra.mxu0 %v3442_v8  ;;  %330 = vmatmul.bf16.gmra.mxu2 %v3002_v9 }
  0x65   :  { %654 = vmatpush.bf16.msra.mxu3 %v3594_v38  ;;  %747 = vmatpush.bf16.msra.mxu2 %v3532_v2 }
  0x67   :  { %557 = vmatmul.bf16.vlgmr.msrb.gmra.mxu0 %v3472_v26  ;;  %736 = vmatpush.bf16.msra.mxu1 %v3577_v32 }
  0x68   :  { %826 = vmatpush.bf16.msrb.mxu0 %v3462_v15 }
  0x69   :  { %813 = vmatpush.bf16.msrb.mxu3 %v3367_v7  ;;  %748 = vmatpush.bf16.msra.mxu2 %v3555_v18 }
  0x6b   :  { %737 = vmatpush.bf16.msra.mxu1 %v3597_v39 }
  0x6c   :  { %827 = vmatpush.bf16.msrb.mxu0 %v3485_v30 }
  0x6d   :  { %814 = vmatpush.bf16.msrb.mxu3 %v3376_v11  ;;  %749 = vmatpush.bf16.msra.mxu2 %v3574_v31 }
  0x70   :  { %828 = vmatpush.bf16.msrb.mxu0 %v3499_v43 }
  0x71   :  { %815 = vmatpush.bf16.msrb.mxu3 %v3385_v17  ;;  %750 = vmatpush.bf16.msra.mxu2 %v3594_v38 }
  0x74   :  { %829 = vmatpush.bf16.msrb.mxu0 %v3517_v56 }
  0x75   :  { %816 = vmatpush.bf16.msrb.mxu3 %v3394_v23 }
  0x78   :  { %830 = vmatpush.bf16.msrb.mxu0 %v3535_v3 }
  0x79   :  { %817 = vmatpush.bf16.msrb.mxu3 %v3403_v34 }
  0x7c   :  { %831 = vmatpush.bf16.msrb.mxu0 %v3558_v19 }
  0x7d   :  { %818 = vmatpush.bf16.msrb.mxu3 %v3412_v45 }
  0x80   :  { %832 = vmatpush.bf16.msrb.mxu0 %v3577_v32 }
  0x81   :  { %819 = vmatpush.bf16.msrb.mxu3 %v3424_v58 }
  0x84   :  { %833 = vmatpush.bf16.msrb.mxu0 %v3597_v39 }
  0x85   :  { %820 = vmatpush.bf16.msrb.mxu3 %v3442_v8 }
  0xa4   :  { %v258_v26 = vpop.f32.mrf.mxu0 }
  0xa5   :  { %v259_v48 = vadd.f32 %v258_v26, %v3675_v47 }
  0xab   :  { %v532_v41 = vpop.f32.mrf.mxu3  ;;  %v287_v59 = vpop.f32.mrf.mxu1 }
  0xac   :  { %v3673_v46 = vpop.f32.mrf.mxu0  ;;  %v568_v51 = vadd.f32 %v532_v41, %v259_v48  ;;  %v288_v63 = vadd.f32 %v287_v59, %v3683_v57 }
  0xae   :  { %v2739_v53 = vmul.f32 -1.442695, %v568_v51 }
  0xb0   :  { %3127 = vpow2.f32 %v2739_v53 }
  0xb3   :  { %v534_v49 = vpop.f32.mrf.mxu3 }
  0xb4   :  { %v263_v50 = vpop.f32.mrf.mxu0 }
  0xb5   :  { %v3679_v52 = vadd.f32 %v263_v50, %v3675_v47 }
  0xb6   :  { %v3128_v60 = vpop.eup %3127 }
  0xb7   :  { %v572_v0 = vadd.f32 1.0, %v3128_v60  ;;  %v316_v1 = vpop.f32.mrf.mxu2 }
  0xb9   :  { %3129 = vrcp.f32 %v572_v0  ;;  %v584_v49 = vand.u32 2147483648, %v572_v0  ;;  %vm578_vm1 = vweird.f32 %v572_v0  ;;  %v582_v50 = vand.u32 2147483647, %v572_v0 }
  0xbb   :  { %vm583_vm3 = vcmp.eq.f32.partialorder %v582_v50, 8.507059e+37 }
  0xbc   :  { %v3681_v54 = vpop.f32.mrf.mxu0 }
  0xbf   :  { %v3130_v14 = vpop.eup %3129  ;;  %v3691_v20 = vpop.f32.mrf.mxu2 }
  0xc0   :  { %v574_v22 = vmul.f32 %v3130_v14, %v572_v0  ;;  %vm579_vm0 = vweird.f32 %v3130_v14 }
  0xc1   :  { %vm580_vm2 = vmor %vm578_vm1, %vm579_vm0 }
  0xc2   :  { %v575_v29 = vsub.f32 1.0, %v574_v22 }
  0xc4   :  { %v268_v61 = vpop.f32.mrf.mxu0  ;;  %v576_v37 = vmul.f32 %v3130_v14, %v575_v29 }
  0xc5   :  { %v3686_v62 = vadd.f32 %v268_v61, %v3675_v47  ;;  %v585_v61 = vor.u32 1.1754944e-38, %v584_v49 }
  0xc6   :  { %v577_v48 = vadd.f32 %v3130_v14, %v576_v37 }
  0xc7   :  { %v321_v35 = vpop.f32.mrf.mxu2 }
  0xc8   :  { %v3699_v36 = vadd.f32 %v321_v35, %v3696_v33  ;;  %v581_v59 = vsel %vm580_vm2, %v3130_v14, %v577_v48 }
  0xcb   :  { %v545_v4 = vpop.f32.mrf.mxu3 }
  0xcc   :  { %v588_v5 = vadd.f32 %v545_v4, %v288_v63  ;;  %v3689_v13 = vpop.f32.mrf.mxu0  ;;  %v317_v63 = vadd.f32 %v316_v1, %v3696_v33 }
  0xce   :  { %v2740_v6 = vmul.f32 -1.442695, %v588_v5  ;;  %v586_v5 = vsel %vm583_vm3, %v585_v61, %v581_v59 }
  0xcf   :  { %v3708_v51 = vpop.f32.mrf.mxu2 }
  0xd0   :  { %3131 = vpow2.f32 %v2740_v6 }
  0xd3   :  { %v547_v16 = vpop.f32.mrf.mxu3 }
  0xd4   :  { %v273_v25 = vpop.f32.mrf.mxu0 }
  0xd5   :  { %v3694_v27 = vadd.f32 %v273_v25, %v3675_v47 }
  0xd6   :  { %v3132_v21 = vpop.eup %3131 }
  0xd7   :  { %v592_v24 = vadd.f32 1.0, %v3132_v21  ;;  %4546 = vst [vmem:[#allocation7_spill] sm:$0xff] %v3694_v27  ;;  %v326_v25 = vpop.f32.mrf.mxu2 }
  0xd8   :  { %v3713_v14 = vadd.f32 %v326_v25, %v3696_v33 }
  0xd9   :  { %3133 = vrcp.f32 %v592_v24  ;;  %vm598_vm4 = vweird.f32 %v592_v24  ;;  %v604_v6 = vand.u32 2147483648, %v592_v24  ;;  %v602_v21 = vand.u32 2147483647, %v592_v24 }
  0xdb   :  { %v605_v35 = vor.u32 1.1754944e-38, %v604_v6  ;;  %vm603_vm7 = vcmp.eq.f32.partialorder %v602_v21, 8.507059e+37 }
  0xdc   :  { %v3701_v9 = vpop.f32.mrf.mxu0 }
  0xdd   :  { %4547 = vst [vmem:[#allocation8_spill] sm:$0xff] %v3701_v9 }
  0xdf   :  { %v3134_v40 = vpop.eup %3133  ;;  %v3715_v48 = vpop.f32.mrf.mxu2 }
  0xe0   :  { %v594_v26 = vmul.f32 %v3134_v40, %v592_v24  ;;  %vm599_vm5 = vweird.f32 %v3134_v40 }
  0xe1   :  { %vm600_vm6 = vmor %vm598_vm4, %vm599_vm5 }
  0xe2   :  { %v595_v41 = vsub.f32 1.0, %v594_v26 }
  0xe4   :  { %v596_v53 = vmul.f32 %v3134_v40, %v595_v41  ;;  %v558_v60 = vpop.f32.mrf.mxu0 }
  0xe5   :  { %v611_v4 = vadd.f32 %v3706_v44, %v558_v60 }
  0xe6   :  { %v597_v0 = vadd.f32 %v3134_v40, %v596_v53 }
  0xe7   :  { %v612_v16 = vmul.f32 %v611_v4, %v586_v5  ;;  %v331_v53 = vpop.f32.mrf.mxu2 }
  0xe8   :  { %v601_v29 = vsel %vm600_vm6, %v3134_v40, %v597_v0  ;;  %v3724_v59 = vadd.f32 %v331_v53, %v3696_v33 }
  0xe9   :  { %v613_v22 = vadd.f32 %v612_v16, %v317_v63  ;;  %v606_v37 = vsel %vm603_vm7, %v605_v35, %v601_v29  ;;  %v261_v16 = vadd.f32 %v3673_v46, %v3675_v47 }
  0xea   :  { %v615_v26 = vsub.f32 1.0, %v606_v37  ;;  %v617_v50 = vmul.f32 %v606_v37, %v3452_v10  ;;  %4548 = vst [vmem:[#allocation9_spill] sm:$0xff] %v3724_v59  ;;  %v289_v10 = vpop.f32.mrf.mxu1 }
  0xeb   :  { %3135 = vtanh.f32 %v613_v22  ;;  %v290_v29 = vadd.f32 %v289_v10, %v3683_v57 }
  0xec   :  { %v560_v1 = vpop.f32.mrf.mxu0 }
  0xef   :  { %v3761_v6 = vpop.f32.mrf.mxu2 }
  0xf0   :  { %4550 = vst [vmem:[#allocation11_spill] sm:$0xff] %v3761_v6 }
  0xf1   :  { %v3136_v41 = vpop.eup %3135 }
  0xf2   :  { %v616_v49 = vmul.f32 %v3136_v41, %v615_v26  ;;  %v3749_v60 = vpop.f32.mrf.mxu1 }
  0xf4   :  { %v3718_v24 = vadd.f32 %v617_v50, %v616_v49 }
  0xf6   :  { %v620_v40 = vpack.c.bf16 %v3718_v24, %v3718_v24 }
  0xf8   :  { %629 = vmatmul.bf16.vlgmr.msrb.gmra.mxu1 %v620_v40  ;;  %642 = vmatmul.bf16.vlgmr.msrb.gmra.mxu2 %v620_v40 }
  0xf9   :  { %655 = vmatmul.bf16.vlgmr.msra.gmra.mxu3 %v620_v40  ;;  %839 = vmatpush.bf16.msrb.mxu1 %v3454_v12 }
  0xfa   :  { %909 = vmatpush.bf16.msrb.mxu2 %v3367_v7  ;;  %922 = vmatpush.bf16.msra.mxu3 %v3462_v15  ;;  %v3751_v61 = vpop.f32.mrf.mxu1 }
  0xfd   :  { %840 = vmatpush.bf16.msrb.mxu1 %v3479_v28 }
  0xfe   :  { %910 = vmatpush.bf16.msrb.mxu2 %v3376_v11  ;;  %923 = vmatpush.bf16.msra.mxu3 %v3485_v30 }
 0x101   :  { %841 = vmatpush.bf16.msrb.mxu1 %v3496_v42 }
 0x102   :  { %911 = vmatpush.bf16.msrb.mxu2 %v3385_v17  ;;  %924 = vmatpush.bf16.msra.mxu3 %v3499_v43  ;;  %v3753_v63 = vpop.f32.mrf.mxu1 }
 0x105   :  { %842 = vmatpush.bf16.msrb.mxu1 %v3514_v55 }
 0x106   :  { %912 = vmatpush.bf16.msrb.mxu2 %v3394_v23  ;;  %925 = vmatpush.bf16.msra.mxu3 %v3517_v56 }
 0x109   :  { %843 = vmatpush.bf16.msrb.mxu1 %v3532_v2 }
 0x10a   :  { %913 = vmatpush.bf16.msrb.mxu2 %v3403_v34  ;;  %926 = vmatpush.bf16.msra.mxu3 %v3535_v3  ;;  %v3755_v4 = vpop.f32.mrf.mxu1 }
 0x10d   :  { %844 = vmatpush.bf16.msrb.mxu1 %v3555_v18 }
 0x10e   :  { %914 = vmatpush.bf16.msrb.mxu2 %v3412_v45  ;;  %927 = vmatpush.bf16.msra.mxu3 %v3558_v19 }
 0x111   :  { %845 = vmatpush.bf16.msrb.mxu1 %v3574_v31 }
 0x112   :  { %915 = vmatpush.bf16.msrb.mxu2 %v3424_v58  ;;  %928 = vmatpush.bf16.msra.mxu3 %v3577_v32  ;;  %v3757_v5 = vpop.f32.mrf.mxu1 }
 0x115   :  { %846 = vmatpush.bf16.msrb.mxu1 %v3594_v38 }
 0x116   :  { %916 = vmatpush.bf16.msrb.mxu2 %v3442_v8  ;;  %929 = vmatpush.bf16.msra.mxu3 %v3597_v39 }
 0x11a   :  { %v3759_v0 = vpop.f32.mrf.mxu1 }
 0x11b   :  { %4549 = vst [vmem:[#allocation10_spill] sm:$0xff] %v3759_v0 }
 0x175   :  { %v630_v21 = vpop.f32.mrf.mxu1 }
 0x176   :  { %v666_v22 = vadd.f32 %v630_v21, %v261_v16 }
 0x178   :  { %v2741_v25 = vmul.f32 -1.442695, %v666_v22 }
 0x17a   :  { %3137 = vpow2.f32 %v2741_v25 }
 0x17b   :  { %v643_v35 = vpop.f32.mrf.mxu2 }
 0x17c   :  { %v686_v1 = vadd.f32 %v643_v35, %v290_v29  ;;  %v656_v37 = vpop.f32.mrf.mxu3 }
 0x17d   :  { %v632_v26 = vpop.f32.mrf.mxu1 }
 0x17e   :  { %v2742_v41 = vmul.f32 -1.442695, %v686_v1 }
 0x180   :  { %v3138_v49 = vpop.eup %3137  ;;  %3139 = vpow2.f32 %v2742_v41 }
 0x181   :  { %v670_v50 = vadd.f32 1.0, %v3138_v49 }
 0x183   :  { %3141 = vrcp.f32 %v670_v50  ;;  %v645_v40 = vpop.f32.mrf.mxu2  ;;  %v682_v22 = vand.u32 2147483648, %v670_v50  ;;  %v680_v25 = vand.u32 2147483647, %v670_v50  ;;  %vm676_vm9 = vweird.f32 %v670_v50 }
 0x184   :  { %v658_v53 = vpop.f32.mrf.mxu3  ;;  %v706_v40 = vadd.f32 %v3706_v44, %v656_v37 }
 0x185   :  { %v683_v1 = vor.u32 1.1754944e-38, %v682_v22  ;;  %vm681_vm11 = vcmp.eq.f32.partialorder %v680_v25, 8.507059e+37 }
 0x186   :  { %v3140_v6 = vpop.eup %3139 }
 0x187   :  { %v690_v9 = vadd.f32 1.0, %v3140_v6  ;;  %v319_v6 = vadd.f32 %v3691_v20, %v3696_v33 }
 0x189   :  { %v3142_v46 = vpop.eup %3141  ;;  %3143 = vrcp.f32 %v690_v9  ;;  %v700_v59 = vand.u32 2147483647, %v690_v9  ;;  %vm696_vm13 = vweird.f32 %v690_v9 }
 0x18a   :  { %v672_v16 = vmul.f32 %v3142_v46, %v670_v50  ;;  %vm677_vm8 = vweird.f32 %v3142_v46 }
 0x18b   :  { %vm678_vm10 = vmor %vm676_vm9, %vm677_vm8  ;;  %vm701_vm15 = vcmp.eq.f32.partialorder %v700_v59, 8.507059e+37 }
 0x18c   :  { %v673_v21 = vsub.f32 1.0, %v672_v16 }
 0x18e   :  { %v674_v10 = vmul.f32 %v3142_v46, %v673_v21  ;;  %v702_v21 = vand.u32 2147483648, %v690_v9 }
 0x18f   :  { %v3144_v29 = vpop.eup %3143 }
 0x190   :  { %v692_v35 = vmul.f32 %v3144_v29, %v690_v9  ;;  %v675_v26 = vadd.f32 %v3142_v46, %v674_v10  ;;  %vm697_vm12 = vweird.f32 %v3144_v29  ;;  %v703_v50 = vor.u32 1.1754944e-38, %v702_v21 }
 0x191   :  { %vm698_vm14 = vmor %vm696_vm13, %vm697_vm12 }
 0x192   :  { %v693_v41 = vsub.f32 1.0, %v692_v35  ;;  %v679_v49 = vsel %vm678_vm10, %v3142_v46, %v675_v26 }
 0x193   :  { %v684_v53 = vsel %vm681_vm11, %v683_v1, %v679_v49 }
 0x194   :  { %v694_v16 = vmul.f32 %v3144_v29, %v693_v41  ;;  %v707_v0 = vmul.f32 %v706_v40, %v684_v53 }
 0x196   :  { %v695_v27 = vadd.f32 %v3144_v29, %v694_v16  ;;  %v708_v10 = vadd.f32 %v707_v0, %v319_v6 }
 0x198   :  { %v699_v22 = vsel %vm698_vm14, %v3144_v29, %v695_v27  ;;  %3145 = vtanh.f32 %v708_v10  ;;  %v293_v27 = vadd.f32 %v3749_v60, %v3683_v57 }
 0x199   :  { %v704_v46 = vsel %vm701_vm15, %v703_v50, %v699_v22 }
 0x19a   :  { %v710_v25 = vsub.f32 1.0, %v704_v46  ;;  %v712_v20 = vmul.f32 %v704_v46, %v3718_v24 }
 0x19e   :  { %v3146_v37 = vpop.eup %3145 }
 0x19f   :  { %v711_v35 = vmul.f32 %v3146_v37, %v710_v25 }
 0x1a1   :  { %v3770_v26 = vadd.f32 %v712_v20, %v711_v35 }
 0x1a3   :  { %v716_v1 = vpack.c.bf16 %v3770_v26, %v3770_v26 }
 0x1a5   :  { %725 = vmatmul.bf16.vlgmr.msra.gmra.mxu0 %v716_v1  ;;  %738 = vmatmul.bf16.vlgmr.msra.gmra.mxu1 %v716_v1 }
 0x1a6   :  { %751 = vmatmul.bf16.vlgmr.msra.gmra.mxu2 %v716_v1  ;;  %935 = vmatpush.bf16.msra.mxu0 %v3454_v12 }
 0x1a7   :  { %1005 = vmatpush.bf16.msra.mxu1 %v3367_v7  ;;  %1018 = vmatpush.bf16.msra.mxu2 %v3462_v15 }
 0x1aa   :  { %936 = vmatpush.bf16.msra.mxu0 %v3479_v28 }
 0x1ab   :  { %1006 = vmatpush.bf16.msra.mxu1 %v3376_v11  ;;  %1019 = vmatpush.bf16.msra.mxu2 %v3485_v30 }
 0x1ae   :  { %937 = vmatpush.bf16.msra.mxu0 %v3496_v42 }
 0x1af   :  { %1007 = vmatpush.bf16.msra.mxu1 %v3385_v17  ;;  %1020 = vmatpush.bf16.msra.mxu2 %v3499_v43 }
 0x1b2   :  { %938 = vmatpush.bf16.msra.mxu0 %v3514_v55 }
 0x1b3   :  { %1008 = vmatpush.bf16.msra.mxu1 %v3394_v23  ;;  %1021 = vmatpush.bf16.msra.mxu2 %v3517_v56 }
 0x1b6   :  { %939 = vmatpush.bf16.msra.mxu0 %v3532_v2 }
 0x1b7   :  { %1009 = vmatpush.bf16.msra.mxu1 %v3403_v34  ;;  %1022 = vmatpush.bf16.msra.mxu2 %v3535_v3 }
 0x1ba   :  { %940 = vmatpush.bf16.msra.mxu0 %v3555_v18 }
 0x1bb   :  { %1010 = vmatpush.bf16.msra.mxu1 %v3412_v45  ;;  %1023 = vmatpush.bf16.msra.mxu2 %v3558_v19 }
 0x1be   :  { %941 = vmatpush.bf16.msra.mxu0 %v3574_v31 }
 0x1bf   :  { %1011 = vmatpush.bf16.msra.mxu1 %v3424_v58  ;;  %1024 = vmatpush.bf16.msra.mxu2 %v3577_v32 }
 0x1c2   :  { %942 = vmatpush.bf16.msra.mxu0 %v3594_v38 }
 0x1c3   :  { %1012 = vmatpush.bf16.msra.mxu1 %v3442_v8  ;;  %1025 = vmatpush.bf16.msra.mxu2 %v3597_v39 }
 0x222   :  { %v726_v9 = vpop.f32.mrf.mxu0  ;;  %v739_v59 = vpop.f32.mrf.mxu1 }
 0x223   :  { %v762_v0 = vadd.f32 %v726_v9, %v3679_v52  ;;  %v782_v29 = vadd.f32 %v739_v59, %v293_v27 }
 0x225   :  { %v2743_v41 = vmul.f32 -1.442695, %v762_v0  ;;  %v2744_v49 = vmul.f32 -1.442695, %v782_v29 }
 0x227   :  { %3147 = vpow2.f32 %v2743_v41 }
 0x228   :  { %3149 = vpow2.f32 %v2744_v49 }
 0x229   :  { %v752_v40 = vpop.f32.mrf.mxu2 }
 0x22a   :  { %v728_v6 = vpop.f32.mrf.mxu0  ;;  %v741_v53 = vpop.f32.mrf.mxu1  ;;  %v802_v41 = vadd.f32 %v3706_v44, %v752_v40 }
 0x22d   :  { %v3148_v16 = vpop.eup %3147 }
 0x22e   :  { %v3150_v21 = vpop.eup %3149  ;;  %v766_v10 = vadd.f32 1.0, %v3148_v16 }
 0x22f   :  { %v786_v50 = vadd.f32 1.0, %v3150_v21 }
 0x230   :  { %3151 = vrcp.f32 %v766_v10  ;;  %v778_v20 = vand.u32 2147483648, %v766_v10  ;;  %v776_v27 = vand.u32 2147483647, %v766_v10  ;;  %vm772_vm1 = vweird.f32 %v766_v10 }
 0x231   :  { %3153 = vrcp.f32 %v786_v50  ;;  %v754_v22 = vpop.f32.mrf.mxu2  ;;  %v798_v53 = vand.u32 2147483648, %v786_v50  ;;  %vm792_vm5 = vweird.f32 %v786_v50  ;;  %v796_v21 = vand.u32 2147483647, %v786_v50 }
 0x232   :  { %v779_v0 = vor.u32 1.1754944e-38, %v778_v20  ;;  %vm777_vm3 = vcmp.eq.f32.partialorder %v776_v27, 8.507059e+37 }
 0x233   :  { %vm797_vm7 = vcmp.eq.f32.partialorder %v796_v21, 8.507059e+37 }
 0x236   :  { %v3152_v60 = vpop.eup %3151 }
 0x237   :  { %v3154_v46 = vpop.eup %3153  ;;  %v768_v25 = vmul.f32 %v3152_v60, %v766_v10  ;;  %vm773_vm0 = vweird.f32 %v3152_v60 }
 0x238   :  { %v788_v37 = vmul.f32 %v3154_v46, %v786_v50  ;;  %vm774_vm2 = vmor %vm772_vm1, %vm773_vm0  ;;  %vm793_vm4 = vweird.f32 %v3154_v46 }
 0x239   :  { %v769_v52 = vsub.f32 1.0, %v768_v25  ;;  %vm794_vm6 = vmor %vm792_vm5, %vm793_vm4 }
 0x23a   :  { %v789_v35 = vsub.f32 1.0, %v788_v37  ;;  %v799_v37 = vor.u32 1.1754944e-38, %v798_v53 }
 0x23b   :  { %v770_v1 = vmul.f32 %v3152_v60, %v769_v52 }
 0x23c   :  { %v790_v9 = vmul.f32 %v3154_v46, %v789_v35 }
 0x23d   :  { %v771_v59 = vadd.f32 %v3152_v60, %v770_v1 }
 0x23e   :  { %v791_v49 = vadd.f32 %v3154_v46, %v790_v9 }
 0x23f   :  { %v775_v29 = vsel %vm774_vm2, %v3152_v60, %v771_v59  ;;  %v266_v59 = vadd.f32 %v3681_v54, %v3675_v47 }
 0x240   :  { %v780_v6 = vsel %vm777_vm3, %v779_v0, %v775_v29  ;;  %v795_v25 = vsel %vm794_vm6, %v3154_v46, %v791_v49 }
 0x241   :  { %v803_v16 = vmul.f32 %v802_v41, %v780_v6  ;;  %v800_v10 = vsel %vm797_vm7, %v799_v37, %v795_v25 }
 0x242   :  { %v806_v52 = vsub.f32 1.0, %v800_v10  ;;  %v808_v40 = vmul.f32 %v800_v10, %v3770_v26 }
 0x243   :  { %v804_v22 = vadd.f32 %v803_v16, %v3699_v36  ;;  %v295_v36 = vadd.f32 %v3751_v61, %v3683_v57 }
 0x245   :  { %3155 = vtanh.f32 %v804_v22 }
 0x24b   :  { %v3156_v60 = vpop.eup %3155 }
 0x24c   :  { %v807_v35 = vmul.f32 %v3156_v60, %v806_v52 }
 0x24e   :  { %v3804_v20 = vadd.f32 %v808_v40, %v807_v35 }
 0x250   :  { %v812_v1 = vpack.c.bf16 %v3804_v20, %v3804_v20 }
 0x252   :  { %821 = vmatmul.bf16.vlgmr.msrb.gmra.mxu3 %v812_v1  ;;  %834 = vmatmul.bf16.vlgmr.msrb.gmra.mxu0 %v812_v1 }
 0x253   :  { %847 = vmatmul.bf16.vlgmr.msrb.gmra.mxu1 %v812_v1  ;;  %1031 = vmatpush.bf16.msrb.mxu3 %v3454_v12 }
 0x254   :  { %1101 = vmatpush.bf16.msrb.mxu0 %v3367_v7  ;;  %1114 = vmatpush.bf16.msrb.mxu1 %v3462_v15 }
 0x257   :  { %1032 = vmatpush.bf16.msrb.mxu3 %v3479_v28 }
 0x258   :  { %1102 = vmatpush.bf16.msrb.mxu0 %v3376_v11  ;;  %1115 = vmatpush.bf16.msrb.mxu1 %v3485_v30 }
 0x25b   :  { %1033 = vmatpush.bf16.msrb.mxu3 %v3496_v42 }
 0x25c   :  { %1103 = vmatpush.bf16.msrb.mxu0 %v3385_v17  ;;  %1116 = vmatpush.bf16.msrb.mxu1 %v3499_v43 }
 0x25f   :  { %1034 = vmatpush.bf16.msrb.mxu3 %v3514_v55 }
 0x260   :  { %1104 = vmatpush.bf16.msrb.mxu0 %v3394_v23  ;;  %1117 = vmatpush.bf16.msrb.mxu1 %v3517_v56 }
 0x263   :  { %1035 = vmatpush.bf16.msrb.mxu3 %v3532_v2 }
 0x264   :  { %1105 = vmatpush.bf16.msrb.mxu0 %v3403_v34  ;;  %1118 = vmatpush.bf16.msrb.mxu1 %v3535_v3 }
 0x267   :  { %1036 = vmatpush.bf16.msrb.mxu3 %v3555_v18 }
 0x268   :  { %1106 = vmatpush.bf16.msrb.mxu0 %v3412_v45  ;;  %1119 = vmatpush.bf16.msrb.mxu1 %v3558_v19 }
 0x26b   :  { %1037 = vmatpush.bf16.msrb.mxu3 %v3574_v31 }
 0x26c   :  { %1107 = vmatpush.bf16.msrb.mxu0 %v3424_v58  ;;  %1120 = vmatpush.bf16.msrb.mxu1 %v3577_v32 }
 0x26f   :  { %1038 = vmatpush.bf16.msrb.mxu3 %v3594_v38 }
 0x270   :  { %1108 = vmatpush.bf16.msrb.mxu0 %v3442_v8  ;;  %1121 = vmatpush.bf16.msrb.mxu1 %v3597_v39 }
 0x2cf   :  { %v835_v50 = vpop.f32.mrf.mxu0 }
 0x2d0   :  { %v878_v46 = vadd.f32 %v835_v50, %v295_v36  ;;  %v848_v27 = vpop.f32.mrf.mxu1 }
 0x2d2   :  { %v2746_v9 = vmul.f32 -1.442695, %v878_v46 }
 0x2d4   :  { %3157 = vpow2.f32 %v2746_v9  ;;  %v898_v9 = vadd.f32 %v3706_v44, %v848_v27 }
 0x2d5   :  { %v822_v0 = vpop.f32.mrf.mxu3 }
 0x2d6   :  { %v858_v29 = vadd.f32 %v822_v0, %v266_v59 }
 0x2d7   :  { %v837_v41 = vpop.f32.mrf.mxu0 }
 0x2d8   :  { %v2745_v49 = vmul.f32 -1.442695, %v858_v29  ;;  %v850_v6 = vpop.f32.mrf.mxu1  ;;  %v324_v41 = vadd.f32 %v3708_v51, %v3696_v33 }
 0x2da   :  { %v3158_v53 = vpop.eup %3157  ;;  %3159 = vpow2.f32 %v2745_v49 }
 0x2db   :  { %v882_v16 = vadd.f32 1.0, %v3158_v53 }
 0x2dd   :  { %v824_v21 = vpop.f32.mrf.mxu3  ;;  %3161 = vrcp.f32 %v882_v16  ;;  %v894_v49 = vand.u32 2147483648, %v882_v16  ;;  %vm888_vm13 = vweird.f32 %v882_v16  ;;  %v892_v53 = vand.u32 2147483647, %v882_v16 }
 0x2df   :  { %vm893_vm15 = vcmp.eq.f32.partialorder %v892_v53, 8.507059e+37 }
 0x2e0   :  { %v3160_v22 = vpop.eup %3159 }
 0x2e1   :  { %v862_v61 = vadd.f32 1.0, %v3160_v22 }
 0x2e3   :  { %3163 = vrcp.f32 %v862_v61  ;;  %v3162_v25 = vpop.eup %3161  ;;  %v874_v35 = vand.u32 2147483648, %v862_v61  ;;  %v872_v1 = vand.u32 2147483647, %v862_v61  ;;  %vm868_vm9 = vweird.f32 %v862_v61 }
 0x2e4   :  { %v884_v37 = vmul.f32 %v3162_v25, %v882_v16  ;;  %vm889_vm12 = vweird.f32 %v3162_v25 }
 0x2e5   :  { %v875_v46 = vor.u32 1.1754944e-38, %v874_v35  ;;  %vm873_vm11 = vcmp.eq.f32.partialorder %v872_v1, 8.507059e+37  ;;  %vm890_vm14 = vmor %vm888_vm13, %vm889_vm12 }
 0x2e6   :  { %v885_v60 = vsub.f32 1.0, %v884_v37 }
 0x2e8   :  { %v886_v36 = vmul.f32 %v3162_v25, %v885_v60 }
 0x2e9   :  { %v3164_v10 = vpop.eup %3163 }
 0x2ea   :  { %v864_v52 = vmul.f32 %v3164_v10, %v862_v61  ;;  %vm869_vm8 = vweird.f32 %v3164_v10  ;;  %v887_v0 = vadd.f32 %v3162_v25, %v886_v36  ;;  %v895_v61 = vor.u32 1.1754944e-38, %v894_v49 }
 0x2eb   :  { %vm870_vm10 = vmor %vm868_vm9, %vm869_vm8 }
 0x2ec   :  { %v865_v54 = vsub.f32 1.0, %v864_v52  ;;  %v891_v22 = vsel %vm890_vm14, %v3162_v25, %v887_v0 }
 0x2ed   :  { %v896_v37 = vsel %vm893_vm15, %v895_v61, %v891_v22 }
 0x2ee   :  { %v866_v40 = vmul.f32 %v3164_v10, %v865_v54  ;;  %v902_v27 = vsub.f32 1.0, %v896_v37  ;;  %v904_v60 = vmul.f32 %v896_v37, %v3804_v20 }
 0x2f0   :  { %v867_v50 = vadd.f32 %v3164_v10, %v866_v40 }
 0x2f2   :  { %v871_v59 = vsel %vm870_vm10, %v3164_v10, %v867_v50 }
 0x2f3   :  { %v876_v29 = vsel %vm873_vm11, %v875_v46, %v871_v59 }
 0x2f4   :  { %v899_v6 = vmul.f32 %v898_v9, %v876_v29 }
 0x2f6   :  { %v900_v21 = vadd.f32 %v899_v6, %v324_v41 }
 0x2f8   :  { %3165 = vtanh.f32 %v900_v21 }
 0x2fe   :  { %v3166_v10 = vpop.eup %3165 }
 0x2ff   :  { %v903_v52 = vmul.f32 %v3166_v10, %v902_v27 }
 0x301   :  { %v3840_v54 = vadd.f32 %v904_v60, %v903_v52 }
 0x303   :  { %v908_v51 = vpack.c.bf16 %v3840_v54, %v3840_v54 }
 0x305   :  { %917 = vmatmul.bf16.vlgmr.msrb.gmra.mxu2 %v908_v51  ;;  %930 = vmatmul.bf16.vlgmr.msra.gmra.mxu3 %v908_v51 }
 0x306   :  { %943 = vmatmul.bf16.vlgmr.msra.gmra.mxu0 %v908_v51  ;;  %1127 = vmatpush.bf16.msrb.mxu2 %v3454_v12 }
 0x307   :  { %1197 = vmatpush.bf16.msra.mxu3 %v3367_v7  ;;  %1210 = vmatpush.bf16.msra.mxu0 %v3462_v15 }
 0x30a   :  { %1128 = vmatpush.bf16.msrb.mxu2 %v3479_v28 }
 0x30b   :  { %1198 = vmatpush.bf16.msra.mxu3 %v3376_v11  ;;  %1211 = vmatpush.bf16.msra.mxu0 %v3485_v30  ;;  %v298_v11 = vadd.f32 %v3753_v63, %v3683_v57 }
 0x30e   :  { %1129 = vmatpush.bf16.msrb.mxu2 %v3496_v42 }
 0x30f   :  { %1199 = vmatpush.bf16.msra.mxu3 %v3385_v17  ;;  %1212 = vmatpush.bf16.msra.mxu0 %v3499_v43 }
 0x312   :  { %1130 = vmatpush.bf16.msrb.mxu2 %v3514_v55 }
 0x313   :  { %1200 = vmatpush.bf16.msra.mxu3 %v3394_v23  ;;  %1213 = vmatpush.bf16.msra.mxu0 %v3517_v56 }
 0x316   :  { %1131 = vmatpush.bf16.msrb.mxu2 %v3532_v2 }
 0x317   :  { %1201 = vmatpush.bf16.msra.mxu3 %v3403_v34  ;;  %1214 = vmatpush.bf16.msra.mxu0 %v3535_v3 }
 0x31a   :  { %1132 = vmatpush.bf16.msrb.mxu2 %v3555_v18 }
 0x31b   :  { %1202 = vmatpush.bf16.msra.mxu3 %v3412_v45  ;;  %1215 = vmatpush.bf16.msra.mxu0 %v3558_v19 }
 0x31e   :  { %1133 = vmatpush.bf16.msrb.mxu2 %v3574_v31 }
 0x31f   :  { %1203 = vmatpush.bf16.msra.mxu3 %v3424_v58  ;;  %1216 = vmatpush.bf16.msra.mxu0 %v3577_v32 }
 0x322   :  { %1134 = vmatpush.bf16.msrb.mxu2 %v3594_v38 }
 0x323   :  { %1204 = vmatpush.bf16.msra.mxu3 %v3442_v8  ;;  %1217 = vmatpush.bf16.msra.mxu0 %v3597_v39 }
 0x383   :  { %v944_v7 = vpop.f32.mrf.mxu0 }
 0x384   :  { %v994_v59 = vadd.f32 %v3706_v44, %v944_v7 }
 0x388   :  { %v918_v17 = vpop.f32.mrf.mxu2  ;;  %v931_v23 = vpop.f32.mrf.mxu3 }
 0x389   :  { %v954_v34 = vadd.f32 %v918_v17, %v3686_v62  ;;  %v974_v45 = vadd.f32 %v931_v23, %v298_v11  ;;  %v2842_v11 = vld [vmem:[#allocation4 + $0x168] sm:$0xf]  ;;  %v3073_v17 = vld [vmem:[#allocation4 + $0x170] sm:$0xf0] }
 0x38a   :  { %v2843_v23 = vor.u32 %v3073_v17, %v2842_v11 }
 0x38b   :  { %v2747_v15 = vmul.f32 -1.442695, %v954_v34  ;;  %v2748_v30 = vmul.f32 -1.442695, %v974_v45  ;;  %v946_v58 = vpop.f32.mrf.mxu0  ;;  %v2830_v34 = vld [vmem:[#allocation4 + $0x150] sm:$0xf] }
 0x38d   :  { %3167 = vpow2.f32 %v2747_v15  ;;  %v2818_v15 = vld [vmem:[#allocation4 + $0x138] sm:$0xf] }
 0x38e   :  { %3169 = vpow2.f32 %v2748_v30 }
 0x390   :  { %v920_v43 = vpop.f32.mrf.mxu2  ;;  %v933_v56 = vpop.f32.mrf.mxu3 }
 0x391   :  { %v2806_v56 = vld [vmem:[#allocation4 + $0x120] sm:$0xf] }
 0x393   :  { %v3168_v3 = vpop.eup %3167 }
 0x394   :  { %v3170_v8 = vpop.eup %3169  ;;  %v958_v19 = vadd.f32 1.0, %v3168_v3  ;;  %v3064_v3 = vld [vmem:[#allocation4 + $0x128] sm:$0xf0] }
 0x395   :  { %v978_v32 = vadd.f32 1.0, %v3170_v8 }
 0x396   :  { %3171 = vrcp.f32 %v958_v19  ;;  %v970_v62 = vand.u32 2147483648, %v958_v19  ;;  %v968_v36 = vand.u32 2147483647, %v958_v19  ;;  %vm964_vm1 = vweird.f32 %v958_v19 }
 0x397   :  { %3173 = vrcp.f32 %v978_v32  ;;  %v990_v6 = vand.u32 2147483648, %v978_v32  ;;  %vm984_vm5 = vweird.f32 %v978_v32  ;;  %v988_v53 = vand.u32 2147483647, %v978_v32 }
 0x398   :  { %v971_v9 = vor.u32 1.1754944e-38, %v970_v62  ;;  %vm969_vm3 = vcmp.eq.f32.partialorder %v968_v36, 8.507059e+37  ;;  %v2782_v62 = vld [vmem:[#allocation4 + $0xf0] sm:$0xf] }
 0x399   :  { %v991_v61 = vor.u32 1.1754944e-38, %v990_v6  ;;  %vm989_vm7 = vcmp.eq.f32.partialorder %v988_v53, 8.507059e+37 }
 0x39c   :  { %v3172_v39 = vpop.eup %3171 }
 0x39d   :  { %v3174_v63 = vpop.eup %3173  ;;  %v960_v16 = vmul.f32 %v3172_v39, %v958_v19  ;;  %vm965_vm0 = vweird.f32 %v3172_v39  ;;  %v2807_v19 = vor.u32 %v3064_v3, %v2806_v56  ;;  %v2948_v56 = vld [vmem:[%s4541_s3 + $0x138] sm:$0xf]  ;;  %v3091_v3 = vld [vmem:[%s4541_s3 + $0x140] sm:$0xf0] }
 0x39e   :  { %v980_v25 = vmul.f32 %v3174_v63, %v978_v32  ;;  %vm966_vm2 = vmor %vm964_vm1, %vm965_vm0  ;;  %vm985_vm4 = vweird.f32 %v3174_v63 }
 0x39f   :  { %v961_v35 = vsub.f32 1.0, %v960_v16  ;;  %vm986_vm6 = vmor %vm984_vm5, %vm985_vm4  ;;  %v3061_v16 = vld [vmem:[#allocation4 + $0x110] sm:$0xf0] }
 0x3a0   :  { %v981_v40 = vsub.f32 1.0, %v980_v25 }
 0x3a1   :  { %v962_v1 = vmul.f32 %v3172_v39, %v961_v35 }
 0x3a2   :  { %v982_v50 = vmul.f32 %v3174_v63, %v981_v40  ;;  %v3058_v40 = vld [vmem:[#allocation4 + $0xf8] sm:$0xf0] }
 0x3a3   :  { %v963_v46 = vadd.f32 %v3172_v39, %v962_v1  ;;  %v2783_v36 = vor.u32 %v3058_v40, %v2782_v62 }
 0x3a4   :  { %v983_v41 = vadd.f32 %v3174_v63, %v982_v50  ;;  %v2770_v50 = vld [vmem:[#allocation4 + $0xd8] sm:$0xf] }
 0x3a5   :  { %v967_v0 = vsel %vm966_vm2, %v3172_v39, %v963_v46  ;;  %v3055_v46 = vld [vmem:[#allocation4 + $0xe0] sm:$0xf0] }
 0x3a6   :  { %v972_v29 = vsel %vm969_vm3, %v971_v9, %v967_v0  ;;  %v987_v22 = vsel %vm986_vm6, %v3174_v63, %v983_v41  ;;  %v2794_v63 = vld [vmem:[#allocation4 + $0x108] sm:$0xf]  ;;  %v2771_v0 = vor.u32 %v3055_v46, %v2770_v50  ;;  %v2758_v41 = vld [vmem:[#allocation4 + $0xc0] sm:$0xf] }
 0x3a7   :  { %v995_v49 = vmul.f32 %v994_v59, %v972_v29  ;;  %v992_v37 = vsel %vm989_vm7, %v991_v61, %v987_v22  ;;  %v2795_v25 = vor.u32 %v3061_v16, %v2794_v63  ;;  %v3072_v63 = vld [vmem:[#allocation4 + $0x16c] sm:$0xf]  ;;  %v2844_v16 = vld [vmem:[#allocation4 + $0x174] sm:$0xf0] }
 0x3a8   :  { %v998_v27 = vsub.f32 1.0, %v992_v37  ;;  %v1000_v60 = vmul.f32 %v992_v37, %v3840_v54  ;;  %v2847_v40 = vor.u32 %v3072_v63, %v2844_v16  ;;  %v2802_v16 = vld [vmem:[#allocation4 + $0x110] sm:$0xf] }
 0x3a9   :  { %v996_v21 = vadd.f32 %v995_v49, %v3713_v14  ;;  %v271_v14 = vadd.f32 %v3689_v13, %v3675_v47  ;;  %v3067_v13 = vld [vmem:[#allocation4 + $0x140] sm:$0xf0]  ;;  %v3052_v49 = vld [vmem:[#allocation4 + $0xc8] sm:$0xf0] }
 0x3aa   :  { %v2819_v58 = vor.u32 %v3067_v13, %v2818_v15  ;;  %v2759_v61 = vor.u32 %v3052_v49, %v2758_v41  ;;  %v3900_v13 = vpack.c.bf16 %v3770_v26, %v3718_v24  ;;  %v3097_v24 = vld [vmem:[%s4541_s3 + $0x170] sm:$0xf0] }
 0x3ab   :  { %3175 = vtanh.f32 %v996_v21  ;;  %v3069_v49 = vld [vmem:[#allocation4 + $0x154] sm:$0xf] }
 0x3b1   :  { %v3176_v10 = vpop.eup %3175 }
 0x3b2   :  { %v999_v52 = vmul.f32 %v3176_v10, %v998_v27 }
 0x3b4   :  { %v3874_v51 = vadd.f32 %v1000_v60, %v999_v52 }
 0x3b6   :  { %v1004_v7 = vpack.c.bf16 %v3874_v51, %v3874_v51 }
 0x3b8   :  { %1013 = vmatmul.bf16.vlgmr.msra.gmra.mxu1 %v1004_v7  ;;  %1026 = vmatmul.bf16.vlgmr.msra.gmra.mxu2 %v1004_v7 }
 0x3b9   :  { %1039 = vmatmul.bf16.vlgmr.msrb.gmra.mxu3 %v1004_v7  ;;  %1223 = vmatpush.bf16.msra.mxu1 %v3454_v12 }
 0x3ba   :  { %1475 = vmatpush.bf16.msra.mxu2 %v2843_v23  ;;  %1504 = vmatpush.bf16.msrb.mxu3 %v2847_v40  ;;  %v2784_v40 = vld [vmem:[#allocation4 + $0xfc] sm:$0xf0] }
 0x3bd   :  { %1224 = vmatpush.bf16.msra.mxu1 %v3479_v28 }
 0x3c1   :  { %1225 = vmatpush.bf16.msra.mxu1 %v3496_v42 }
 0x3c5   :  { %1226 = vmatpush.bf16.msra.mxu1 %v3514_v55  ;;  %v3070_v55 = vld [vmem:[#allocation4 + $0x158] sm:$0xf0] }
 0x3c6   :  { %v2831_v45 = vor.u32 %v3070_v55, %v2830_v34 }
 0x3c8   :  { %1476 = vmatpush.bf16.msra.mxu2 %v2831_v45 }
 0x3c9   :  { %1227 = vmatpush.bf16.msra.mxu1 %v3532_v2  ;;  %v300_v2 = vadd.f32 %v3755_v4, %v3683_v57 }
 0x3cc   :  { %1477 = vmatpush.bf16.msra.mxu2 %v2819_v58 }
 0x3cd   :  { %1228 = vmatpush.bf16.msra.mxu1 %v3555_v18 }
 0x3d0   :  { %1478 = vmatpush.bf16.msra.mxu2 %v2807_v19  ;;  %v2936_v19 = vld [vmem:[%s4541_s3 + $0x120] sm:$0xf] }
 0x3d1   :  { %1229 = vmatpush.bf16.msra.mxu1 %v3574_v31 }
 0x3d4   :  { %1479 = vmatpush.bf16.msra.mxu2 %v2795_v25  ;;  %v2850_v25 = vld [vmem:[#allocation4 + $0x170] sm:$0xf] }
 0x3d5   :  { %1230 = vmatpush.bf16.msra.mxu1 %v3594_v38 }
 0x3d8   :  { %1480 = vmatpush.bf16.msra.mxu2 %v2783_v36  ;;  %v4551_v36 = vld [vmem:[#allocation7_spill] sm:$0xff] }
 0x3dc   :  { %1481 = vmatpush.bf16.msra.mxu2 %v2771_v0 }
 0x3e0   :  { %1482 = vmatpush.bf16.msra.mxu2 %v2759_v61 }
 0x435   :  { %v1014_v12 = vpop.f32.mrf.mxu1 }
 0x436   :  { %v1050_v28 = vadd.f32 %v1014_v12, %v271_v14  ;;  %v329_v14 = vadd.f32 %v3715_v48, %v3696_v33 }
 0x438   :  { %v2749_v42 = vmul.f32 -1.442695, %v1050_v28 }
 0x43a   :  { %3177 = vpow2.f32 %v2749_v42 }
 0x43b   :  { %v1027_v18 = vpop.f32.mrf.mxu2 }
 0x43c   :  { %v1070_v31 = vadd.f32 %v1027_v18, %v300_v2  ;;  %v1040_v38 = vpop.f32.mrf.mxu3 }
 0x43d   :  { %v1016_v30 = vpop.f32.mrf.mxu1  ;;  %v1090_v7 = vadd.f32 %v3706_v44, %v1040_v38 }
 0x43e   :  { %v2750_v43 = vmul.f32 -1.442695, %v1070_v31  ;;  %v3905_v30 = vpack.c.bf16 %v3840_v54, %v3804_v20  ;;  %v2960_v20 = vld [vmem:[%s4541_s3 + $0x150] sm:$0xf]  ;;  %v3094_v54 = vld [vmem:[%s4541_s3 + $0x158] sm:$0xf0] }
 0x440   :  { %v3178_v8 = vpop.eup %3177  ;;  %3179 = vpow2.f32 %v2750_v43  ;;  %v2972_v43 = vld [vmem:[%s4541_s3 + $0x168] sm:$0xf] }
 0x441   :  { %v1054_v32 = vadd.f32 1.0, %v3178_v8  ;;  %v3919_v26 = vor.u32 %v3097_v24, %v2972_v43  ;;  %v3937_v8 = vor.u32 %v3091_v3, %v2948_v56  ;;  %v3076_v3 = vld [vmem:[%s4541_s3 + $0xc8] sm:$0xf0] }
 0x443   :  { %3181 = vrcp.f32 %v1054_v32  ;;  %v1029_v39 = vpop.f32.mrf.mxu2  ;;  %v1066_v6 = vand.u32 2147483648, %v1054_v32  ;;  %v1064_v21 = vand.u32 2147483647, %v1054_v32  ;;  %vm1060_vm9 = vweird.f32 %v1054_v32 }
 0x444   :  { %v1042_v4 = vpop.f32.mrf.mxu3  ;;  %v303_v39 = vadd.f32 %v3757_v5, %v3683_v57  ;;  %v2924_v5 = vld [vmem:[%s4541_s3 + $0x108] sm:$0xf] }
 0x445   :  { %v1067_v10 = vor.u32 1.1754944e-38, %v1066_v6  ;;  %vm1065_vm11 = vcmp.eq.f32.partialorder %v1064_v21, 8.507059e+37  ;;  %v2832_v6 = vld [vmem:[#allocation4 + $0x15c] sm:$0xf0]  ;;  %v3071_v21 = vld [vmem:[#allocation4 + $0x160] sm:$0xf0] }
 0x446   :  { %v3180_v35 = vpop.eup %3179 }
 0x447   :  { %v1074_v1 = vadd.f32 1.0, %v3180_v35 }
 0x449   :  { %v3182_v9 = vpop.eup %3181  ;;  %3183 = vrcp.f32 %v1074_v1  ;;  %v1086_v12 = vand.u32 2147483648, %v1074_v1  ;;  %v1084_v28 = vand.u32 2147483647, %v1074_v1  ;;  %vm1080_vm13 = vweird.f32 %v1074_v1 }
 0x44a   :  { %v1056_v59 = vmul.f32 %v3182_v9, %v1054_v32  ;;  %vm1061_vm8 = vweird.f32 %v3182_v9  ;;  %v3088_v32 = vld [vmem:[%s4541_s3 + $0x128] sm:$0xf0] }
 0x44b   :  { %vm1062_vm10 = vmor %vm1060_vm9, %vm1061_vm8  ;;  %v1087_v55 = vor.u32 1.1754944e-38, %v1086_v12  ;;  %vm1085_vm15 = vcmp.eq.f32.partialorder %v1084_v28, 8.507059e+37  ;;  %v3948_v4 = vor.u32 %v3088_v32, %v2936_v19  ;;  %v3060_v32 = vld [vmem:[#allocation4 + $0x10c] sm:$0xf] }
 0x44c   :  { %v1057_v29 = vsub.f32 1.0, %v1056_v59  ;;  %v3085_v59 = vld [vmem:[%s4541_s3 + $0x110] sm:$0xf0] }
 0x44d   :  { %v3958_v41 = vor.u32 %v3085_v59, %v2924_v5 }
 0x44e   :  { %v1058_v53 = vmul.f32 %v3182_v9, %v1057_v29 }
 0x44f   :  { %v3184_v22 = vpop.eup %3183 }
 0x450   :  { %v1076_v37 = vmul.f32 %v3184_v22, %v1074_v1  ;;  %v1059_v27 = vadd.f32 %v3182_v9, %v1058_v53  ;;  %vm1081_vm12 = vweird.f32 %v3184_v22  ;;  %v3074_v1 = vld [vmem:[#allocation4 + $0x178] sm:$0xf0]  ;;  %v2838_v53 = vld [vmem:[#allocation4 + $0x158] sm:$0xf] }
 0x451   :  { %vm1082_vm14 = vmor %vm1080_vm13, %vm1081_vm12  ;;  %v2839_v61 = vor.u32 %v3071_v21, %v2838_v53 }
 0x452   :  { %v1077_v52 = vsub.f32 1.0, %v1076_v37  ;;  %v1063_v60 = vsel %vm1062_vm10, %v3182_v9, %v1059_v27  ;;  %v2851_v9 = vor.u32 %v3074_v1, %v2850_v25  ;;  %v2912_v37 = vld [vmem:[%s4541_s3 + $0xf0] sm:$0xf]  ;;  %v3082_v27 = vld [vmem:[%s4541_s3 + $0xf8] sm:$0xf0] }
 0x453   :  { %v1068_v11 = vsel %vm1065_vm11, %v1067_v10, %v1063_v60  ;;  %v3066_v60 = vld [vmem:[#allocation4 + $0x13c] sm:$0xf]  ;;  %v2790_v1 = vld [vmem:[#allocation4 + $0xf8] sm:$0xf] }
 0x454   :  { %v1078_v17 = vmul.f32 %v3184_v22, %v1077_v52  ;;  %v1091_v23 = vmul.f32 %v1090_v7, %v1068_v11  ;;  %v3969_v52 = vor.u32 %v3082_v27, %v2912_v37  ;;  %v2820_v7 = vld [vmem:[#allocation4 + $0x144] sm:$0xf0]  ;;  %v3062_v25 = vld [vmem:[#allocation4 + $0x118] sm:$0xf0]  ;;  %v3056_v37 = vld [vmem:[#allocation4 + $0xe8] sm:$0xf0] }
 0x455   :  { %v2823_v12 = vor.u32 %v3066_v60, %v2820_v7 }
 0x456   :  { %v1079_v42 = vadd.f32 %v3184_v22, %v1078_v17  ;;  %v1092_v34 = vadd.f32 %v1091_v23, %v329_v14  ;;  %v2826_v14 = vld [vmem:[#allocation4 + $0x140] sm:$0xf]  ;;  %v3068_v23 = vld [vmem:[#allocation4 + $0x148] sm:$0xf0] }
 0x457   :  { %v2827_v28 = vor.u32 %v3068_v23, %v2826_v14 }
 0x458   :  { %v1083_v45 = vsel %vm1082_vm14, %v3184_v22, %v1079_v42  ;;  %3185 = vtanh.f32 %v1092_v34  ;;  %v2835_v22 = vor.u32 %v3069_v49, %v2832_v6  ;;  %v2900_v42 = vld [vmem:[%s4541_s3 + $0xd8] sm:$0xf]  ;;  %v3079_v34 = vld [vmem:[%s4541_s3 + $0xe0] sm:$0xf0]  ;;  %v3054_v49 = vld [vmem:[#allocation4 + $0xdc] sm:$0xf] }
 0x459   :  { %v1088_v2 = vsel %vm1085_vm15, %v1087_v55, %v1083_v45  ;;  %v3063_v55 = vld [vmem:[#allocation4 + $0x124] sm:$0xf]  ;;  %v2772_v6 = vld [vmem:[#allocation4 + $0xe4] sm:$0xf0] }
 0x45a   :  { %v1094_v44 = vsub.f32 1.0, %v1088_v2  ;;  %v1096_v48 = vmul.f32 %v1088_v2, %v3874_v51  ;;  %1505 = vmatpush.bf16.msrb.mxu3 %v2835_v22  ;;  %v3978_v2 = vor.u32 %v3079_v34, %v2900_v42  ;;  %v2775_v22 = vor.u32 %v3054_v49, %v2772_v6  ;;  %v3053_v42 = vld [vmem:[#allocation4 + $0xd0] sm:$0xf0]  ;;  %v4053_v49 = vld [vmem:[%s4539_s1 + $0x8] sm:$0xff] }
 0x45b   :  { %v3084_v6 = vld [vmem:[%s4541_s3 + $0x10c] sm:$0xf] }
 0x45e   :  { %v3186_v18 = vpop.eup %3185  ;;  %1506 = vmatpush.bf16.msrb.mxu3 %v2823_v12  ;;  %v2766_v12 = vld [vmem:[#allocation4 + $0xc8] sm:$0xf] }
 0x45f   :  { %v1095_v31 = vmul.f32 %v3186_v18, %v1094_v44  ;;  %v2808_v44 = vld [vmem:[#allocation4 + $0x12c] sm:$0xf0]  ;;  %v2814_v18 = vld [vmem:[#allocation4 + $0x128] sm:$0xf] }
 0x460   :  { %v2811_v43 = vor.u32 %v3063_v55, %v2808_v44  ;;  %v2767_v55 = vor.u32 %v3053_v42, %v2766_v12  ;;  %v3997_v44 = vld [vmem:[%s4543_s5] ss:$0 sm:$0xff] }
 0x461   :  { %v3894_v38 = vadd.f32 %v1096_v48, %v1095_v31  ;;  %v3065_v31 = vld [vmem:[#allocation4 + $0x130] sm:$0xf0] }
 0x462   :  { %v2815_v24 = vor.u32 %v3065_v31, %v2814_v18  ;;  %1507 = vmatpush.bf16.msrb.mxu3 %v2811_v43 }
 0x463   :  { %v1100_v15 = vpack.c.bf16 %v3894_v38, %v3894_v38  ;;  %v3910_v58 = vpack.c.bf16 %v3894_v38, %v3874_v51  ;;  %v3928_v51 = vor.u32 %v3094_v54, %v2960_v20  ;;  %v2888_v54 = vld [vmem:[%s4541_s3 + $0xc0] sm:$0xf] }
 0x464   :  { %v3990_v19 = vor.u32 %v3076_v3, %v2888_v54  ;;  %v4552_v54 = vld [vmem:[#allocation9_spill] sm:$0xff] }
 0x465   :  { %1109 = vmatmul.bf16.vlgmr.msrb.gmra.mxu0 %v1100_v15  ;;  %1122 = vmatmul.bf16.vlgmr.msrb.gmra.mxu1 %v1100_v15 }
 0x466   :  { %1135 = vmatmul.bf16.vlgmr.msrb.gmra.mxu2 %v1100_v15  ;;  %1752 = vmatpush.bf16.msrb.mxu1 %v3919_v26 }
 0x467   :  { %1533 = vmatpush.bf16.msrb.mxu0 %v2851_v9 }
 0x46a   :  { %1753 = vmatpush.bf16.msrb.mxu1 %v3928_v51 }
 0x46b   :  { %1534 = vmatpush.bf16.msrb.mxu0 %v2839_v61  ;;  %v2778_v61 = vld [vmem:[#allocation4 + $0xe0] sm:$0xf] }
 0x46c   :  { %v2779_v7 = vor.u32 %v3056_v37, %v2778_v61  ;;  %v3081_v61 = vld [vmem:[%s4541_s3 + $0xf4] sm:$0xf]  ;;  %v2914_v37 = vld [vmem:[%s4541_s3 + $0xfc] sm:$0xf0] }
 0x46e   :  { %1754 = vmatpush.bf16.msrb.mxu1 %v3937_v8 }
 0x46f   :  { %1535 = vmatpush.bf16.msrb.mxu0 %v2827_v28 }
 0x472   :  { %1755 = vmatpush.bf16.msrb.mxu1 %v3948_v4 }
 0x473   :  { %1536 = vmatpush.bf16.msrb.mxu0 %v2815_v24 }
 0x476   :  { %1483 = vmatmul.bf16.vlgmr.msra.gmra.mxu2 %v3900_v13  ;;  %1756 = vmatpush.bf16.msrb.mxu1 %v3958_v41 }
 0x47a   :  { %1757 = vmatpush.bf16.msrb.mxu1 %v3969_v52 }
 0x47e   :  { %1758 = vmatpush.bf16.msrb.mxu1 %v3978_v2 }
 0x482   :  { %1759 = vmatpush.bf16.msrb.mxu1 %v3990_v19 }
 0x486   :  { %1488 = vmatmul.bf16.gmra.mxu2 %v3905_v30 }
 0x496   :  { %1493 = vmatmul.bf16.gmra.mxu2 %v3910_v58 }
 0x4e2   :  { %v1110_v35 = vpop.f32.mrf.mxu0  ;;  %v1123_v62 = vpop.f32.mrf.mxu1 }
 0x4e3   :  { %v1146_v50 = vadd.f32 %v1110_v35, %v4551_v36  ;;  %v1166_v46 = vadd.f32 %v1123_v62, %v303_v39  ;;  %v2796_v39 = vld [vmem:[#allocation4 + $0x114] sm:$0xf0]  ;;  %v2803_v35 = vor.u32 %v3062_v25, %v2802_v16  ;;  %v3057_v62 = vld [vmem:[#allocation4 + $0xf4] sm:$0xf]  ;;  %v3059_v36 = vld [vmem:[#allocation4 + $0x100] sm:$0xf0] }
 0x4e4   :  { %v2799_v63 = vor.u32 %v3060_v32, %v2796_v39  ;;  %v2791_v9 = vor.u32 %v3059_v36, %v2790_v1  ;;  %v3093_v36 = vld [vmem:[%s4541_s3 + $0x154] sm:$0xf] }
 0x4e5   :  { %v2751_v0 = vmul.f32 -1.442695, %v1146_v50  ;;  %v2752_v29 = vmul.f32 -1.442695, %v1166_v46  ;;  %1537 = vmatpush.bf16.msrb.mxu0 %v2803_v35  ;;  %v2787_v46 = vor.u32 %v3057_v62, %v2784_v40  ;;  %v3096_v35 = vld [vmem:[%s4541_s3 + $0x16c] sm:$0xf] }
 0x4e6   :  { %1508 = vmatpush.bf16.msrb.mxu3 %v2799_v63 }
 0x4e7   :  { %3187 = vpow2.f32 %v2751_v0 }
 0x4e8   :  { %3189 = vpow2.f32 %v2752_v29 }
 0x4e9   :  { %v3967_v10 = vpop.f32.mrf.mxu2  ;;  %1538 = vmatpush.bf16.msrb.mxu0 %v2791_v9  ;;  %v2950_v9 = vld [vmem:[%s4541_s3 + $0x144] sm:$0xf0] }
 0x4ea   :  { %v1112_v11 = vpop.f32.mrf.mxu0  ;;  %v1125_v17 = vpop.f32.mrf.mxu1  ;;  %1509 = vmatpush.bf16.msrb.mxu3 %v2787_v46  ;;  %v1186_v18 = vadd.f32 %v3997_v44, %v3967_v10  ;;  %v3090_v46 = vld [vmem:[%s4541_s3 + $0x13c] sm:$0xf] }
 0x4eb   :  { %v3051_v11 = vld [vmem:[#allocation4 + $0xc4] sm:$0xf]  ;;  %v2760_v17 = vld [vmem:[#allocation4 + $0xcc] sm:$0xf0] }
 0x4ec   :  { %v2763_v28 = vor.u32 %v3051_v11, %v2760_v17  ;;  %v2890_v11 = vld [vmem:[%s4541_s3 + $0xcc] sm:$0xf0] }
 0x4ed   :  { %v3188_v45 = vpop.eup %3187  ;;  %1539 = vmatpush.bf16.msrb.mxu0 %v2779_v7  ;;  %v2902_v7 = vld [vmem:[%s4541_s3 + $0xe4] sm:$0xf0] }
 0x4ee   :  { %v3190_v48 = vpop.eup %3189  ;;  %v1150_v15 = vadd.f32 1.0, %v3188_v45  ;;  %1510 = vmatpush.bf16.msrb.mxu3 %v2775_v22 }
 0x4ef   :  { %v3980_v20 = vadd.f32 1.0, %v3190_v48 }
 0x4f0   :  { %3191 = vrcp.f32 %v1150_v15  ;;  %v1162_v21 = vand.u32 2147483648, %v1150_v15  ;;  %v1160_v60 = vand.u32 2147483647, %v1150_v15  ;;  %vm1156_vm1 = vweird.f32 %v1150_v15 }
 0x4f1   :  { %3193 = vrcp.f32 %v3980_v20  ;;  %v1138_v56 = vpop.f32.mrf.mxu2  ;;  %vm1176_vm5 = vweird.f32 %v3980_v20  ;;  %v1180_v24 = vand.u32 2147483647, %v3980_v20  ;;  %1540 = vmatpush.bf16.msrb.mxu0 %v2767_v55  ;;  %v2980_v55 = vld [vmem:[%s4541_s3 + $0x170] sm:$0xf] }
 0x4f2   :  { %v1163_v34 = vor.u32 1.1754944e-38, %v1162_v21  ;;  %vm1161_vm3 = vcmp.eq.f32.partialorder %v1160_v60, 8.507059e+37  ;;  %1511 = vmatpush.bf16.msrb.mxu3 %v2763_v28  ;;  %v4064_v21 = vpack.c.bf16 %v4053_v49, %v4053_v49  ;;  %v3078_v60 = vld [vmem:[%s4541_s3 + $0xdc] sm:$0xf] }
 0x4f3   :  { %vm1181_vm7 = vcmp.eq.f32.partialorder %v1180_v24, 8.507059e+37 }
 0x4f6   :  { %v3192_v50 = vpop.eup %3191 }
 0x4f7   :  { %v3194_v5 = vpop.eup %3193  ;;  %v1152_v59 = vmul.f32 %v3192_v50, %v1150_v15  ;;  %vm1157_vm0 = vweird.f32 %v3192_v50  ;;  %v1182_v15 = vand.u32 2147483648, %v3980_v20 }
 0x4f8   :  { %v1172_v0 = vmul.f32 %v3194_v5, %v3980_v20  ;;  %vm1158_vm2 = vmor %vm1156_vm1, %vm1157_vm0  ;;  %vm1177_vm4 = vweird.f32 %v3194_v5  ;;  %v2974_v20 = vld [vmem:[%s4541_s3 + $0x174] sm:$0xf0] }
 0x4f9   :  { %v1153_v29 = vsub.f32 1.0, %v1152_v59  ;;  %vm1178_vm6 = vmor %vm1176_vm5, %vm1177_vm4  ;;  %v1183_v32 = vor.u32 1.1754944e-38, %v1182_v15  ;;  %v4016_v1 = vor.u32 %v3096_v35, %v2974_v20  ;;  %v3087_v59 = vld [vmem:[%s4541_s3 + $0x124] sm:$0xf] }
 0x4fa   :  { %v1173_v53 = vsub.f32 1.0, %v1172_v0  ;;  %v2938_v0 = vld [vmem:[%s4541_s3 + $0x12c] sm:$0xf0] }
 0x4fb   :  { %v1154_v27 = vmul.f32 %v3192_v50, %v1153_v29  ;;  %v4048_v29 = vor.u32 %v3087_v59, %v2938_v0  ;;  %v3086_v59 = vld [vmem:[%s4541_s3 + $0x118] sm:$0xf0] }
 0x4fc   :  { %v1174_v14 = vmul.f32 %v3194_v5, %v1173_v53  ;;  %v2926_v53 = vld [vmem:[%s4541_s3 + $0x114] sm:$0xf0] }
 0x4fd   :  { %v1155_v23 = vadd.f32 %v3192_v50, %v1154_v27  ;;  %v4068_v22 = vor.u32 %v3084_v6, %v2926_v53  ;;  %v4082_v27 = vor.u32 %v3081_v61, %v2914_v37  ;;  %v2920_v37 = vld [vmem:[%s4541_s3 + $0xf8] sm:$0xf] }
 0x4fe   :  { %v1175_v31 = vadd.f32 %v3194_v5, %v1174_v14  ;;  %v3075_v14 = vld [vmem:[%s4541_s3 + $0xc4] sm:$0xf] }
 0x4ff   :  { %v1159_v45 = vsel %vm1158_vm2, %v3192_v50, %v1155_v23  ;;  %v4104_v17 = vor.u32 %v3075_v14, %v2890_v11 }
 0x500   :  { %v1164_v48 = vsel %vm1161_vm3, %v1163_v34, %v1159_v45  ;;  %v1179_v3 = vsel %vm1178_vm6, %v3194_v5, %v1175_v31  ;;  %v4037_v5 = vor.u32 %v3090_v46, %v2950_v9  ;;  %v4554_v31 = vld [vmem:[#allocation8_spill] sm:$0xff]  ;;  %v2932_v9 = vld [vmem:[%s4541_s3 + $0x110] sm:$0xf] }
 0x501   :  { %v1187_v43 = vmul.f32 %v1186_v18, %v1164_v48  ;;  %v1184_v10 = vsel %vm1181_vm7, %v1183_v32, %v1179_v3  ;;  %v2968_v18 = vld [vmem:[%s4541_s3 + $0x158] sm:$0xf]  ;;  %v276_v48 = vadd.f32 %v4554_v31, %v3675_v47  ;;  %v4186_v0 = vor.u32 %v3086_v59, %v2932_v9 }
 0x502   :  { %v1190_v39 = vsub.f32 1.0, %v1184_v10  ;;  %v1192_v25 = vmul.f32 %v1184_v10, %v3894_v38  ;;  %v2962_v38 = vld [vmem:[%s4541_s3 + $0x15c] sm:$0xf0] }
 0x503   :  { %v1188_v56 = vadd.f32 %v1187_v43, %v4552_v54  ;;  %v4026_v50 = vor.u32 %v3093_v36, %v2962_v38  ;;  %v2956_v54 = vld [vmem:[%s4541_s3 + $0x140] sm:$0xf] }
 0x505   :  { %3195 = vtanh.f32 %v1188_v56  ;;  %v3092_v56 = vld [vmem:[%s4541_s3 + $0x148] sm:$0xf0] }
 0x506   :  { %v4155_v10 = vor.u32 %v3092_v56, %v2956_v54 }
 0x50b   :  { %v3196_v63 = vpop.eup %3195 }
 0x50c   :  { %v1191_v16 = vmul.f32 %v3196_v63, %v1190_v39  ;;  %v2944_v63 = vld [vmem:[%s4541_s3 + $0x128] sm:$0xf] }
 0x50e   :  { %v4012_v62 = vadd.f32 %v1192_v25, %v1191_v16  ;;  %v3089_v16 = vld [vmem:[%s4541_s3 + $0x130] sm:$0xf0] }
 0x50f   :  { %v4168_v20 = vor.u32 %v3089_v16, %v2944_v63 }
 0x510   :  { %v1196_v40 = vpack.c.bf16 %v4012_v62, %v4012_v62 }
 0x512   :  { %1205 = vmatmul.bf16.vlgmr.msra.gmra.mxu3 %v1196_v40  ;;  %1218 = vmatmul.bf16.vlgmr.msra.gmra.mxu0 %v1196_v40 }
 0x513   :  { %1231 = vmatmul.bf16.vlgmr.msra.gmra.mxu1 %v1196_v40  ;;  %1847 = vmatpush.bf16.msra.mxu3 %v3919_v26 }
 0x514   :  { %1765 = vmatpush.bf16.msra.mxu1 %v4016_v1  ;;  %1860 = vmatpush.bf16.msra.mxu0 %v4016_v1 }
 0x517   :  { %1848 = vmatpush.bf16.msra.mxu3 %v3928_v51 }
 0x518   :  { %1766 = vmatpush.bf16.msra.mxu1 %v4026_v50  ;;  %1861 = vmatpush.bf16.msra.mxu0 %v4026_v50 }
 0x51b   :  { %1849 = vmatpush.bf16.msra.mxu3 %v3937_v8 }
 0x51c   :  { %1767 = vmatpush.bf16.msra.mxu1 %v4037_v5  ;;  %1862 = vmatpush.bf16.msra.mxu0 %v4037_v5 }
 0x51f   :  { %1850 = vmatpush.bf16.msra.mxu3 %v3948_v4 }
 0x520   :  { %1768 = vmatpush.bf16.msra.mxu1 %v4048_v29  ;;  %1863 = vmatpush.bf16.msra.mxu0 %v4048_v29 }
 0x522   :  { %1512 = vmatmul.bf16.vlgmr.msrb.gmra.mxu3 %v3900_v13  ;;  %1541 = vmatmul.bf16.vlgmr.msrb.gmra.mxu0 %v3900_v13  ;;  %v4093_v13 = vor.u32 %v3078_v60, %v2902_v7  ;;  %v3083_v60 = vld [vmem:[%s4541_s3 + $0x100] sm:$0xf0] }
 0x523   :  { %1760 = vmatmul.bf16.vlgmr.msrb.gmra.mxu1 %v4064_v21  ;;  %1851 = vmatpush.bf16.msra.mxu3 %v3958_v41  ;;  %v4199_v14 = vor.u32 %v3083_v60, %v2920_v37 }
 0x524   :  { %1769 = vmatpush.bf16.msra.mxu1 %v4068_v22  ;;  %1864 = vmatpush.bf16.msra.mxu0 %v4068_v22 }
 0x527   :  { %1852 = vmatpush.bf16.msra.mxu3 %v3969_v52 }
 0x528   :  { %1770 = vmatpush.bf16.msra.mxu1 %v4082_v27  ;;  %1865 = vmatpush.bf16.msra.mxu0 %v4082_v27 }
 0x52b   :  { %1853 = vmatpush.bf16.msra.mxu3 %v3978_v2 }
 0x52c   :  { %1771 = vmatpush.bf16.msra.mxu1 %v4093_v13  ;;  %1866 = vmatpush.bf16.msra.mxu0 %v4093_v13 }
 0x52f   :  { %1854 = vmatpush.bf16.msra.mxu3 %v3990_v19 }
 0x530   :  { %1772 = vmatpush.bf16.msra.mxu1 %v4104_v17  ;;  %1867 = vmatpush.bf16.msra.mxu0 %v4104_v17 }
 0x532   :  { %1517 = vmatmul.bf16.gmra.mxu3 %v3905_v30  ;;  %1546 = vmatmul.bf16.gmra.mxu0 %v3905_v30  ;;  %v4553_v30 = vld [vmem:[#allocation10_spill] sm:$0xff] }
 0x533   :  { %1952 = vmatpush.bf16.msrb.mxu3 %v4016_v1  ;;  %1773 = vmatmul.bf16.vlgmr.msra.gmra.mxu1 %v4064_v21  ;;  %v305_v12 = vadd.f32 %v4553_v30, %v3683_v57  ;;  %v3095_v57 = vld [vmem:[%s4541_s3 + $0x160] sm:$0xf0]  ;;  %v2908_v30 = vld [vmem:[%s4541_s3 + $0xe0] sm:$0xf] }
 0x534   :  { %v4144_v43 = vor.u32 %v3095_v57, %v2968_v18  ;;  %v2896_v18 = vld [vmem:[%s4541_s3 + $0xc8] sm:$0xf]  ;;  %v3077_v57 = vld [vmem:[%s4541_s3 + $0xd0] sm:$0xf0] }
 0x537   :  { %1953 = vmatpush.bf16.msrb.mxu3 %v4026_v50 }
 0x53b   :  { %1954 = vmatpush.bf16.msrb.mxu3 %v4037_v5 }
 0x53f   :  { %1955 = vmatpush.bf16.msrb.mxu3 %v4048_v29 }
 0x542   :  { %1522 = vmatmul.bf16.gmra.mxu3 %v3910_v58  ;;  %1551 = vmatmul.bf16.gmra.mxu0 %v3910_v58  ;;  %v3098_v58 = vld [vmem:[%s4541_s3 + $0x178] sm:$0xf0] }
 0x543   :  { %1956 = vmatpush.bf16.msrb.mxu3 %v4068_v22  ;;  %v4133_v45 = vor.u32 %v3098_v58, %v2980_v55 }
 0x545   :  { %1778 = vmatpush.bf16.msrb.mxu2 %v4133_v45  ;;  %1873 = vmatpush.bf16.msrb.mxu1 %v4133_v45 }
 0x546   :  { %1965 = vmatpush.bf16.msrb.mxu0 %v4133_v45 }
 0x547   :  { %1957 = vmatpush.bf16.msrb.mxu3 %v4082_v27 }
 0x549   :  { %1779 = vmatpush.bf16.msrb.mxu2 %v4144_v43  ;;  %1874 = vmatpush.bf16.msrb.mxu1 %v4144_v43 }
 0x54a   :  { %1966 = vmatpush.bf16.msrb.mxu0 %v4144_v43 }
 0x54b   :  { %1958 = vmatpush.bf16.msrb.mxu3 %v4093_v13 }
 0x54d   :  { %1780 = vmatpush.bf16.msrb.mxu2 %v4155_v10  ;;  %1875 = vmatpush.bf16.msrb.mxu1 %v4155_v10 }
 0x54e   :  { %1967 = vmatpush.bf16.msrb.mxu0 %v4155_v10 }
 0x54f   :  { %1959 = vmatpush.bf16.msrb.mxu3 %v4104_v17 }
 0x551   :  { %1781 = vmatpush.bf16.msrb.mxu2 %v4168_v20  ;;  %1876 = vmatpush.bf16.msrb.mxu1 %v4168_v20 }
 0x552   :  { %1968 = vmatpush.bf16.msrb.mxu0 %v4168_v20 }
 0x555   :  { %1782 = vmatpush.bf16.msrb.mxu2 %v4186_v0  ;;  %1877 = vmatpush.bf16.msrb.mxu1 %v4186_v0 }
 0x556   :  { %1969 = vmatpush.bf16.msrb.mxu0 %v4186_v0 }
 0x559   :  { %1783 = vmatpush.bf16.msrb.mxu2 %v4199_v14  ;;  %1878 = vmatpush.bf16.msrb.mxu1 %v4199_v14 }
 0x55a   :  { %1970 = vmatpush.bf16.msrb.mxu0 %v4199_v14 }
 0x58f   :  { %v1219_v23 = vpop.f32.mrf.mxu0 }
 0x590   :  { %v1262_v28 = vadd.f32 %v1219_v23, %v305_v12  ;;  %v4125_v42 = vpop.f32.mrf.mxu1  ;;  %v3080_v12 = vld [vmem:[%s4541_s3 + $0xe8] sm:$0xf0] }
 0x591   :  { %v1282_v56 = vadd.f32 %v3997_v44, %v4125_v42 }
 0x592   :  { %v2754_v34 = vmul.f32 -1.442695, %v1262_v28  ;;  %v4208_v28 = vor.u32 %v3080_v12, %v2908_v30 }
 0x594   :  { %3197 = vpow2.f32 %v2754_v34  ;;  %1784 = vmatpush.bf16.msrb.mxu2 %v4208_v28  ;;  %1879 = vmatpush.bf16.msrb.mxu1 %v4208_v28 }
 0x595   :  { %v1206_v15 = vpop.f32.mrf.mxu3  ;;  %1971 = vmatpush.bf16.msrb.mxu0 %v4208_v28 }
 0x596   :  { %v1242_v24 = vadd.f32 %v1206_v15, %v276_v48 }
 0x597   :  { %v1221_v47 = vpop.f32.mrf.mxu0 }
 0x598   :  { %v2753_v3 = vmul.f32 -1.442695, %v1242_v24  ;;  %v1234_v32 = vpop.f32.mrf.mxu1  ;;  %v4222_v24 = vor.u32 %v3077_v57, %v2896_v18 }
 0x59a   :  { %v3198_v39 = vpop.eup %3197  ;;  %3199 = vpow2.f32 %v2753_v3  ;;  %1785 = vmatpush.bf16.msrb.mxu2 %v4222_v24  ;;  %1880 = vmatpush.bf16.msrb.mxu1 %v4222_v24 }
 0x59b   :  { %v4165_v25 = vadd.f32 1.0, %v3198_v39  ;;  %v4555_v39 = vld [vmem:[#allocation11_spill] sm:$0xff]  ;;  %1972 = vmatpush.bf16.msrb.mxu0 %v4222_v24 }
 0x59c   :  { %v334_v63 = vadd.f32 %v4555_v39, %v3696_v33 }
 0x59d   :  { %v1208_v35 = vpop.f32.mrf.mxu3  ;;  %3201 = vrcp.f32 %v4165_v25  ;;  %v1278_v16 = vand.u32 2147483648, %v4165_v25  ;;  %vm1272_vm13 = vweird.f32 %v4165_v25  ;;  %v1276_v44 = vand.u32 2147483647, %v4165_v25 }
 0x59e   :  { %1939 = vmatpush.bf16.msra.mxu2 %v3919_v26  ;;  %2031 = vmatpush.bf16.msra.mxu1 %v3919_v26 }
 0x59f   :  { %vm1277_vm15 = vcmp.eq.f32.partialorder %v1276_v44, 8.507059e+37 }
 0x5a0   :  { %v3200_v40 = vpop.eup %3199  ;;  %v4173_v36 = vpop.f32.mrf.mxu1 }
 0x5a1   :  { %v1246_v38 = vadd.f32 1.0, %v3200_v40  ;;  %v1279_v40 = vor.u32 1.1754944e-38, %v1278_v16 }
 0x5a2   :  { %1940 = vmatpush.bf16.msra.mxu2 %v3928_v51  ;;  %2032 = vmatpush.bf16.msra.mxu1 %v3928_v51 }
 0x5a3   :  { %3203 = vrcp.f32 %v1246_v38  ;;  %v4178_v46 = vpop.eup %3201  ;;  %v1258_v34 = vand.u32 2147483648, %v1246_v38  ;;  %v1256_v58 = vand.u32 2147483647, %v1246_v38  ;;  %vm1252_vm9 = vweird.f32 %v1246_v38 }
 0x5a4   :  { %v1268_v6 = vmul.f32 %v4178_v46, %v4165_v25  ;;  %vm1273_vm12 = vweird.f32 %v4178_v46 }
 0x5a5   :  { %v1259_v54 = vor.u32 1.1754944e-38, %v1258_v34  ;;  %vm1257_vm11 = vcmp.eq.f32.partialorder %v1256_v58, 8.507059e+37  ;;  %vm1274_vm14 = vmor %vm1272_vm13, %vm1273_vm12 }
 0x5a6   :  { %v1269_v11 = vsub.f32 1.0, %v1268_v6  ;;  %1941 = vmatpush.bf16.msra.mxu2 %v3937_v8  ;;  %2033 = vmatpush.bf16.msra.mxu1 %v3937_v8 }
 0x5a8   :  { %v1763_v53 = vpop.f32.mrf.mxu1  ;;  %v1270_v31 = vmul.f32 %v4178_v46, %v1269_v11 }
 0x5a9   :  { %v3204_v61 = vpop.eup %3203 }
 0x5aa   :  { %v1248_v7 = vmul.f32 %v3204_v61, %v1246_v38  ;;  %vm1253_vm8 = vweird.f32 %v3204_v61  ;;  %v1271_v32 = vadd.f32 %v4178_v46, %v1270_v31  ;;  %1942 = vmatpush.bf16.msra.mxu2 %v3948_v4  ;;  %2034 = vmatpush.bf16.msra.mxu1 %v3948_v4 }
 0x5ab   :  { %vm1254_vm10 = vmor %vm1252_vm9, %vm1253_vm8 }
 0x5ac   :  { %v1249_v23 = vsub.f32 1.0, %v1248_v7  ;;  %v1275_v33 = vsel %vm1274_vm14, %v4178_v46, %v1271_v32 }
 0x5ad   :  { %v1280_v9 = vsel %vm1277_vm15, %v1279_v40, %v1275_v33 }
 0x5ae   :  { %v1250_v55 = vmul.f32 %v3204_v61, %v1249_v23  ;;  %v1286_v25 = vsub.f32 1.0, %v1280_v9  ;;  %v1288_v53 = vmul.f32 %v1280_v9, %v4012_v62  ;;  %1943 = vmatpush.bf16.msra.mxu2 %v3958_v41  ;;  %2035 = vmatpush.bf16.msra.mxu1 %v3958_v41  ;;  %v1513_v23 = vpop.f32.mrf.mxu3  ;;  %v4297_v9 = vld [vmem:[%s4543_s5 + $0x1] ss:$0 sm:$0xff] }
 0x5b0   :  { %v1251_v48 = vadd.f32 %v3204_v61, %v1250_v55  ;;  %v4219_v15 = vpop.f32.mrf.mxu1 }
 0x5b2   :  { %v1255_v47 = vsel %vm1254_vm10, %v3204_v61, %v1251_v48  ;;  %1944 = vmatpush.bf16.msra.mxu2 %v3969_v52  ;;  %2036 = vmatpush.bf16.msra.mxu1 %v3969_v52 }
 0x5b3   :  { %v1260_v3 = vsel %vm1257_vm11, %v1259_v54, %v1255_v47 }
 0x5b4   :  { %v1283_v35 = vmul.f32 %v1282_v56, %v1260_v3 }
 0x5b6   :  { %v1284_v42 = vadd.f32 %v1283_v35, %v334_v63  ;;  %1945 = vmatpush.bf16.msra.mxu2 %v3978_v2  ;;  %2037 = vmatpush.bf16.msra.mxu1 %v3978_v2 }
 0x5b8   :  { %3205 = vtanh.f32 %v1284_v42  ;;  %v1776_v38 = vpop.f32.mrf.mxu1 }
 0x5ba   :  { %1946 = vmatpush.bf16.msra.mxu2 %v3990_v19  ;;  %2038 = vmatpush.bf16.msra.mxu1 %v3990_v19 }
 0x5be   :  { %v3206_v59 = vpop.eup %3205 }
 0x5bf   :  { %v1287_v6 = vmul.f32 %v3206_v59, %v1286_v25 }
 0x5c1   :  { %v1289_v61 = vadd.f32 %v1288_v53, %v1287_v6  ;;  %v1542_v53 = vpop.f32.mrf.mxu0 }
 0x5c3   :  { %1292 = vst [vmem:[%s4545_s7] sm:$0xff] %v1289_v61  ;;  %v1304_v46 = vpack.c.bf16 %v1289_v61, %v4012_v62  ;;  %v1484_v62 = vpop.f32.mrf.mxu2 }
 0x5c5   :  { %1498 = vmatmul.bf16.gmra.mxu2 %v1304_v46  ;;  %1527 = vmatmul.bf16.gmra.mxu3 %v1304_v46 }
 0x5c6   :  { %1556 = vmatmul.bf16.gmra.mxu0 %v1304_v46 }
 0x5cb   :  { %v4269_v37 = vpop.f32.mrf.mxu2 }
 0x5d3   :  { %v4274_v60 = vpop.f32.mrf.mxu2 }
 0x5d5   :  { %1786 = vmatmul.bf16.vlgmr.msrb.gmra.mxu2 %v4064_v21  ;;  %v2755_v21 = vld [vmem:[%s4542_s4 + $0x3] sm:$0x7] }
 0x5d6   :  { %2044 = vmatpush.bf16.msrb.mxu2 %v4016_v1  ;;  %v4276_v7 = vperm.slane %v2755_v21, 0  ;;  %v4280_v12 = vperm.slane %v2755_v21, 1  ;;  %v4299_v59 = vperm.slane %v2755_v21, 2 }
 0x5d8   :  { %v1485_v11 = vadd.f32 %v1484_v62, %v4276_v7  ;;  %v1514_v58 = vadd.f32 %v1513_v23, %v4280_v12  ;;  %v1543_v23 = vadd.f32 %v1542_v53, %v4299_v59 }
 0x5da   :  { %2045 = vmatpush.bf16.msrb.mxu2 %v4026_v50  ;;  %v1794_v30 = vadd.f32 %v4173_v36, %v1485_v11  ;;  %v1814_v18 = vadd.f32 %v4219_v15, %v1514_v58 }
 0x5db   :  { %v4282_v34 = vpop.f32.mrf.mxu2 }
 0x5dc   :  { %v2982_v55 = vmul.f32 -1.442695, %v1794_v30  ;;  %v2983_v57 = vmul.f32 -1.442695, %v1814_v18 }
 0x5de   :  { %2046 = vmatpush.bf16.msrb.mxu2 %v4037_v5  ;;  %3207 = vpow2.f32 %v2982_v55 }
 0x5df   :  { %3209 = vpow2.f32 %v2983_v57 }
 0x5e2   :  { %2047 = vmatpush.bf16.msrb.mxu2 %v4048_v29 }
 0x5e3   :  { %v4286_v31 = vpop.f32.mrf.mxu2 }
 0x5e4   :  { %v3208_v48 = vpop.eup %3207 }
 0x5e5   :  { %v1798_v54 = vadd.f32 1.0, %v3208_v48  ;;  %v3210_v56 = vpop.eup %3209 }
 0x5e6   :  { %2048 = vmatpush.bf16.msrb.mxu2 %v4068_v22  ;;  %v1818_v47 = vadd.f32 1.0, %v3210_v56 }
 0x5e7   :  { %3211 = vrcp.f32 %v1798_v54  ;;  %v1810_v40 = vand.u32 2147483648, %v1798_v54  ;;  %vm1804_vm1 = vweird.f32 %v1798_v54  ;;  %v1808_v38 = vand.u32 2147483647, %v1798_v54 }
 0x5e8   :  { %3213 = vrcp.f32 %v1818_v47  ;;  %v1830_v55 = vand.u32 2147483648, %v1818_v47  ;;  %vm1824_vm5 = vweird.f32 %v1818_v47  ;;  %v1828_v18 = vand.u32 2147483647, %v1818_v47 }
 0x5e9   :  { %v1811_v46 = vor.u32 1.1754944e-38, %v1810_v40  ;;  %vm1809_vm3 = vcmp.eq.f32.partialorder %v1808_v38, 8.507059e+37 }
 0x5ea   :  { %2049 = vmatpush.bf16.msrb.mxu2 %v4082_v27  ;;  %v1831_v48 = vor.u32 1.1754944e-38, %v1830_v55  ;;  %vm1829_vm7 = vcmp.eq.f32.partialorder %v1828_v18, 8.507059e+37 }
 0x5eb   :  { %v4288_v36 = vpop.f32.mrf.mxu2 }
 0x5ed   :  { %v3212_v3 = vpop.eup %3211 }
 0x5ee   :  { %2050 = vmatpush.bf16.msrb.mxu2 %v4093_v13  ;;  %v1800_v32 = vmul.f32 %v3212_v3, %v1798_v54  ;;  %v3214_v63 = vpop.eup %3213  ;;  %vm1805_vm0 = vweird.f32 %v3212_v3 }
 0x5ef   :  { %v1820_v15 = vmul.f32 %v3214_v63, %v1818_v47  ;;  %vm1806_vm2 = vmor %vm1804_vm1, %vm1805_vm0  ;;  %vm1825_vm4 = vweird.f32 %v3214_v63  ;;  %v1515_v47 = vpop.f32.mrf.mxu3 }
 0x5f0   :  { %v1801_v16 = vsub.f32 1.0, %v1800_v32  ;;  %vm1826_vm6 = vmor %vm1824_vm5, %vm1825_vm4 }
 0x5f1   :  { %v1821_v42 = vsub.f32 1.0, %v1820_v15 }
 0x5f2   :  { %2051 = vmatpush.bf16.msrb.mxu2 %v4104_v17  ;;  %v1802_v35 = vmul.f32 %v3212_v3, %v1801_v16 }
 0x5f3   :  { %v1822_v25 = vmul.f32 %v3214_v63, %v1821_v42 }
 0x5f4   :  { %v1803_v33 = vadd.f32 %v3212_v3, %v1802_v35 }
 0x5f5   :  { %v1823_v11 = vadd.f32 %v3214_v63, %v1822_v25 }
 0x5f6   :  { %v1807_v6 = vsel %vm1806_vm2, %v3212_v3, %v1803_v33 }
 0x5f7   :  { %v1812_v30 = vsel %vm1809_vm3, %v1811_v46, %v1807_v6  ;;  %v1827_v21 = vsel %vm1826_vm6, %v3214_v63, %v1823_v11  ;;  %v4334_v33 = vpop.f32.mrf.mxu3 }
 0x5f8   :  { %v1832_v56 = vsel %vm1829_vm7, %v1831_v48, %v1827_v21  ;;  %v1487_v21 = vadd.f32 %v4269_v37, %v4276_v7 }
 0x5f9   :  { %v1841_v3 = vsub.f32 1.0, %v1832_v56  ;;  %v1843_v15 = vmul.f32 %v1832_v56, %v4053_v49  ;;  %v1544_v49 = vpop.f32.mrf.mxu0 }
 0x5ff   :  { %v4338_v38 = vpop.f32.mrf.mxu3 }
 0x601   :  { %v4332_v63 = vpop.f32.mrf.mxu0 }
 0x607   :  { %v4342_v6 = vpop.f32.mrf.mxu3 }
 0x609   :  { %v4336_v40 = vpop.f32.mrf.mxu0 }
 0x611   :  { %v4340_v25 = vpop.f32.mrf.mxu0 }
 0x619   :  { %v4344_v53 = vpop.f32.mrf.mxu0 }
 0x643   :  { %v4348_v46 = vpop.f32.mrf.mxu0 }
 0x644   :  { %4557 = vst [vmem:[#allocation9_spill] sm:$0xff] %v4348_v46 }
 0x648   :  { %v4290_v39 = vpop.f32.mrf.mxu2 }
 0x64b   :  { %v4352_v11 = vpop.f32.mrf.mxu0 }
 0x64c   :  { %4559 = vst [vmem:[#allocation8_spill] sm:$0xff] %v4352_v11 }
 0x650   :  { %v4292_v44 = vpop.f32.mrf.mxu2 }
 0x651   :  { %4556 = vst [vmem:[#allocation7_spill] sm:$0xff] %v4292_v44 }
 0x658   :  { %v1787_v61 = vpop.f32.mrf.mxu2 }
 0x659   :  { %v1837_v62 = vadd.f32 %v4297_v9, %v1787_v61  ;;  %v4346_v61 = vpop.f32.mrf.mxu3 }
 0x65b   :  { %v1838_v58 = vmul.f32 %v1837_v62, %v1812_v30 }
 0x65d   :  { %v1839_v57 = vadd.f32 %v1838_v58, %v1543_v23  ;;  %v1516_v23 = vadd.f32 %v1515_v47, %v4280_v12 }
 0x65f   :  { %3215 = vtanh.f32 %v1839_v57 }
 0x660   :  { %v1789_v54 = vpop.f32.mrf.mxu2 }
 0x661   :  { %v4350_v62 = vpop.f32.mrf.mxu3 }
 0x662   :  { %4558 = vst [vmem:[#allocation10_spill] sm:$0xff] %v4350_v62 }
 0x665   :  { %v3216_v32 = vpop.eup %3215 }
 0x666   :  { %v1842_v16 = vmul.f32 %v3216_v32, %v1841_v3 }
 0x668   :  { %v4304_v35 = vadd.f32 %v1843_v15, %v1842_v16 }
 0x669   :  { %v4354_v30 = vpop.f32.mrf.mxu3 }
 0x66a   :  { %v1846_v42 = vpack.c.bf16 %v4304_v35, %v4304_v35  ;;  %4560 = vst [vmem:[#allocation11_spill] sm:$0xff] %v4354_v30 }
 0x66c   :  { %1855 = vmatmul.bf16.vlgmr.msra.gmra.mxu3 %v1846_v42  ;;  %1868 = vmatmul.bf16.vlgmr.msra.gmra.mxu0 %v1846_v42 }
 0x66d   :  { %1881 = vmatmul.bf16.vlgmr.msrb.gmra.mxu1 %v1846_v42  ;;  %2057 = vmatpush.bf16.msra.mxu3 %v4133_v45 }
 0x66e   :  { %2123 = vmatpush.bf16.msra.mxu0 %v3919_v26  ;;  %2136 = vmatpush.bf16.msrb.mxu1 %v4016_v1 }
 0x671   :  { %2058 = vmatpush.bf16.msra.mxu3 %v4144_v43 }
 0x672   :  { %2124 = vmatpush.bf16.msra.mxu0 %v3928_v51  ;;  %2137 = vmatpush.bf16.msrb.mxu1 %v4026_v50 }
 0x675   :  { %2059 = vmatpush.bf16.msra.mxu3 %v4155_v10 }
 0x676   :  { %2125 = vmatpush.bf16.msra.mxu0 %v3937_v8  ;;  %2138 = vmatpush.bf16.msrb.mxu1 %v4037_v5 }
 0x679   :  { %2060 = vmatpush.bf16.msra.mxu3 %v4168_v20 }
 0x67a   :  { %2126 = vmatpush.bf16.msra.mxu0 %v3948_v4  ;;  %2139 = vmatpush.bf16.msrb.mxu1 %v4048_v29 }
 0x67d   :  { %2061 = vmatpush.bf16.msra.mxu3 %v4186_v0 }
 0x67e   :  { %2127 = vmatpush.bf16.msra.mxu0 %v3958_v41  ;;  %2140 = vmatpush.bf16.msrb.mxu1 %v4068_v22 }
 0x681   :  { %2062 = vmatpush.bf16.msra.mxu3 %v4199_v14 }
 0x682   :  { %2128 = vmatpush.bf16.msra.mxu0 %v3969_v52  ;;  %2141 = vmatpush.bf16.msrb.mxu1 %v4082_v27 }
 0x685   :  { %2063 = vmatpush.bf16.msra.mxu3 %v4208_v28 }
 0x686   :  { %2129 = vmatpush.bf16.msra.mxu0 %v3978_v2  ;;  %2142 = vmatpush.bf16.msrb.mxu1 %v4093_v13 }
 0x689   :  { %2064 = vmatpush.bf16.msra.mxu3 %v4222_v24 }
 0x68a   :  { %2130 = vmatpush.bf16.msra.mxu0 %v3990_v19  ;;  %2143 = vmatpush.bf16.msrb.mxu1 %v4104_v17 }
 0x6e9   :  { %v1869_v55 = vpop.f32.mrf.mxu0 }
 0x6ea   :  { %v1909_v58 = vadd.f32 %v1869_v55, %v1516_v23  ;;  %v1882_v18 = vpop.f32.mrf.mxu1 }
 0x6ec   :  { %v2985_v57 = vmul.f32 -1.442695, %v1909_v58 }
 0x6ee   :  { %3217 = vpow2.f32 %v2985_v57 }
 0x6ef   :  { %v1856_v48 = vpop.f32.mrf.mxu3 }
 0x6f0   :  { %v1889_v54 = vadd.f32 %v1856_v48, %v1487_v21 }
 0x6f1   :  { %v1871_v56 = vpop.f32.mrf.mxu0 }
 0x6f2   :  { %v2984_v3 = vmul.f32 -1.442695, %v1889_v54  ;;  %v1884_v32 = vpop.f32.mrf.mxu1 }
 0x6f4   :  { %v3218_v16 = vpop.eup %3217  ;;  %3219 = vpow2.f32 %v2984_v3  ;;  %v1929_v3 = vadd.f32 %v4297_v9, %v1882_v18 }
 0x6f5   :  { %v1913_v15 = vadd.f32 1.0, %v3218_v16 }
 0x6f7   :  { %v1858_v42 = vpop.f32.mrf.mxu3  ;;  %3221 = vrcp.f32 %v1913_v15  ;;  %vm1919_vm13 = vweird.f32 %v1913_v15 }
 0x6f8   :  { %v1545_v42 = vadd.f32 %v1544_v49, %v4299_v59 }
 0x6fa   :  { %v3220_v11 = vpop.eup %3219 }
 0x6fb   :  { %v1893_v47 = vadd.f32 1.0, %v3220_v11 }
 0x6fd   :  { %3223 = vrcp.f32 %v1893_v47  ;;  %v3222_v23 = vpop.eup %3221  ;;  %v1905_v57 = vand.u32 2147483648, %v1893_v47  ;;  %v1903_v21 = vand.u32 2147483647, %v1893_v47  ;;  %vm1899_vm9 = vweird.f32 %v1893_v47 }
 0x6fe   :  { %v1915_v55 = vmul.f32 %v3222_v23, %v1913_v15  ;;  %vm1920_vm12 = vweird.f32 %v3222_v23 }
 0x6ff   :  { %v1906_v56 = vor.u32 1.1754944e-38, %v1905_v57  ;;  %vm1904_vm11 = vcmp.eq.f32.partialorder %v1903_v21, 8.507059e+37  ;;  %vm1921_vm14 = vmor %vm1919_vm13, %vm1920_vm12 }
 0x700   :  { %v1916_v44 = vsub.f32 1.0, %v1915_v55  ;;  %v1925_v55 = vand.u32 2147483648, %v1913_v15 }
 0x702   :  { %v1917_v48 = vmul.f32 %v3222_v23, %v1916_v44 }
 0x703   :  { %v3224_v58 = vpop.eup %3223 }
 0x704   :  { %v1895_v30 = vmul.f32 %v3224_v58, %v1893_v47  ;;  %vm1900_vm8 = vweird.f32 %v3224_v58  ;;  %v1918_v11 = vadd.f32 %v3222_v23, %v1917_v48 }
 0x705   :  { %vm1901_vm10 = vmor %vm1899_vm9, %vm1900_vm8 }
 0x706   :  { %v1896_v37 = vsub.f32 1.0, %v1895_v30  ;;  %v1922_v44 = vsel %vm1921_vm14, %v3222_v23, %v1918_v11  ;;  %v1519_v23 = vadd.f32 %v4334_v33, %v4280_v12 }
 0x708   :  { %v1897_v46 = vmul.f32 %v3224_v58, %v1896_v37  ;;  %v1923_v37 = vand.u32 2147483647, %v1913_v15 }
 0x70a   :  { %v1898_v54 = vadd.f32 %v3224_v58, %v1897_v46  ;;  %v1926_v46 = vor.u32 1.1754944e-38, %v1925_v55  ;;  %vm1924_vm15 = vcmp.eq.f32.partialorder %v1923_v37, 8.507059e+37 }
 0x70c   :  { %v1902_v32 = vsel %vm1901_vm10, %v3224_v58, %v1898_v54  ;;  %v1927_v47 = vsel %vm1924_vm15, %v1926_v46, %v1922_v44 }
 0x70d   :  { %v1907_v16 = vsel %vm1904_vm11, %v1906_v56, %v1902_v32  ;;  %v1933_v57 = vsub.f32 1.0, %v1927_v47  ;;  %v1935_v21 = vmul.f32 %v1927_v47, %v4304_v35 }
 0x70e   :  { %v1930_v30 = vmul.f32 %v1929_v3, %v1907_v16 }
 0x710   :  { %v1931_v62 = vadd.f32 %v1930_v30, %v1545_v42 }
 0x712   :  { %3225 = vtanh.f32 %v1931_v62  ;;  %v1490_v62 = vadd.f32 %v4274_v60, %v4276_v7 }
 0x718   :  { %v3226_v18 = vpop.eup %3225 }
 0x719   :  { %v1934_v58 = vmul.f32 %v3226_v18, %v1933_v57 }
 0x71b   :  { %v4362_v48 = vadd.f32 %v1935_v21, %v1934_v58 }
 0x71d   :  { %v1938_v49 = vpack.c.bf16 %v4362_v48, %v4362_v48  ;;  %v3102_v15 = vpack.c.bf16 %v4362_v48, %v4304_v35 }
 0x71f   :  { %1947 = vmatmul.bf16.vlgmr.msra.gmra.mxu2 %v1938_v49  ;;  %3103 = vst [vmem:[%s4544_s6] sm:$0xff] %v3102_v15   ;;  %1960 = vmatmul.bf16.vlgmr.msrb.gmra.mxu3 %v1938_v49 }
 0x720   :  { %1973 = vmatmul.bf16.vlgmr.msrb.gmra.mxu0 %v1938_v49  ;;  %2149 = vmatpush.bf16.msra.mxu2 %v4133_v45 }
 0x721   :  { %2215 = vmatpush.bf16.msrb.mxu3 %v3919_v26  ;;  %2228 = vmatpush.bf16.msrb.mxu0 %v4016_v1 }
 0x724   :  { %2150 = vmatpush.bf16.msra.mxu2 %v4144_v43 }
 0x725   :  { %2216 = vmatpush.bf16.msrb.mxu3 %v3928_v51  ;;  %2229 = vmatpush.bf16.msrb.mxu0 %v4026_v50 }
 0x728   :  { %2151 = vmatpush.bf16.msra.mxu2 %v4155_v10 }
 0x729   :  { %2217 = vmatpush.bf16.msrb.mxu3 %v3937_v8  ;;  %2230 = vmatpush.bf16.msrb.mxu0 %v4037_v5 }
 0x72c   :  { %2152 = vmatpush.bf16.msra.mxu2 %v4168_v20 }
 0x72d   :  { %2218 = vmatpush.bf16.msrb.mxu3 %v3948_v4  ;;  %2231 = vmatpush.bf16.msrb.mxu0 %v4048_v29 }
 0x730   :  { %2153 = vmatpush.bf16.msra.mxu2 %v4186_v0 }
 0x731   :  { %2219 = vmatpush.bf16.msrb.mxu3 %v3958_v41  ;;  %2232 = vmatpush.bf16.msrb.mxu0 %v4068_v22 }
 0x734   :  { %2154 = vmatpush.bf16.msra.mxu2 %v4199_v14 }
 0x735   :  { %2220 = vmatpush.bf16.msrb.mxu3 %v3969_v52  ;;  %2233 = vmatpush.bf16.msrb.mxu0 %v4082_v27 }
 0x738   :  { %2155 = vmatpush.bf16.msra.mxu2 %v4208_v28 }
 0x739   :  { %2221 = vmatpush.bf16.msrb.mxu3 %v3978_v2  ;;  %2234 = vmatpush.bf16.msrb.mxu0 %v4093_v13 }
 0x73c   :  { %2156 = vmatpush.bf16.msra.mxu2 %v4222_v24 }
 0x73d   :  { %2222 = vmatpush.bf16.msrb.mxu3 %v3990_v19  ;;  %2235 = vmatpush.bf16.msrb.mxu0 %v4104_v17 }
 0x79d   :  { %v1974_v35 = vpop.f32.mrf.mxu0 }
 0x7a2   :  { %v1948_v54 = vpop.f32.mrf.mxu2  ;;  %v1961_v56 = vpop.f32.mrf.mxu3 }
 0x7a3   :  { %v1981_v3 = vadd.f32 %v1948_v54, %v1490_v62  ;;  %v2001_v32 = vadd.f32 %v1961_v56, %v1519_v23 }
 0x7a5   :  { %v2986_v11 = vmul.f32 -1.442695, %v1981_v3  ;;  %v2987_v16 = vmul.f32 -1.442695, %v2001_v32  ;;  %v1976_v42 = vpop.f32.mrf.mxu0  ;;  %v2021_v3 = vadd.f32 %v4297_v9, %v1974_v35 }
 0x7a6   :  { %v1548_v42 = vadd.f32 %v4332_v63, %v4299_v59 }
 0x7a7   :  { %3227 = vpow2.f32 %v2986_v11 }
 0x7a8   :  { %3229 = vpow2.f32 %v2987_v16 }
 0x7aa   :  { %v1950_v55 = vpop.f32.mrf.mxu2  ;;  %v1963_v30 = vpop.f32.mrf.mxu3 }
 0x7ad   :  { %v3228_v37 = vpop.eup %3227 }
 0x7ae   :  { %v3230_v44 = vpop.eup %3229  ;;  %v1985_v46 = vadd.f32 1.0, %v3228_v37 }
 0x7af   :  { %v2005_v47 = vadd.f32 1.0, %v3230_v44 }
 0x7b0   :  { %3231 = vrcp.f32 %v1985_v46  ;;  %v1997_v21 = vand.u32 2147483648, %v1985_v46  ;;  %v1995_v62 = vand.u32 2147483647, %v1985_v46  ;;  %vm1991_vm1 = vweird.f32 %v1985_v46 }
 0x7b1   :  { %3233 = vrcp.f32 %v2005_v47  ;;  %v2017_v30 = vand.u32 2147483648, %v2005_v47  ;;  %vm2011_vm5 = vweird.f32 %v2005_v47  ;;  %v2015_v37 = vand.u32 2147483647, %v2005_v47 }
 0x7b2   :  { %v1998_v56 = vor.u32 1.1754944e-38, %v1997_v21  ;;  %vm1996_vm3 = vcmp.eq.f32.partialorder %v1995_v62, 8.507059e+37  ;;  %v1521_v62 = vadd.f32 %v4338_v38, %v4280_v12 }
 0x7b3   :  { %vm2016_vm7 = vcmp.eq.f32.partialorder %v2015_v37, 8.507059e+37 }
 0x7b6   :  { %v3232_v60 = vpop.eup %3231 }
 0x7b7   :  { %v3234_v57 = vpop.eup %3233  ;;  %v1987_v33 = vmul.f32 %v3232_v60, %v1985_v46  ;;  %vm1992_vm0 = vweird.f32 %v3232_v60  ;;  %v2018_v46 = vor.u32 1.1754944e-38, %v2017_v30 }
 0x7b8   :  { %v2007_v18 = vmul.f32 %v3234_v57, %v2005_v47  ;;  %vm1993_vm2 = vmor %vm1991_vm1, %vm1992_vm0  ;;  %vm2012_vm4 = vweird.f32 %v3234_v57 }
 0x7b9   :  { %v1988_v58 = vsub.f32 1.0, %v1987_v33  ;;  %vm2013_vm6 = vmor %vm2011_vm5, %vm2012_vm4 }
 0x7ba   :  { %v2008_v49 = vsub.f32 1.0, %v2007_v18 }
 0x7bb   :  { %v1989_v15 = vmul.f32 %v3232_v60, %v1988_v58 }
 0x7bc   :  { %v2009_v23 = vmul.f32 %v3234_v57, %v2008_v49 }
 0x7bd   :  { %v1990_v54 = vadd.f32 %v3232_v60, %v1989_v15 }
 0x7be   :  { %v2010_v16 = vadd.f32 %v3234_v57, %v2009_v23 }
 0x7bf   :  { %v1994_v32 = vsel %vm1993_vm2, %v3232_v60, %v1990_v54 }
 0x7c0   :  { %v1999_v11 = vsel %vm1996_vm3, %v1998_v56, %v1994_v32  ;;  %v2014_v33 = vsel %vm2013_vm6, %v3234_v57, %v2010_v16 }
 0x7c1   :  { %v2022_v55 = vmul.f32 %v2021_v3, %v1999_v11  ;;  %v2019_v18 = vsel %vm2016_vm7, %v2018_v46, %v2014_v33 }
 0x7c2   :  { %v2025_v35 = vsub.f32 1.0, %v2019_v18  ;;  %v2027_v21 = vmul.f32 %v2019_v18, %v4362_v48  ;;  %v1492_v48 = vadd.f32 %v4282_v34, %v4276_v7 }
 0x7c3   :  { %v2023_v44 = vadd.f32 %v2022_v55, %v1548_v42 }
 0x7c5   :  { %3235 = vtanh.f32 %v2023_v44 }
 0x7cb   :  { %v3236_v60 = vpop.eup %3235 }
 0x7cc   :  { %v2026_v58 = vmul.f32 %v3236_v60, %v2025_v35 }
 0x7ce   :  { %v4403_v49 = vadd.f32 %v2027_v21, %v2026_v58 }
 0x7d0   :  { %v2030_v63 = vpack.c.bf16 %v4403_v49, %v4403_v49 }
 0x7d2   :  { %2039 = vmatmul.bf16.vlgmr.msra.gmra.mxu1 %v2030_v63  ;;  %2052 = vmatmul.bf16.vlgmr.msrb.gmra.mxu2 %v2030_v63 }
 0x7d3   :  { %2065 = vmatmul.bf16.vlgmr.msra.gmra.mxu3 %v2030_v63  ;;  %2241 = vmatpush.bf16.msra.mxu1 %v4133_v45 }
 0x7d4   :  { %2307 = vmatpush.bf16.msrb.mxu2 %v3919_v26  ;;  %2320 = vmatpush.bf16.msra.mxu3 %v4016_v1 }
 0x7d7   :  { %2242 = vmatpush.bf16.msra.mxu1 %v4144_v43 }
 0x7d8   :  { %2308 = vmatpush.bf16.msrb.mxu2 %v3928_v51  ;;  %2321 = vmatpush.bf16.msra.mxu3 %v4026_v50 }
 0x7db   :  { %2243 = vmatpush.bf16.msra.mxu1 %v4155_v10 }
 0x7dc   :  { %2309 = vmatpush.bf16.msrb.mxu2 %v3937_v8  ;;  %2322 = vmatpush.bf16.msra.mxu3 %v4037_v5 }
 0x7df   :  { %2244 = vmatpush.bf16.msra.mxu1 %v4168_v20 }
 0x7e0   :  { %2310 = vmatpush.bf16.msrb.mxu2 %v3948_v4  ;;  %2323 = vmatpush.bf16.msra.mxu3 %v4048_v29 }
 0x7e3   :  { %2245 = vmatpush.bf16.msra.mxu1 %v4186_v0 }
 0x7e4   :  { %2311 = vmatpush.bf16.msrb.mxu2 %v3958_v41  ;;  %2324 = vmatpush.bf16.msra.mxu3 %v4068_v22 }
 0x7e7   :  { %2246 = vmatpush.bf16.msra.mxu1 %v4199_v14 }
 0x7e8   :  { %2312 = vmatpush.bf16.msrb.mxu2 %v3969_v52  ;;  %2325 = vmatpush.bf16.msra.mxu3 %v4082_v27 }
 0x7eb   :  { %2247 = vmatpush.bf16.msra.mxu1 %v4208_v28 }
 0x7ec   :  { %2313 = vmatpush.bf16.msrb.mxu2 %v3978_v2  ;;  %2326 = vmatpush.bf16.msra.mxu3 %v4093_v13 }
 0x7ef   :  { %2248 = vmatpush.bf16.msra.mxu1 %v4222_v24 }
 0x7f0   :  { %2314 = vmatpush.bf16.msrb.mxu2 %v3990_v19  ;;  %2327 = vmatpush.bf16.msra.mxu3 %v4104_v17 }
 0x84f   :  { %v2040_v47 = vpop.f32.mrf.mxu1 }
 0x850   :  { %v2073_v57 = vadd.f32 %v2040_v47, %v1492_v48 }
 0x852   :  { %v2988_v15 = vmul.f32 -1.442695, %v2073_v57  ;;  %v1550_v57 = vadd.f32 %v4336_v40, %v4299_v59 }
 0x854   :  { %3237 = vpow2.f32 %v2988_v15 }
 0x855   :  { %v2053_v23 = vpop.f32.mrf.mxu2 }
 0x856   :  { %v2093_v54 = vadd.f32 %v2053_v23, %v1521_v62  ;;  %v2066_v56 = vpop.f32.mrf.mxu3 }
 0x857   :  { %v2042_v3 = vpop.f32.mrf.mxu1  ;;  %v2113_v47 = vadd.f32 %v4297_v9, %v2066_v56 }
 0x858   :  { %v2989_v32 = vmul.f32 -1.442695, %v2093_v54 }
 0x85a   :  { %v3238_v11 = vpop.eup %3237  ;;  %3239 = vpow2.f32 %v2989_v32 }
 0x85b   :  { %v2077_v16 = vadd.f32 1.0, %v3238_v11 }
 0x85d   :  { %3241 = vrcp.f32 %v2077_v16  ;;  %v2055_v42 = vpop.f32.mrf.mxu2  ;;  %v2089_v46 = vand.u32 2147483648, %v2077_v16  ;;  %v2087_v18 = vand.u32 2147483647, %v2077_v16  ;;  %vm2083_vm9 = vweird.f32 %v2077_v16 }
 0x85e   :  { %v2068_v55 = vpop.f32.mrf.mxu3 }
 0x85f   :  { %v2090_v21 = vor.u32 1.1754944e-38, %v2089_v46  ;;  %vm2088_vm11 = vcmp.eq.f32.partialorder %v2087_v18, 8.507059e+37 }
 0x860   :  { %v3240_v30 = vpop.eup %3239 }
 0x861   :  { %v2097_v34 = vadd.f32 1.0, %v3240_v30 }
 0x863   :  { %v3242_v37 = vpop.eup %3241  ;;  %3243 = vrcp.f32 %v2097_v34  ;;  %v2109_v23 = vand.u32 2147483648, %v2097_v34  ;;  %v2107_v3 = vand.u32 2147483647, %v2097_v34  ;;  %vm2103_vm13 = vweird.f32 %v2097_v34 }
 0x864   :  { %v2079_v44 = vmul.f32 %v3242_v37, %v2077_v16  ;;  %vm2084_vm8 = vweird.f32 %v3242_v37 }
 0x865   :  { %vm2085_vm10 = vmor %vm2083_vm9, %vm2084_vm8  ;;  %v2110_v16 = vor.u32 1.1754944e-38, %v2109_v23  ;;  %vm2108_vm15 = vcmp.eq.f32.partialorder %v2107_v3, 8.507059e+37  ;;  %v1553_v23 = vadd.f32 %v4340_v25, %v4299_v59 }
 0x866   :  { %v2080_v33 = vsub.f32 1.0, %v2079_v44 }
 0x868   :  { %v2081_v38 = vmul.f32 %v3242_v37, %v2080_v33 }
 0x869   :  { %v3244_v35 = vpop.eup %3243 }
 0x86a   :  { %v2099_v60 = vmul.f32 %v3244_v35, %v2097_v34  ;;  %v2082_v58 = vadd.f32 %v3242_v37, %v2081_v38  ;;  %vm2104_vm12 = vweird.f32 %v3244_v35 }
 0x86b   :  { %vm2105_vm14 = vmor %vm2103_vm13, %vm2104_vm12 }
 0x86c   :  { %v2100_v63 = vsub.f32 1.0, %v2099_v60  ;;  %v2086_v48 = vsel %vm2085_vm10, %v3242_v37, %v2082_v58 }
 0x86d   :  { %v2091_v15 = vsel %vm2088_vm11, %v2090_v21, %v2086_v48 }
 0x86e   :  { %v2101_v62 = vmul.f32 %v3244_v35, %v2100_v63  ;;  %v2114_v54 = vmul.f32 %v2113_v47, %v2091_v15 }
 0x870   :  { %v2102_v32 = vadd.f32 %v3244_v35, %v2101_v62  ;;  %v2115_v11 = vadd.f32 %v2114_v54, %v1550_v57 }
 0x872   :  { %v2106_v42 = vsel %vm2105_vm14, %v3244_v35, %v2102_v32  ;;  %3245 = vtanh.f32 %v2115_v11 }
 0x873   :  { %v2111_v55 = vsel %vm2108_vm15, %v2110_v16, %v2106_v42 }
 0x874   :  { %v2117_v30 = vsub.f32 1.0, %v2111_v55  ;;  %v2119_v40 = vmul.f32 %v2111_v55, %v4403_v49 }
 0x878   :  { %v3246_v56 = vpop.eup %3245 }
 0x879   :  { %v2118_v37 = vmul.f32 %v3246_v56, %v2117_v30 }
 0x87b   :  { %v4439_v44 = vadd.f32 %v2119_v40, %v2118_v37 }
 0x87d   :  { %v3107_v33 = vpack.c.bf16 %v4439_v44, %v4403_v49  ;;  %v2122_v34 = vpack.c.bf16 %v4439_v44, %v4439_v44 }
 0x87f   :  { %3119 = vst [vmem:[%s4544_s6 + $0x8] sm:$0xff] %v3107_v33   ;;  %2131 = vmatmul.bf16.vlgmr.msra.gmra.mxu0 %v2122_v34  ;;  %2144 = vmatmul.bf16.vlgmr.msrb.gmra.mxu1 %v2122_v34 }
 0x880   :  { %2157 = vmatmul.bf16.vlgmr.msra.gmra.mxu2 %v2122_v34  ;;  %2333 = vmatpush.bf16.msra.mxu0 %v4133_v45 }
 0x881   :  { %2399 = vmatpush.bf16.msrb.mxu1 %v3919_v26  ;;  %2412 = vmatpush.bf16.msra.mxu2 %v4016_v1  ;;  %v1495_v26 = vadd.f32 %v4286_v31, %v4276_v7 }
 0x884   :  { %2334 = vmatpush.bf16.msra.mxu0 %v4144_v43 }
 0x885   :  { %2400 = vmatpush.bf16.msrb.mxu1 %v3928_v51  ;;  %2413 = vmatpush.bf16.msra.mxu2 %v4026_v50  ;;  %v1524_v51 = vadd.f32 %v4342_v6, %v4280_v12 }
 0x888   :  { %2335 = vmatpush.bf16.msra.mxu0 %v4155_v10 }
 0x889   :  { %2401 = vmatpush.bf16.msrb.mxu1 %v3937_v8  ;;  %2414 = vmatpush.bf16.msra.mxu2 %v4037_v5 }
 0x88c   :  { %2336 = vmatpush.bf16.msra.mxu0 %v4168_v20 }
 0x88d   :  { %2402 = vmatpush.bf16.msrb.mxu1 %v3948_v4  ;;  %2415 = vmatpush.bf16.msra.mxu2 %v4048_v29 }
 0x890   :  { %2337 = vmatpush.bf16.msra.mxu0 %v4186_v0 }
 0x891   :  { %2403 = vmatpush.bf16.msrb.mxu1 %v3958_v41  ;;  %2416 = vmatpush.bf16.msra.mxu2 %v4068_v22 }
 0x894   :  { %2338 = vmatpush.bf16.msra.mxu0 %v4199_v14 }
 0x895   :  { %2404 = vmatpush.bf16.msrb.mxu1 %v3969_v52  ;;  %2417 = vmatpush.bf16.msra.mxu2 %v4082_v27 }
 0x898   :  { %2339 = vmatpush.bf16.msra.mxu0 %v4208_v28 }
 0x899   :  { %2405 = vmatpush.bf16.msrb.mxu1 %v3978_v2  ;;  %2418 = vmatpush.bf16.msra.mxu2 %v4093_v13 }
 0x89c   :  { %2340 = vmatpush.bf16.msra.mxu0 %v4222_v24 }
 0x89d   :  { %2406 = vmatpush.bf16.msrb.mxu1 %v3990_v19  ;;  %2419 = vmatpush.bf16.msra.mxu2 %v4104_v17 }
 0x8fc   :  { %v2132_v8 = vpop.f32.mrf.mxu0  ;;  %v2145_v4 = vpop.f32.mrf.mxu1 }
 0x8fd   :  { %v2165_v41 = vadd.f32 %v2132_v8, %v1495_v26  ;;  %v2185_v52 = vadd.f32 %v2145_v4, %v1524_v51 }
 0x8ff   :  { %v2990_v1 = vmul.f32 -1.442695, %v2165_v41  ;;  %v2991_v2 = vmul.f32 -1.442695, %v2185_v52 }
 0x901   :  { %3247 = vpow2.f32 %v2990_v1 }
 0x902   :  { %3249 = vpow2.f32 %v2991_v2 }
 0x903   :  { %v2158_v50 = vpop.f32.mrf.mxu2 }
 0x904   :  { %v2134_v5 = vpop.f32.mrf.mxu0  ;;  %v2147_v29 = vpop.f32.mrf.mxu1  ;;  %v2205_v57 = vadd.f32 %v4297_v9, %v2158_v50 }
 0x907   :  { %v3248_v19 = vpop.eup %3247 }
 0x908   :  { %v3250_v22 = vpop.eup %3249  ;;  %v2169_v27 = vadd.f32 1.0, %v3248_v19 }
 0x909   :  { %v2189_v13 = vadd.f32 1.0, %v3250_v22 }
 0x90a   :  { %3251 = vrcp.f32 %v2169_v27  ;;  %v2181_v35 = vand.u32 2147483648, %v2169_v27  ;;  %v2179_v58 = vand.u32 2147483647, %v2169_v27  ;;  %vm2175_vm1 = vweird.f32 %v2169_v27 }
 0x90b   :  { %3253 = vrcp.f32 %v2189_v13  ;;  %v2160_v17 = vpop.f32.mrf.mxu2  ;;  %v2201_v54 = vand.u32 2147483648, %v2189_v13  ;;  %vm2195_vm5 = vweird.f32 %v2189_v13  ;;  %v2199_v32 = vand.u32 2147483647, %v2189_v13 }
 0x90c   :  { %v2182_v48 = vor.u32 1.1754944e-38, %v2181_v35  ;;  %vm2180_vm3 = vcmp.eq.f32.partialorder %v2179_v58, 8.507059e+37 }
 0x90d   :  { %v2202_v42 = vor.u32 1.1754944e-38, %v2201_v54  ;;  %vm2200_vm7 = vcmp.eq.f32.partialorder %v2199_v32, 8.507059e+37  ;;  %v1500_v32 = vadd.f32 %v4290_v39, %v4276_v7 }
 0x910   :  { %v3252_v31 = vpop.eup %3251 }
 0x911   :  { %v3254_v6 = vpop.eup %3253  ;;  %v2171_v49 = vmul.f32 %v3252_v31, %v2169_v27  ;;  %vm2176_vm0 = vweird.f32 %v3252_v31 }
 0x912   :  { %v2191_v46 = vmul.f32 %v3254_v6, %v2189_v13  ;;  %vm2177_vm2 = vmor %vm2175_vm1, %vm2176_vm0  ;;  %vm2196_vm4 = vweird.f32 %v3254_v6 }
 0x913   :  { %v2172_v38 = vsub.f32 1.0, %v2171_v49  ;;  %vm2197_vm6 = vmor %vm2195_vm5, %vm2196_vm4 }
 0x914   :  { %v2192_v18 = vsub.f32 1.0, %v2191_v46 }
 0x915   :  { %v2173_v60 = vmul.f32 %v3252_v31, %v2172_v38  ;;  %v1555_v38 = vadd.f32 %v4344_v53, %v4299_v59 }
 0x916   :  { %v2193_v21 = vmul.f32 %v3254_v6, %v2192_v18 }
 0x917   :  { %v2174_v63 = vadd.f32 %v3252_v31, %v2173_v60 }
 0x918   :  { %v2194_v15 = vadd.f32 %v3254_v6, %v2193_v21 }
 0x919   :  { %v2178_v47 = vsel %vm2177_vm2, %v3252_v31, %v2174_v63 }
 0x91a   :  { %v2183_v62 = vsel %vm2180_vm3, %v2182_v48, %v2178_v47  ;;  %v2198_v16 = vsel %vm2197_vm6, %v3254_v6, %v2194_v15 }
 0x91b   :  { %v2206_v3 = vmul.f32 %v2205_v57, %v2183_v62  ;;  %v2203_v55 = vsel %vm2200_vm7, %v2202_v42, %v2198_v16 }
 0x91c   :  { %v2209_v30 = vsub.f32 1.0, %v2203_v55  ;;  %v2211_v40 = vmul.f32 %v2203_v55, %v4439_v44  ;;  %v1526_v44 = vadd.f32 %v4346_v61, %v4280_v12 }
 0x91d   :  { %v2207_v11 = vadd.f32 %v2206_v3, %v1553_v23 }
 0x91f   :  { %3255 = vtanh.f32 %v2207_v11  ;;  %v4561_v11 = vld [vmem:[#allocation10_spill] sm:$0xff] }
 0x920   :  { %v1529_v16 = vadd.f32 %v4561_v11, %v4280_v12 }
 0x925   :  { %v3256_v56 = vpop.eup %3255 }
 0x926   :  { %v2210_v37 = vmul.f32 %v3256_v56, %v2209_v30 }
 0x928   :  { %v4480_v33 = vadd.f32 %v2211_v40, %v2210_v37 }
 0x92a   :  { %v2214_v25 = vpack.c.bf16 %v4480_v33, %v4480_v33 }
 0x92c   :  { %2223 = vmatmul.bf16.vlgmr.msrb.gmra.mxu3 %v2214_v25  ;;  %2236 = vmatmul.bf16.vlgmr.msrb.gmra.mxu0 %v2214_v25 }
 0x92d   :  { %2249 = vmatmul.bf16.vlgmr.msra.gmra.mxu1 %v2214_v25  ;;  %2425 = vmatpush.bf16.msrb.mxu3 %v4133_v45 }
 0x931   :  { %2426 = vmatpush.bf16.msrb.mxu3 %v4144_v43  ;;  %v1497_v43 = vadd.f32 %v4288_v36, %v4276_v7 }
 0x935   :  { %2427 = vmatpush.bf16.msrb.mxu3 %v4155_v10 }
 0x939   :  { %2428 = vmatpush.bf16.msrb.mxu3 %v4168_v20 }
 0x93d   :  { %2429 = vmatpush.bf16.msrb.mxu3 %v4186_v0 }
 0x941   :  { %2430 = vmatpush.bf16.msrb.mxu3 %v4199_v14 }
 0x945   :  { %2431 = vmatpush.bf16.msrb.mxu3 %v4208_v28 }
 0x949   :  { %2432 = vmatpush.bf16.msrb.mxu3 %v4222_v24 }
 0x9a9   :  { %v2237_v34 = vpop.f32.mrf.mxu0 }
 0x9aa   :  { %v2277_v26 = vadd.f32 %v2237_v34, %v1526_v44  ;;  %v2250_v45 = vpop.f32.mrf.mxu1 }
 0x9ab   :  { %v2297_v31 = vadd.f32 %v4297_v9, %v2250_v45 }
 0x9ac   :  { %v2993_v51 = vmul.f32 -1.442695, %v2277_v26 }
 0x9ae   :  { %3257 = vpow2.f32 %v2993_v51 }
 0x9af   :  { %v2224_v10 = vpop.f32.mrf.mxu3 }
 0x9b0   :  { %v2257_v20 = vadd.f32 %v2224_v10, %v1497_v43 }
 0x9b1   :  { %v2239_v0 = vpop.f32.mrf.mxu0 }
 0x9b2   :  { %v2992_v8 = vmul.f32 -1.442695, %v2257_v20  ;;  %v2252_v14 = vpop.f32.mrf.mxu1 }
 0x9b4   :  { %v3258_v4 = vpop.eup %3257  ;;  %3259 = vpow2.f32 %v2992_v8 }
 0x9b5   :  { %v2281_v28 = vadd.f32 1.0, %v3258_v4 }
 0x9b7   :  { %v2226_v24 = vpop.f32.mrf.mxu3  ;;  %3261 = vrcp.f32 %v2281_v28  ;;  %v2293_v18 = vand.u32 2147483648, %v2281_v28  ;;  %vm2287_vm13 = vweird.f32 %v2281_v28  ;;  %v2291_v60 = vand.u32 2147483647, %v2281_v28 }
 0x9b9   :  { %v2294_v63 = vor.u32 1.1754944e-38, %v2293_v18  ;;  %vm2292_vm15 = vcmp.eq.f32.partialorder %v2291_v60, 8.507059e+37 }
 0x9ba   :  { %v3260_v41 = vpop.eup %3259 }
 0x9bb   :  { %v2261_v61 = vadd.f32 1.0, %v3260_v41 }
 0x9bd   :  { %3263 = vrcp.f32 %v2261_v61  ;;  %v3262_v52 = vpop.eup %3261  ;;  %v2273_v29 = vand.u32 2147483648, %v2261_v61  ;;  %v2271_v22 = vand.u32 2147483647, %v2261_v61  ;;  %vm2267_vm9 = vweird.f32 %v2261_v61 }
 0x9be   :  { %v2283_v1 = vmul.f32 %v3262_v52, %v2281_v28  ;;  %vm2288_vm12 = vweird.f32 %v3262_v52 }
 0x9bf   :  { %v2274_v17 = vor.u32 1.1754944e-38, %v2273_v29  ;;  %vm2272_vm11 = vcmp.eq.f32.partialorder %v2271_v22, 8.507059e+37  ;;  %vm2289_vm14 = vmor %vm2287_vm13, %vm2288_vm12 }
 0x9c0   :  { %v2284_v5 = vsub.f32 1.0, %v2283_v1 }
 0x9c2   :  { %v2285_v27 = vmul.f32 %v3262_v52, %v2284_v5  ;;  %v4562_v5 = vld [vmem:[#allocation9_spill] sm:$0xff] }
 0x9c3   :  { %v3264_v2 = vpop.eup %3263 }
 0x9c4   :  { %v2263_v50 = vmul.f32 %v3264_v2, %v2261_v61  ;;  %vm2268_vm8 = vweird.f32 %v3264_v2  ;;  %v2286_v49 = vadd.f32 %v3262_v52, %v2285_v27 }
 0x9c5   :  { %vm2269_vm10 = vmor %vm2267_vm9, %vm2268_vm8 }
 0x9c6   :  { %v2264_v36 = vsub.f32 1.0, %v2263_v50  ;;  %v2290_v21 = vsel %vm2289_vm14, %v3262_v52, %v2286_v49 }
 0x9c7   :  { %v2295_v48 = vsel %vm2292_vm15, %v2294_v63, %v2290_v21 }
 0x9c8   :  { %v2265_v19 = vmul.f32 %v3264_v2, %v2264_v36  ;;  %v2301_v47 = vsub.f32 1.0, %v2295_v48  ;;  %v2303_v62 = vmul.f32 %v2295_v48, %v4480_v33  ;;  %v1558_v36 = vadd.f32 %v4562_v5, %v4299_v59  ;;  %v4564_v48 = vld [vmem:[#allocation11_spill] sm:$0xff] }
 0x9ca   :  { %v2266_v13 = vadd.f32 %v3264_v2, %v2265_v19 }
 0x9cc   :  { %v2270_v6 = vsel %vm2269_vm10, %v3264_v2, %v2266_v13 }
 0x9cd   :  { %v2275_v46 = vsel %vm2272_vm11, %v2274_v17, %v2270_v6 }
 0x9ce   :  { %v2298_v35 = vmul.f32 %v2297_v31, %v2275_v46 }
 0x9d0   :  { %v2299_v58 = vadd.f32 %v2298_v35, %v1555_v38  ;;  %v4563_v35 = vld [vmem:[#allocation7_spill] sm:$0xff] }
 0x9d1   :  { %v1502_v60 = vadd.f32 %v4563_v35, %v4276_v7 }
 0x9d2   :  { %3265 = vtanh.f32 %v2299_v58 }
 0x9d8   :  { %v3266_v57 = vpop.eup %3265 }
 0x9d9   :  { %v2302_v15 = vmul.f32 %v3266_v57, %v2301_v47  ;;  %v1531_v47 = vadd.f32 %v4564_v48, %v4280_v12 }
 0x9db   :  { %v4500_v23 = vadd.f32 %v2303_v62, %v2302_v15 }
 0x9dd   :  { %v2306_v53 = vpack.c.bf16 %v4500_v23, %v4500_v23  ;;  %v3112_v54 = vpack.c.bf16 %v4500_v23, %v4480_v33 }
 0x9df   :  { %2315 = vmatmul.bf16.vlgmr.msrb.gmra.mxu2 %v2306_v53  ;;  %3120 = vst [vmem:[%s4544_s6 + $0x10] sm:$0xff] %v3112_v54   ;;  %2328 = vmatmul.bf16.vlgmr.msra.gmra.mxu3 %v2306_v53 }
 0x9e0   :  { %2341 = vmatmul.bf16.vlgmr.msra.gmra.mxu0 %v2306_v53 }
 0xa5d   :  { %v2342_v3 = vpop.f32.mrf.mxu0 }
 0xa5e   :  { %v2389_v52 = vadd.f32 %v4297_v9, %v2342_v3 }
 0xa62   :  { %v2316_v42 = vpop.f32.mrf.mxu2  ;;  %v2329_v55 = vpop.f32.mrf.mxu3 }
 0xa63   :  { %v2349_v30 = vadd.f32 %v2316_v42, %v1500_v32  ;;  %v2369_v56 = vadd.f32 %v2329_v55, %v1529_v16 }
 0xa65   :  { %v2994_v37 = vmul.f32 -1.442695, %v2349_v30  ;;  %v2995_v40 = vmul.f32 -1.442695, %v2369_v56  ;;  %v2344_v33 = vpop.f32.mrf.mxu0 }
 0xa67   :  { %3267 = vpow2.f32 %v2994_v37 }
 0xa68   :  { %3269 = vpow2.f32 %v2995_v40 }
 0xa6a   :  { %v2318_v25 = vpop.f32.mrf.mxu2  ;;  %v2331_v44 = vpop.f32.mrf.mxu3 }
 0xa6d   :  { %v3268_v34 = vpop.eup %3267 }
 0xa6e   :  { %v3270_v26 = vpop.eup %3269  ;;  %v2353_v45 = vadd.f32 1.0, %v3268_v34 }
 0xa6f   :  { %v2373_v51 = vadd.f32 1.0, %v3270_v26 }
 0xa70   :  { %3271 = vrcp.f32 %v2353_v45  ;;  %v2365_v8 = vand.u32 2147483648, %v2353_v45  ;;  %v2363_v28 = vand.u32 2147483647, %v2353_v45  ;;  %vm2359_vm1 = vweird.f32 %v2353_v45 }
 0xa71   :  { %3273 = vrcp.f32 %v2373_v51  ;;  %v2385_v19 = vand.u32 2147483648, %v2373_v51  ;;  %vm2379_vm5 = vweird.f32 %v2373_v51  ;;  %v2383_v22 = vand.u32 2147483647, %v2373_v51 }
 0xa72   :  { %v2366_v61 = vor.u32 1.1754944e-38, %v2365_v8  ;;  %vm2364_vm3 = vcmp.eq.f32.partialorder %v2363_v28, 8.507059e+37 }
 0xa73   :  { %v2386_v17 = vor.u32 1.1754944e-38, %v2385_v19  ;;  %vm2384_vm7 = vcmp.eq.f32.partialorder %v2383_v22, 8.507059e+37 }
 0xa76   :  { %v3272_v39 = vpop.eup %3271 }
 0xa77   :  { %v3274_v43 = vpop.eup %3273  ;;  %v2355_v10 = vmul.f32 %v3272_v39, %v2353_v45  ;;  %vm2360_vm0 = vweird.f32 %v3272_v39  ;;  %v3288_v45 = vld [vmem:[%s4543_s5 + $0x1] ss:$0 sm:$0xff] }
 0xa78   :  { %v2375_v20 = vmul.f32 %v3274_v43, %v2373_v51  ;;  %vm2361_vm2 = vmor %vm2359_vm1, %vm2360_vm0  ;;  %vm2380_vm4 = vweird.f32 %v3274_v43 }
 0xa79   :  { %v2356_v0 = vsub.f32 1.0, %v2355_v10  ;;  %vm2381_vm6 = vmor %vm2379_vm5, %vm2380_vm4 }
 0xa7a   :  { %v2376_v14 = vsub.f32 1.0, %v2375_v20 }
 0xa7b   :  { %v2357_v4 = vmul.f32 %v3272_v39, %v2356_v0 }
 0xa7c   :  { %v2377_v24 = vmul.f32 %v3274_v43, %v2376_v14 }
 0xa7d   :  { %v2358_v41 = vadd.f32 %v3272_v39, %v2357_v4 }
 0xa7e   :  { %v2378_v50 = vadd.f32 %v3274_v43, %v2377_v24 }
 0xa7f   :  { %v2362_v1 = vsel %vm2361_vm2, %v3272_v39, %v2358_v41  ;;  %v4565_v39 = vld [vmem:[#allocation8_spill] sm:$0xff] }
 0xa80   :  { %v2367_v2 = vsel %vm2364_vm3, %v2366_v61, %v2362_v1  ;;  %v2382_v13 = vsel %vm2381_vm6, %v3274_v43, %v2378_v50  ;;  %v1560_v43 = vadd.f32 %v4565_v39, %v4299_v59 }
 0xa81   :  { %v2390_v29 = vmul.f32 %v2389_v52, %v2367_v2  ;;  %v2387_v31 = vsel %vm2384_vm7, %v2386_v17, %v2382_v13 }
 0xa82   :  { %v2393_v9 = vsub.f32 1.0, %v2387_v31  ;;  %v2395_v46 = vmul.f32 %v2387_v31, %v4500_v23 }
 0xa83   :  { %v2391_v27 = vadd.f32 %v2390_v29, %v1558_v36 }
 0xa85   :  { %3275 = vtanh.f32 %v2391_v27 }
 0xa8b   :  { %v3276_v6 = vpop.eup %3275 }
 0xa8c   :  { %v2394_v49 = vmul.f32 %v3276_v6, %v2393_v9 }
 0xa8e   :  { %v4517_v38 = vadd.f32 %v2395_v46, %v2394_v49 }
 0xa90   :  { %v2398_v18 = vpack.c.bf16 %v4517_v38, %v4517_v38 }
 0xa92   :  { %2407 = vmatmul.bf16.vlgmr.msrb.gmra.mxu1 %v2398_v18  ;;  %2420 = vmatmul.bf16.vlgmr.msra.gmra.mxu2 %v2398_v18 }
 0xa93   :  { %2433 = vmatmul.bf16.vlgmr.msrb.gmra.mxu3 %v2398_v18 }
 0xb0f   :  { %v2408_v58 = vpop.f32.mrf.mxu1 }
 0xb10   :  { %v2441_v21 = vadd.f32 %v2408_v58, %v1502_v60 }
 0xb12   :  { %v2996_v63 = vmul.f32 -1.442695, %v2441_v21 }
 0xb14   :  { %3277 = vpow2.f32 %v2996_v63 }
 0xb15   :  { %v2421_v57 = vpop.f32.mrf.mxu2 }
 0xb16   :  { %v2461_v15 = vadd.f32 %v2421_v57, %v1531_v47  ;;  %v2434_v62 = vpop.f32.mrf.mxu3 }
 0xb17   :  { %v2410_v23 = vpop.f32.mrf.mxu1  ;;  %v2481_v51 = vadd.f32 %v3288_v45, %v2434_v62 }
 0xb18   :  { %v2997_v53 = vmul.f32 -1.442695, %v2461_v15 }
 0xb1a   :  { %v3278_v54 = vpop.eup %3277  ;;  %3279 = vpow2.f32 %v2997_v53 }
 0xb1b   :  { %v2445_v3 = vadd.f32 1.0, %v3278_v54 }
 0xb1d   :  { %3281 = vrcp.f32 %v2445_v3  ;;  %v2423_v32 = vpop.f32.mrf.mxu2  ;;  %v2457_v56 = vand.u32 2147483648, %v2445_v3  ;;  %v2455_v37 = vand.u32 2147483647, %v2445_v3  ;;  %vm2451_vm9 = vweird.f32 %v2445_v3 }
 0xb1e   :  { %v2436_v11 = vpop.f32.mrf.mxu3 }
 0xb1f   :  { %v2458_v44 = vor.u32 1.1754944e-38, %v2457_v56  ;;  %vm2456_vm11 = vcmp.eq.f32.partialorder %v2455_v37, 8.507059e+37 }
 0xb20   :  { %v3280_v16 = vpop.eup %3279 }
 0xb21   :  { %v2465_v7 = vadd.f32 1.0, %v3280_v16 }
 0xb23   :  { %v3282_v42 = vpop.eup %3281  ;;  %3283 = vrcp.f32 %v2465_v7  ;;  %v2477_v0 = vand.u32 2147483648, %v2465_v7  ;;  %v2475_v14 = vand.u32 2147483647, %v2465_v7  ;;  %vm2471_vm13 = vweird.f32 %v2465_v7 }
 0xb24   :  { %v2447_v55 = vmul.f32 %v3282_v42, %v2445_v3  ;;  %vm2452_vm8 = vweird.f32 %v3282_v42 }
 0xb25   :  { %vm2453_vm10 = vmor %vm2451_vm9, %vm2452_vm8  ;;  %v2478_v24 = vor.u32 1.1754944e-38, %v2477_v0  ;;  %vm2476_vm15 = vcmp.eq.f32.partialorder %v2475_v14, 8.507059e+37 }
 0xb26   :  { %v2448_v30 = vsub.f32 1.0, %v2447_v55 }
 0xb28   :  { %v2449_v12 = vmul.f32 %v3282_v42, %v2448_v30 }
 0xb29   :  { %v3284_v40 = vpop.eup %3283 }
 0xb2a   :  { %v2467_v33 = vmul.f32 %v3284_v40, %v2465_v7  ;;  %v2450_v25 = vadd.f32 %v3282_v42, %v2449_v12  ;;  %vm2472_vm12 = vweird.f32 %v3284_v40 }
 0xb2b   :  { %vm2473_vm14 = vmor %vm2471_vm13, %vm2472_vm12 }
 0xb2c   :  { %v2468_v34 = vsub.f32 1.0, %v2467_v33  ;;  %v2454_v26 = vsel %vm2453_vm10, %v3282_v42, %v2450_v25 }
 0xb2d   :  { %v2459_v10 = vsel %vm2456_vm11, %v2458_v44, %v2454_v26 }
 0xb2e   :  { %v2469_v20 = vmul.f32 %v3284_v40, %v2468_v34  ;;  %v2482_v8 = vmul.f32 %v2481_v51, %v2459_v10 }
 0xb30   :  { %v2470_v4 = vadd.f32 %v3284_v40, %v2469_v20  ;;  %v2483_v28 = vadd.f32 %v2482_v8, %v1560_v43 }
 0xb32   :  { %v2474_v41 = vsel %vm2473_vm14, %v3284_v40, %v2470_v4  ;;  %3285 = vtanh.f32 %v2483_v28 }
 0xb33   :  { %v2479_v61 = vsel %vm2476_vm15, %v2478_v24, %v2474_v41 }
 0xb34   :  { %v2485_v52 = vsub.f32 1.0, %v2479_v61  ;;  %v2487_v59 = vmul.f32 %v2479_v61, %v4517_v38 }
 0xb38   :  { %v3286_v1 = vpop.eup %3285 }
 0xb39   :  { %v2486_v2 = vmul.f32 %v3286_v1, %v2485_v52 }
 0xb3b   :  { %v2488_v50 = vadd.f32 %v2487_v59, %v2486_v2 }
 0xb3d   :  { %2998 = vst [vmem:[%s4545_s7 + $0x8] sm:$0xff] %v2488_v50  ;;  %v3117_v5 = vpack.c.bf16 %v2488_v50, %v4517_v38 }
 0xb3f   :  { %3121 = vst [vmem:[%s4544_s6 + $0x18] sm:$0xff] %v3117_v5  }
 0xb40   :  { %2523 = vsyncpa [#allocation5], 1 }

</bundles_post_ra>
